<compile_context>
chip_gen: v5e
topology: v5e:2x2
jax: 0.10.0
libtpu: 0.0.40
codegen_flags: <defaults>
</compile_context>

<pallas_src>
import functools

import jax
import jax.numpy as jnp
from jax.experimental import pallas as pl
from jax.experimental.pallas import tpu as pltpu

EPS = 1e-5
_VMEM = pl.BlockSpec(memory_space=pltpu.MemorySpace.VMEM)


# ----------------------------------------------------------------------------
# Fused kernel
# ----------------------------------------------------------------------------
def _bn_relu(z, n_valid, gamma, beta):
    """Training-mode BatchNorm (batch stats over axis 0, biased var) + ReLU.

    Padded rows of `z` must be exactly zero: they contribute nothing to the
    sums and we divide by the real row count `n_valid`.
    """
    inv_n = 1.0 / float(n_valid)
    mean = jnp.sum(z, axis=0, keepdims=True) * inv_n
    msq = jnp.sum(z * z, axis=0, keepdims=True) * inv_n
    var = jnp.maximum(msq - mean * mean, 0.0)
    scale = gamma * jax.lax.rsqrt(var + EPS)
    shift = beta - mean * scale
    return jnp.maximum(z * scale + shift, 0.0)


def _supervisor_kernel(B, BP, OH1, OW1, OH2, OW2,
                       cls_x_ref, pat1_ref,
                       cls_w_ref, cls_g_ref, cls_b_ref,
                       c1_w_ref, c1_g_ref, c1_b_ref,
                       c2_w_ref, c2_g_ref, c2_b_ref,
                       p1_w_ref, p1_g_ref, p1_b_ref,
                       p2_w_ref, p2_b_ref,
                       o_ref,
                       a1_ref, patch_ref):
    f32, bf16 = jnp.float32, jnp.bfloat16
    C1 = 64                      # conv1 output channels
    n1 = OH1 * OW1               # conv1 spatial positions
    n2 = OH2 * OW2               # conv2 spatial positions

    # Row-validity masks: padded batch rows (b >= B) are forced to zero before
    # anything that reduces across rows (BN stats, pooling, the next matmul).
    rmask_b = (jax.lax.broadcasted_iota(jnp.int32, (BP, 1), 0) < B).astype(f32)
    rmask_1 = ((jax.lax.broadcasted_iota(jnp.int32, (n1 * BP, 1), 0) % BP) < B
               ).astype(f32)

    # --- class branch: Linear(10,128) -> BN1d -> ReLU (bias folded into BN) --
    zc = jnp.dot(cls_x_ref[...], cls_w_ref[...], preferred_element_type=f32)
    class_feat = _bn_relu(zc, B, cls_g_ref[...], cls_b_ref[...]) * rmask_b    # (BP,128)

    # --- conv1 (3x3, s2, 3->64) as one im2col matmul + BN2d + ReLU -----------
    z1 = jnp.dot(pat1_ref[...], c1_w_ref[...], preferred_element_type=f32)    # (n1*BP,64)
    a1_ref[...] = _bn_relu(z1, B * n1, c1_g_ref[...], c1_b_ref[...]) * rmask_1

    # --- conv2 im2col: 8-row-aligned block copies into a (n2*BP, 9*64) patch -
    # a1 rows are ordered (h, w, b_pad); each position is exactly one aligned
    # 8-row f32 sublane tile, so every copy is a clean static slice.
    for oh in range(OH2):
        for ow in range(OW2):
            dr = (oh * OW2 + ow) * BP
            for i in range(3):
                for j in range(3):
                    sr = ((2 * oh + i) * OW1 + (2 * ow + j)) * BP
                    patch_ref[pl.ds(dr, BP), pl.ds((i * 3 + j) * C1, C1)] = (
                        a1_ref[pl.ds(sr, BP), :])

    # --- conv2 (3x3, s2, 64->128) as ONE K=576 MXU matmul (single bf16 cast) -
    z2 = jnp.dot(patch_ref[...].astype(bf16), c2_w_ref[...],
                 preferred_element_type=f32)                                  # (n2*BP,128)

    # --- BN2d(128) + ReLU + AdaptiveAvgPool2d((1,1)) on the stacked array ----
    inv_n2 = 1.0 / float(B * n2)
    mean2 = jnp.sum(z2, axis=0, keepdims=True) * inv_n2
    var2 = jnp.maximum(jnp.sum(z2 * z2, axis=0, keepdims=True) * inv_n2
                       - mean2 * mean2, 0.0)
    scale2 = c2_g_ref[...] * jax.lax.rsqrt(var2 + EPS)
    shift2 = c2_b_ref[...] - mean2 * scale2
    relu2 = jnp.maximum(z2 * scale2 + shift2, 0.0)                            # (n2*BP,128)
    # Average over the n2 spatial positions; each position block is exactly
    # one (8,128) f32 vreg row, so these slices/adds are free-ish.
    img_feat = relu2[0:BP, :]
    for t in range(1, n2):
        img_feat = img_feat + relu2[t * BP:(t + 1) * BP, :]
    img_feat = img_feat * (rmask_b * (1.0 / n2))                              # (BP,128)

    # --- path_net: lane-aligned concat -> Linear(256,256)+BN1d+ReLU -> Linear
    pfeat = jnp.concatenate([class_feat, img_feat], axis=1).astype(bf16)      # (BP,256)
    zp = jnp.dot(pfeat, p1_w_ref[...], preferred_element_type=f32)            # (BP,256)
    h = _bn_relu(zp, B, p1_g_ref[...], p1_b_ref[...])
    out = jnp.dot(h.astype(bf16), p2_w_ref[...],
                  preferred_element_type=f32) + p2_b_ref[...]                 # (BP,P)
    # (B, P) store is a small masked partial vst; fine at this size.
    o_ref[...] = out[:B, :]


# ----------------------------------------------------------------------------
# Parameters (fresh init; pre-BN biases omitted — they cancel under train-mode BN)
# ----------------------------------------------------------------------------
def init_params(key, path_dim):
    ks = jax.random.split(key, 5)

    def w(k, shape, scale=0.05):
        return (scale * jax.random.normal(k, shape, dtype=jnp.float32)).astype(jnp.bfloat16)

    p = {}
    # class_features: Linear(10,128) + BN1d(128) + ReLU
    p["cls_w"] = w(ks[0], (10, 128))
    p["cls_g"] = jnp.ones((1, 128), jnp.float32)
    p["cls_be"] = jnp.zeros((1, 128), jnp.float32)
    # conv1: Conv2d(3,64,3,stride=2); weight (kh,kw,cin,cout) -> (27,64)
    p["c1_w"] = w(ks[1], (3, 3, 3, 64)).reshape(27, 64)
    p["c1_g"] = jnp.ones((1, 64), jnp.float32)
    p["c1_be"] = jnp.zeros((1, 64), jnp.float32)
    # conv2: Conv2d(64,128,3,stride=2); weight (kh,kw,cin,cout) -> (576,128)
    p["c2_w"] = w(ks[2], (3, 3, 64, 128)).reshape(9 * 64, 128)
    p["c2_g"] = jnp.ones((1, 128), jnp.float32)
    p["c2_be"] = jnp.zeros((1, 128), jnp.float32)
    # path_net: Linear(256,256)+BN1d+ReLU, Linear(256,path_dim) (with bias)
    p["p1_w"] = w(ks[3], (256, 256))
    p["p1_g"] = jnp.ones((1, 256), jnp.float32)
    p["p1_be"] = jnp.zeros((1, 256), jnp.float32)
    p["p2_w"] = w(ks[4], (256, path_dim))
    p["p2_b"] = jnp.zeros((1, path_dim), jnp.float32)
    return p


# ----------------------------------------------------------------------------
# Forward
# ----------------------------------------------------------------------------
def supervisor_forward(params, class_vec, img_nchw):
    B, Cin, H, W = img_nchw.shape
    K, S = 3, 2
    OH1, OW1 = (H - K) // S + 1, (W - K) // S + 1
    OH2, OW2 = (OH1 - K) // S + 1, (OW1 - K) // S + 1
    P = params["p2_w"].shape[1]
    BP = ((B + 7) // 8) * 8      # pad batch to a multiple of the 8-sublane tile

    # Zero-pad the batch: padded rows stay exactly zero through every pre-BN
    # matmul (no biases), so batch statistics are unaffected.
    cls_p = jnp.pad(class_vec, ((0, BP - B), (0, 0))).astype(jnp.bfloat16)
    img_p = jnp.pad(img_nchw, ((0, BP - B), (0, 0), (0, 0), (0, 0)))

    # conv1 im2col (one fused XLA data-movement op feeding the kernel).  Rows
    # ordered (h, w, b_pad) so every output position is one aligned 8-row
    # block, which the in-kernel conv2 im2col relies on.
    # TODO(synk): stride-2 taps with C=3 have no clean lane-aligned in-kernel
    # form, so conv1's im2col stays outside the kernel (single XLA fusion).
    x = jnp.transpose(img_p, (0, 2, 3, 1)).astype(jnp.float32)                # NHWC
    taps = [x[:, i:i + S * (OH1 - 1) + 1:S, j:j + S * (OW1 - 1) + 1:S, :]
            for i in range(K) for j in range(K)]
    patches = jnp.concatenate(taps, axis=-1)                                  # (BP,OH1,OW1,27)
    pat1 = jnp.transpose(patches, (1, 2, 0, 3)).reshape(OH1 * OW1 * BP, K * K * Cin)
    pat1 = pat1.astype(jnp.bfloat16)

    kernel = functools.partial(_supervisor_kernel, B, BP, OH1, OW1, OH2, OW2)

    flops = 2 * BP * (10 * 128 + OH1 * OW1 * 27 * 64
                      + OH2 * OW2 * 9 * 64 * 128 + 256 * 256 + 256 * P)
    bytes_accessed = ((pat1.size + cls_p.size) * 2
                      + (10 * 128 + 27 * 64 + 9 * 64 * 128 + 256 * 256 + 256 * P) * 2
                      + (2 * (128 + 64 + 128 + 256) + P) * 4
                      + B * P * 4)

    return pl.pallas_call(
        kernel,
        out_shape=jax.ShapeDtypeStruct((B, P), jnp.float32),
        in_specs=[_VMEM] * 16,
        out_specs=_VMEM,
        scratch_shapes=[pltpu.VMEM((OH1 * OW1 * BP, 64), jnp.float32),     # a1
                        pltpu.VMEM((OH2 * OW2 * BP, 9 * 64), jnp.float32)],  # conv2 patch
        cost_estimate=pl.CostEstimate(flops=int(flops), transcendentals=576,
                                      bytes_accessed=int(bytes_accessed)),
    )(cls_p, pat1,
      params["cls_w"], params["cls_g"], params["cls_be"],
      params["c1_w"], params["c1_g"], params["c1_be"],
      params["c2_w"], params["c2_g"], params["c2_be"],
      params["p1_w"], params["p1_g"], params["p1_be"],
      params["p2_w"], params["p2_b"])


if __name__ == "__main__":
    B, PATH_DIM = 4, 32
    key = jax.random.PRNGKey(0)
    k_param, k_cls, k_img = jax.random.split(key, 3)

    params = init_params(k_param, PATH_DIM)
    class_vec = jax.random.normal(k_cls, (B, 10), dtype=jnp.float32)
    img = jax.random.normal(k_img, (B, 3, 16, 16), dtype=jnp.float32)  # NCHW, like PyTorch

    out = jax.jit(supervisor_forward)(params, class_vec, img)
    out = jax.block_until_ready(out)
    assert out.shape == (B, PATH_DIM), out.shape
    assert bool(jnp.all(jnp.isfinite(out)))
    print("KERNEL_OK")
</pallas_src>

<mosaic_0001>
module attributes {stable_mosaic.version = 11 : i64} {
  func.func @_supervisor_kernel(%arg0: memref<8x10xbf16, #tpu.memory_space<vmem>>, %arg1: memref<392x27xbf16, #tpu.memory_space<vmem>>, %arg2: memref<10x128xbf16, #tpu.memory_space<vmem>>, %arg3: memref<1x128xf32, #tpu.memory_space<vmem>>, %arg4: memref<1x128xf32, #tpu.memory_space<vmem>>, %arg5: memref<27x64xbf16, #tpu.memory_space<vmem>>, %arg6: memref<1x64xf32, #tpu.memory_space<vmem>>, %arg7: memref<1x64xf32, #tpu.memory_space<vmem>>, %arg8: memref<576x128xbf16, #tpu.memory_space<vmem>>, %arg9: memref<1x128xf32, #tpu.memory_space<vmem>>, %arg10: memref<1x128xf32, #tpu.memory_space<vmem>>, %arg11: memref<256x256xbf16, #tpu.memory_space<vmem>>, %arg12: memref<1x256xf32, #tpu.memory_space<vmem>>, %arg13: memref<1x256xf32, #tpu.memory_space<vmem>>, %arg14: memref<256x32xbf16, #tpu.memory_space<vmem>>, %arg15: memref<1x32xf32, #tpu.memory_space<vmem>>, %arg16: memref<4x32xf32, #tpu.memory_space<vmem>>, %arg17: memref<392x64xf32, #tpu.memory_space<vmem>>, %arg18: memref<72x576xf32, #tpu.memory_space<vmem>>) attributes {dimension_semantics = [], scalar_prefetch = 0 : i64, scratch_operands = 2 : i64, tpu.core_type = #tpu.core_type<tc>} {
    %0 = tpu.iota {dimensions = array<i32: 0>} : vector<8x1xi32>
    %c4_i32 = arith.constant 4 : i32
    %1 = vector.broadcast %c4_i32 : i32 to vector<8x1xi32>
    %2 = arith.cmpi slt, %0, %1 : vector<8x1xi32>
    %3 = arith.extui %2 : vector<8x1xi1> to vector<8x1xi32>
    %4 = arith.sitofp %3 : vector<8x1xi32> to vector<8x1xf32>
    %5 = tpu.iota {dimensions = array<i32: 0>} : vector<392x1xi32>
    %c8_i32 = arith.constant 8 : i32
    %c0_i32 = arith.constant 0 : i32
    %6 = arith.cmpi eq, %c8_i32, %c0_i32 : i32
    %c1_i32 = arith.constant 1 : i32
    %7 = arith.select %6, %c1_i32, %c8_i32 : i32
    %8 = vector.broadcast %7 : i32 to vector<392x1xi32>
    %9 = arith.remsi %5, %8 : vector<392x1xi32>
    %c0_i32_0 = arith.constant 0 : i32
    %10 = vector.broadcast %c0_i32_0 : i32 to vector<392x1xi32>
    %11 = arith.cmpi ne, %9, %10 : vector<392x1xi32>
    %c0_i32_1 = arith.constant 0 : i32
    %12 = vector.broadcast %c0_i32_1 : i32 to vector<392x1xi32>
    %13 = arith.cmpi slt, %9, %12 : vector<392x1xi32>
    %c0_i32_2 = arith.constant 0 : i32
    %14 = arith.cmpi slt, %7, %c0_i32_2 : i32
    %15 = vector.broadcast %14 : i1 to vector<392x1xi1>
    %16 = vector.broadcast %15 : vector<392x1xi1> to vector<392x1xi1>
    %17 = arith.xori %13, %16 : vector<392x1xi1>
    %18 = arith.andi %17, %11 : vector<392x1xi1>
    %19 = vector.broadcast %7 : i32 to vector<392x1xi32>
    %20 = arith.addi %9, %19 : vector<392x1xi32>
    %21 = arith.select %18, %20, %9 : vector<392x1xi1>, vector<392x1xi32>
    %c4_i32_3 = arith.constant 4 : i32
    %22 = vector.broadcast %c4_i32_3 : i32 to vector<392x1xi32>
    %23 = arith.cmpi slt, %21, %22 : vector<392x1xi32>
    %24 = arith.extui %23 : vector<392x1xi1> to vector<392x1xi32>
    %25 = arith.sitofp %24 : vector<392x1xi32> to vector<392x1xf32>
    %c0 = arith.constant 0 : index
    %c0_4 = arith.constant 0 : index
    %26 = vector.load %arg0[%c0, %c0_4] : memref<8x10xbf16, #tpu.memory_space<vmem>>, vector<8x10xbf16>
    %c0_5 = arith.constant 0 : index
    %c0_6 = arith.constant 0 : index
    %27 = vector.load %arg2[%c0_5, %c0_6] : memref<10x128xbf16, #tpu.memory_space<vmem>>, vector<10x128xbf16>
    %cst = arith.constant dense<0.000000e+00> : vector<8x128xf32>
    %28 = tpu.matmul %26, %27, %cst {dimension_numbers = #tpu.dot_dimension_numbers<[1], [0], [0], [1], [0, 0, 1, 1], [], []>} : vector<8x10xbf16>, vector<10x128xbf16>, vector<8x128xf32> -> vector<8x128xf32>
    %c0_7 = arith.constant 0 : index
    %c0_8 = arith.constant 0 : index
    %29 = vector.load %arg3[%c0_7, %c0_8] : memref<1x128xf32, #tpu.memory_space<vmem>>, vector<1x128xf32>
    %c0_9 = arith.constant 0 : index
    %c0_10 = arith.constant 0 : index
    %30 = vector.load %arg4[%c0_9, %c0_10] : memref<1x128xf32, #tpu.memory_space<vmem>>, vector<1x128xf32>
    %cst_11 = arith.constant dense<0.000000e+00> : vector<128xf32>
    %31 = vector.multi_reduction <add>, %28, %cst_11 [0] : vector<8x128xf32> to vector<128xf32>
    %32 = vector.shape_cast %31 : vector<128xf32> to vector<1x128xf32>
    %cst_12 = arith.constant 2.500000e-01 : f32
    %33 = vector.broadcast %cst_12 : f32 to vector<1x128xf32>
    %34 = arith.mulf %32, %33 : vector<1x128xf32>
    %35 = arith.mulf %28, %28 : vector<8x128xf32>
    %cst_13 = arith.constant dense<0.000000e+00> : vector<128xf32>
    %36 = vector.multi_reduction <add>, %35, %cst_13 [0] : vector<8x128xf32> to vector<128xf32>
    %37 = vector.shape_cast %36 : vector<128xf32> to vector<1x128xf32>
    %cst_14 = arith.constant 2.500000e-01 : f32
    %38 = vector.broadcast %cst_14 : f32 to vector<1x128xf32>
    %39 = arith.mulf %37, %38 : vector<1x128xf32>
    %40 = arith.mulf %34, %34 : vector<1x128xf32>
    %41 = arith.subf %39, %40 : vector<1x128xf32>
    %cst_15 = arith.constant 0.000000e+00 : f32
    %42 = vector.broadcast %cst_15 : f32 to vector<1x128xf32>
    %43 = arith.maximumf %41, %42 : vector<1x128xf32>
    %cst_16 = arith.constant 9.99999974E-6 : f32
    %44 = vector.broadcast %cst_16 : f32 to vector<1x128xf32>
    %45 = arith.addf %43, %44 : vector<1x128xf32>
    %46 = math.rsqrt %45 : vector<1x128xf32>
    %47 = arith.mulf %29, %46 : vector<1x128xf32>
    %48 = arith.mulf %34, %47 : vector<1x128xf32>
    %49 = arith.subf %30, %48 : vector<1x128xf32>
    %50 = vector.broadcast %47 : vector<1x128xf32> to vector<8x128xf32>
    %51 = arith.mulf %28, %50 : vector<8x128xf32>
    %52 = vector.broadcast %49 : vector<1x128xf32> to vector<8x128xf32>
    %53 = arith.addf %51, %52 : vector<8x128xf32>
    %cst_17 = arith.constant 0.000000e+00 : f32
    %54 = vector.broadcast %cst_17 : f32 to vector<8x128xf32>
    %55 = arith.maximumf %53, %54 : vector<8x128xf32>
    %56 = vector.broadcast %4 : vector<8x1xf32> to vector<8x128xf32>
    %57 = arith.mulf %55, %56 : vector<8x128xf32>
    %c0_18 = arith.constant 0 : index
    %c0_19 = arith.constant 0 : index
    %58 = vector.load %arg1[%c0_18, %c0_19] : memref<392x27xbf16, #tpu.memory_space<vmem>>, vector<392x27xbf16>
    %c0_20 = arith.constant 0 : index
    %c0_21 = arith.constant 0 : index
    %59 = vector.load %arg5[%c0_20, %c0_21] : memref<27x64xbf16, #tpu.memory_space<vmem>>, vector<27x64xbf16>
    %cst_22 = arith.constant dense<0.000000e+00> : vector<392x64xf32>
    %60 = tpu.matmul %58, %59, %cst_22 {dimension_numbers = #tpu.dot_dimension_numbers<[1], [0], [0], [1], [0, 0, 1, 1], [], []>} : vector<392x27xbf16>, vector<27x64xbf16>, vector<392x64xf32> -> vector<392x64xf32>
    %c0_23 = arith.constant 0 : index
    %c0_24 = arith.constant 0 : index
    %61 = vector.load %arg6[%c0_23, %c0_24] : memref<1x64xf32, #tpu.memory_space<vmem>>, vector<1x64xf32>
    %c0_25 = arith.constant 0 : index
    %c0_26 = arith.constant 0 : index
    %62 = vector.load %arg7[%c0_25, %c0_26] : memref<1x64xf32, #tpu.memory_space<vmem>>, vector<1x64xf32>
    %cst_27 = arith.constant dense<0.000000e+00> : vector<64xf32>
    %63 = vector.multi_reduction <add>, %60, %cst_27 [0] : vector<392x64xf32> to vector<64xf32>
    %64 = vector.shape_cast %63 : vector<64xf32> to vector<1x64xf32>
    %cst_28 = arith.constant 0.00510204071 : f32
    %65 = vector.broadcast %cst_28 : f32 to vector<1x64xf32>
    %66 = arith.mulf %64, %65 : vector<1x64xf32>
    %67 = arith.mulf %60, %60 : vector<392x64xf32>
    %cst_29 = arith.constant dense<0.000000e+00> : vector<64xf32>
    %68 = vector.multi_reduction <add>, %67, %cst_29 [0] : vector<392x64xf32> to vector<64xf32>
    %69 = vector.shape_cast %68 : vector<64xf32> to vector<1x64xf32>
    %cst_30 = arith.constant 0.00510204071 : f32
    %70 = vector.broadcast %cst_30 : f32 to vector<1x64xf32>
    %71 = arith.mulf %69, %70 : vector<1x64xf32>
    %72 = arith.mulf %66, %66 : vector<1x64xf32>
    %73 = arith.subf %71, %72 : vector<1x64xf32>
    %cst_31 = arith.constant 0.000000e+00 : f32
    %74 = vector.broadcast %cst_31 : f32 to vector<1x64xf32>
    %75 = arith.maximumf %73, %74 : vector<1x64xf32>
    %cst_32 = arith.constant 9.99999974E-6 : f32
    %76 = vector.broadcast %cst_32 : f32 to vector<1x64xf32>
    %77 = arith.addf %75, %76 : vector<1x64xf32>
    %78 = math.rsqrt %77 : vector<1x64xf32>
    %79 = arith.mulf %61, %78 : vector<1x64xf32>
    %80 = arith.mulf %66, %79 : vector<1x64xf32>
    %81 = arith.subf %62, %80 : vector<1x64xf32>
    %82 = vector.broadcast %79 : vector<1x64xf32> to vector<392x64xf32>
    %83 = arith.mulf %60, %82 : vector<392x64xf32>
    %84 = vector.broadcast %81 : vector<1x64xf32> to vector<392x64xf32>
    %85 = arith.addf %83, %84 : vector<392x64xf32>
    %cst_33 = arith.constant 0.000000e+00 : f32
    %86 = vector.broadcast %cst_33 : f32 to vector<392x64xf32>
    %87 = arith.maximumf %85, %86 : vector<392x64xf32>
    %88 = vector.broadcast %25 : vector<392x1xf32> to vector<392x64xf32>
    %89 = arith.mulf %87, %88 : vector<392x64xf32>
    %c0_34 = arith.constant 0 : index
    %c0_35 = arith.constant 0 : index
    %90 = vector.load %arg17[%c0_34, %c0_35] : memref<392x64xf32, #tpu.memory_space<vmem>>, vector<392x64xf32>
    tpu.vector_store %arg17[%c0_34, %c0_35], %89 {strides = array<i32>} : memref<392x64xf32, #tpu.memory_space<vmem>>, vector<392x64xf32>,
    %c0_36 = arith.constant 0 : index
    %c0_37 = arith.constant 0 : index
    %91 = vector.load %arg17[%c0_36, %c0_37] : memref<392x64xf32, #tpu.memory_space<vmem>>, vector<8x64xf32>
    %c0_38 = arith.constant 0 : index
    %c0_39 = arith.constant 0 : index
    %92 = vector.load %arg18[%c0_38, %c0_39] : memref<72x576xf32, #tpu.memory_space<vmem>>, vector<8x64xf32>
    tpu.vector_store %arg18[%c0_38, %c0_39], %91 {strides = array<i32>} : memref<72x576xf32, #tpu.memory_space<vmem>>, vector<8x64xf32>,
    %c8 = arith.constant 8 : index
    %c0_40 = arith.constant 0 : index
    %93 = vector.load %arg17[%c8, %c0_40] : memref<392x64xf32, #tpu.memory_space<vmem>>, vector<8x64xf32>
    %c0_41 = arith.constant 0 : index
    %c64 = arith.constant 64 : index
    %94 = vector.load %arg18[%c0_41, %c64] : memref<72x576xf32, #tpu.memory_space<vmem>>, vector<8x64xf32>
    tpu.vector_store %arg18[%c0_41, %c64], %93 {strides = array<i32>} : memref<72x576xf32, #tpu.memory_space<vmem>>, vector<8x64xf32>,
    %c16 = arith.constant 16 : index
    %c0_42 = arith.constant 0 : index
    %95 = vector.load %arg17[%c16, %c0_42] : memref<392x64xf32, #tpu.memory_space<vmem>>, vector<8x64xf32>
    %c0_43 = arith.constant 0 : index
    %c128 = arith.constant 128 : index
    %96 = vector.load %arg18[%c0_43, %c128] : memref<72x576xf32, #tpu.memory_space<vmem>>, vector<8x64xf32>
    tpu.vector_store %arg18[%c0_43, %c128], %95 {strides = array<i32>} : memref<72x576xf32, #tpu.memory_space<vmem>>, vector<8x64xf32>,
    %c56 = arith.constant 56 : index
    %c0_44 = arith.constant 0 : index
    %97 = vector.load %arg17[%c56, %c0_44] : memref<392x64xf32, #tpu.memory_space<vmem>>, vector<8x64xf32>
    %c0_45 = arith.constant 0 : index
    %c192 = arith.constant 192 : index
    %98 = vector.load %arg18[%c0_45, %c192] : memref<72x576xf32, #tpu.memory_space<vmem>>, vector<8x64xf32>
    tpu.vector_store %arg18[%c0_45, %c192], %97 {strides = array<i32>} : memref<72x576xf32, #tpu.memory_space<vmem>>, vector<8x64xf32>,
    %c64_46 = arith.constant 64 : index
    %c0_47 = arith.constant 0 : index
    %99 = vector.load %arg17[%c64_46, %c0_47] : memref<392x64xf32, #tpu.memory_space<vmem>>, vector<8x64xf32>
    %c0_48 = arith.constant 0 : index
    %c256 = arith.constant 256 : index
    %100 = vector.load %arg18[%c0_48, %c256] : memref<72x576xf32, #tpu.memory_space<vmem>>, vector<8x64xf32>
    tpu.vector_store %arg18[%c0_48, %c256], %99 {strides = array<i32>} : memref<72x576xf32, #tpu.memory_space<vmem>>, vector<8x64xf32>,
    %c72 = arith.constant 72 : index
    %c0_49 = arith.constant 0 : index
    %101 = vector.load %arg17[%c72, %c0_49] : memref<392x64xf32, #tpu.memory_space<vmem>>, vector<8x64xf32>
    %c0_50 = arith.constant 0 : index
    %c320 = arith.constant 320 : index
    %102 = vector.load %arg18[%c0_50, %c320] : memref<72x576xf32, #tpu.memory_space<vmem>>, vector<8x64xf32>
    tpu.vector_store %arg18[%c0_50, %c320], %101 {strides = array<i32>} : memref<72x576xf32, #tpu.memory_space<vmem>>, vector<8x64xf32>,
    %c112 = arith.constant 112 : index
    %c0_51 = arith.constant 0 : index
    %103 = vector.load %arg17[%c112, %c0_51] : memref<392x64xf32, #tpu.memory_space<vmem>>, vector<8x64xf32>
    %c0_52 = arith.constant 0 : index
    %c384 = arith.constant 384 : index
    %104 = vector.load %arg18[%c0_52, %c384] : memref<72x576xf32, #tpu.memory_space<vmem>>, vector<8x64xf32>
    tpu.vector_store %arg18[%c0_52, %c384], %103 {strides = array<i32>} : memref<72x576xf32, #tpu.memory_space<vmem>>, vector<8x64xf32>,
    %c120 = arith.constant 120 : index
    %c0_53 = arith.constant 0 : index
    %105 = vector.load %arg17[%c120, %c0_53] : memref<392x64xf32, #tpu.memory_space<vmem>>, vector<8x64xf32>
    %c0_54 = arith.constant 0 : index
    %c448 = arith.constant 448 : index
    %106 = vector.load %arg18[%c0_54, %c448] : memref<72x576xf32, #tpu.memory_space<vmem>>, vector<8x64xf32>
    tpu.vector_store %arg18[%c0_54, %c448], %105 {strides = array<i32>} : memref<72x576xf32, #tpu.memory_space<vmem>>, vector<8x64xf32>,
    %c128_55 = arith.constant 128 : index
    %c0_56 = arith.constant 0 : index
    %107 = vector.load %arg17[%c128_55, %c0_56] : memref<392x64xf32, #tpu.memory_space<vmem>>, vector<8x64xf32>
    %c0_57 = arith.constant 0 : index
    %c512 = arith.constant 512 : index
    %108 = vector.load %arg18[%c0_57, %c512] : memref<72x576xf32, #tpu.memory_space<vmem>>, vector<8x64xf32>
    tpu.vector_store %arg18[%c0_57, %c512], %107 {strides = array<i32>} : memref<72x576xf32, #tpu.memory_space<vmem>>, vector<8x64xf32>,
    %c16_58 = arith.constant 16 : index
    %c0_59 = arith.constant 0 : index
    %109 = vector.load %arg17[%c16_58, %c0_59] : memref<392x64xf32, #tpu.memory_space<vmem>>, vector<8x64xf32>
    %c8_60 = arith.constant 8 : index
    %c0_61 = arith.constant 0 : index
    %110 = vector.load %arg18[%c8_60, %c0_61] : memref<72x576xf32, #tpu.memory_space<vmem>>, vector<8x64xf32>
    tpu.vector_store %arg18[%c8_60, %c0_61], %109 {strides = array<i32>} : memref<72x576xf32, #tpu.memory_space<vmem>>, vector<8x64xf32>,
    %c24 = arith.constant 24 : index
    %c0_62 = arith.constant 0 : index
    %111 = vector.load %arg17[%c24, %c0_62] : memref<392x64xf32, #tpu.memory_space<vmem>>, vector<8x64xf32>
    %c8_63 = arith.constant 8 : index
    %c64_64 = arith.constant 64 : index
    %112 = vector.load %arg18[%c8_63, %c64_64] : memref<72x576xf32, #tpu.memory_space<vmem>>, vector<8x64xf32>
    tpu.vector_store %arg18[%c8_63, %c64_64], %111 {strides = array<i32>} : memref<72x576xf32, #tpu.memory_space<vmem>>, vector<8x64xf32>,
    %c32 = arith.constant 32 : index
    %c0_65 = arith.constant 0 : index
    %113 = vector.load %arg17[%c32, %c0_65] : memref<392x64xf32, #tpu.memory_space<vmem>>, vector<8x64xf32>
    %c8_66 = arith.constant 8 : index
    %c128_67 = arith.constant 128 : index
    %114 = vector.load %arg18[%c8_66, %c128_67] : memref<72x576xf32, #tpu.memory_space<vmem>>, vector<8x64xf32>
    tpu.vector_store %arg18[%c8_66, %c128_67], %113 {strides = array<i32>} : memref<72x576xf32, #tpu.memory_space<vmem>>, vector<8x64xf32>,
    %c72_68 = arith.constant 72 : index
    %c0_69 = arith.constant 0 : index
    %115 = vector.load %arg17[%c72_68, %c0_69] : memref<392x64xf32, #tpu.memory_space<vmem>>, vector<8x64xf32>
    %c8_70 = arith.constant 8 : index
    %c192_71 = arith.constant 192 : index
    %116 = vector.load %arg18[%c8_70, %c192_71] : memref<72x576xf32, #tpu.memory_space<vmem>>, vector<8x64xf32>
    tpu.vector_store %arg18[%c8_70, %c192_71], %115 {strides = array<i32>} : memref<72x576xf32, #tpu.memory_space<vmem>>, vector<8x64xf32>,
    %c80 = arith.constant 80 : index
    %c0_72 = arith.constant 0 : index
    %117 = vector.load %arg17[%c80, %c0_72] : memref<392x64xf32, #tpu.memory_space<vmem>>, vector<8x64xf32>
    %c8_73 = arith.constant 8 : index
    %c256_74 = arith.constant 256 : index
    %118 = vector.load %arg18[%c8_73, %c256_74] : memref<72x576xf32, #tpu.memory_space<vmem>>, vector<8x64xf32>
    tpu.vector_store %arg18[%c8_73, %c256_74], %117 {strides = array<i32>} : memref<72x576xf32, #tpu.memory_space<vmem>>, vector<8x64xf32>,
    %c88 = arith.constant 88 : index
    %c0_75 = arith.constant 0 : index
    %119 = vector.load %arg17[%c88, %c0_75] : memref<392x64xf32, #tpu.memory_space<vmem>>, vector<8x64xf32>
    %c8_76 = arith.constant 8 : index
    %c320_77 = arith.constant 320 : index
    %120 = vector.load %arg18[%c8_76, %c320_77] : memref<72x576xf32, #tpu.memory_space<vmem>>, vector<8x64xf32>
    tpu.vector_store %arg18[%c8_76, %c320_77], %119 {strides = array<i32>} : memref<72x576xf32, #tpu.memory_space<vmem>>, vector<8x64xf32>,
    %c128_78 = arith.constant 128 : index
    %c0_79 = arith.constant 0 : index
    %121 = vector.load %arg17[%c128_78, %c0_79] : memref<392x64xf32, #tpu.memory_space<vmem>>, vector<8x64xf32>
    %c8_80 = arith.constant 8 : index
    %c384_81 = arith.constant 384 : index
    %122 = vector.load %arg18[%c8_80, %c384_81] : memref<72x576xf32, #tpu.memory_space<vmem>>, vector<8x64xf32>
    tpu.vector_store %arg18[%c8_80, %c384_81], %121 {strides = array<i32>} : memref<72x576xf32, #tpu.memory_space<vmem>>, vector<8x64xf32>,
    %c136 = arith.constant 136 : index
    %c0_82 = arith.constant 0 : index
    %123 = vector.load %arg17[%c136, %c0_82] : memref<392x64xf32, #tpu.memory_space<vmem>>, vector<8x64xf32>
    %c8_83 = arith.constant 8 : index
    %c448_84 = arith.constant 448 : index
    %124 = vector.load %arg18[%c8_83, %c448_84] : memref<72x576xf32, #tpu.memory_space<vmem>>, vector<8x64xf32>
    tpu.vector_store %arg18[%c8_83, %c448_84], %123 {strides = array<i32>} : memref<72x576xf32, #tpu.memory_space<vmem>>, vector<8x64xf32>,
    %c144 = arith.constant 144 : index
    %c0_85 = arith.constant 0 : index
    %125 = vector.load %arg17[%c144, %c0_85] : memref<392x64xf32, #tpu.memory_space<vmem>>, vector<8x64xf32>
    %c8_86 = arith.constant 8 : index
    %c512_87 = arith.constant 512 : index
    %126 = vector.load %arg18[%c8_86, %c512_87] : memref<72x576xf32, #tpu.memory_space<vmem>>, vector<8x64xf32>
    tpu.vector_store %arg18[%c8_86, %c512_87], %125 {strides = array<i32>} : memref<72x576xf32, #tpu.memory_space<vmem>>, vector<8x64xf32>,
    %c32_88 = arith.constant 32 : index
    %c0_89 = arith.constant 0 : index
    %127 = vector.load %arg17[%c32_88, %c0_89] : memref<392x64xf32, #tpu.memory_space<vmem>>, vector<8x64xf32>
    %c16_90 = arith.constant 16 : index
    %c0_91 = arith.constant 0 : index
    %128 = vector.load %arg18[%c16_90, %c0_91] : memref<72x576xf32, #tpu.memory_space<vmem>>, vector<8x64xf32>
    tpu.vector_store %arg18[%c16_90, %c0_91], %127 {strides = array<i32>} : memref<72x576xf32, #tpu.memory_space<vmem>>, vector<8x64xf32>,
    %c40 = arith.constant 40 : index
    %c0_92 = arith.constant 0 : index
    %129 = vector.load %arg17[%c40, %c0_92] : memref<392x64xf32, #tpu.memory_space<vmem>>, vector<8x64xf32>
    %c16_93 = arith.constant 16 : index
    %c64_94 = arith.constant 64 : index
    %130 = vector.load %arg18[%c16_93, %c64_94] : memref<72x576xf32, #tpu.memory_space<vmem>>, vector<8x64xf32>
    tpu.vector_store %arg18[%c16_93, %c64_94], %129 {strides = array<i32>} : memref<72x576xf32, #tpu.memory_space<vmem>>, vector<8x64xf32>,
    %c48 = arith.constant 48 : index
    %c0_95 = arith.constant 0 : index
    %131 = vector.load %arg17[%c48, %c0_95] : memref<392x64xf32, #tpu.memory_space<vmem>>, vector<8x64xf32>
    %c16_96 = arith.constant 16 : index
    %c128_97 = arith.constant 128 : index
    %132 = vector.load %arg18[%c16_96, %c128_97] : memref<72x576xf32, #tpu.memory_space<vmem>>, vector<8x64xf32>
    tpu.vector_store %arg18[%c16_96, %c128_97], %131 {strides = array<i32>} : memref<72x576xf32, #tpu.memory_space<vmem>>, vector<8x64xf32>,
    %c88_98 = arith.constant 88 : index
    %c0_99 = arith.constant 0 : index
    %133 = vector.load %arg17[%c88_98, %c0_99] : memref<392x64xf32, #tpu.memory_space<vmem>>, vector<8x64xf32>
    %c16_100 = arith.constant 16 : index
    %c192_101 = arith.constant 192 : index
    %134 = vector.load %arg18[%c16_100, %c192_101] : memref<72x576xf32, #tpu.memory_space<vmem>>, vector<8x64xf32>
    tpu.vector_store %arg18[%c16_100, %c192_101], %133 {strides = array<i32>} : memref<72x576xf32, #tpu.memory_space<vmem>>, vector<8x64xf32>,
    %c96 = arith.constant 96 : index
    %c0_102 = arith.constant 0 : index
    %135 = vector.load %arg17[%c96, %c0_102] : memref<392x64xf32, #tpu.memory_space<vmem>>, vector<8x64xf32>
    %c16_103 = arith.constant 16 : index
    %c256_104 = arith.constant 256 : index
    %136 = vector.load %arg18[%c16_103, %c256_104] : memref<72x576xf32, #tpu.memory_space<vmem>>, vector<8x64xf32>
    tpu.vector_store %arg18[%c16_103, %c256_104], %135 {strides = array<i32>} : memref<72x576xf32, #tpu.memory_space<vmem>>, vector<8x64xf32>,
    %c104 = arith.constant 104 : index
    %c0_105 = arith.constant 0 : index
    %137 = vector.load %arg17[%c104, %c0_105] : memref<392x64xf32, #tpu.memory_space<vmem>>, vector<8x64xf32>
    %c16_106 = arith.constant 16 : index
    %c320_107 = arith.constant 320 : index
    %138 = vector.load %arg18[%c16_106, %c320_107] : memref<72x576xf32, #tpu.memory_space<vmem>>, vector<8x64xf32>
    tpu.vector_store %arg18[%c16_106, %c320_107], %137 {strides = array<i32>} : memref<72x576xf32, #tpu.memory_space<vmem>>, vector<8x64xf32>,
    %c144_108 = arith.constant 144 : index
    %c0_109 = arith.constant 0 : index
    %139 = vector.load %arg17[%c144_108, %c0_109] : memref<392x64xf32, #tpu.memory_space<vmem>>, vector<8x64xf32>
    %c16_110 = arith.constant 16 : index
    %c384_111 = arith.constant 384 : index
    %140 = vector.load %arg18[%c16_110, %c384_111] : memref<72x576xf32, #tpu.memory_space<vmem>>, vector<8x64xf32>
    tpu.vector_store %arg18[%c16_110, %c384_111], %139 {strides = array<i32>} : memref<72x576xf32, #tpu.memory_space<vmem>>, vector<8x64xf32>,
    %c152 = arith.constant 152 : index
    %c0_112 = arith.constant 0 : index
    %141 = vector.load %arg17[%c152, %c0_112] : memref<392x64xf32, #tpu.memory_space<vmem>>, vector<8x64xf32>
    %c16_113 = arith.constant 16 : index
    %c448_114 = arith.constant 448 : index
    %142 = vector.load %arg18[%c16_113, %c448_114] : memref<72x576xf32, #tpu.memory_space<vmem>>, vector<8x64xf32>
    tpu.vector_store %arg18[%c16_113, %c448_114], %141 {strides = array<i32>} : memref<72x576xf32, #tpu.memory_space<vmem>>, vector<8x64xf32>,
    %c160 = arith.constant 160 : index
    %c0_115 = arith.constant 0 : index
    %143 = vector.load %arg17[%c160, %c0_115] : memref<392x64xf32, #tpu.memory_space<vmem>>, vector<8x64xf32>
    %c16_116 = arith.constant 16 : index
    %c512_117 = arith.constant 512 : index
    %144 = vector.load %arg18[%c16_116, %c512_117] : memref<72x576xf32, #tpu.memory_space<vmem>>, vector<8x64xf32>
    tpu.vector_store %arg18[%c16_116, %c512_117], %143 {strides = array<i32>} : memref<72x576xf32, #tpu.memory_space<vmem>>, vector<8x64xf32>,
    %c112_118 = arith.constant 112 : index
    %c0_119 = arith.constant 0 : index
    %145 = vector.load %arg17[%c112_118, %c0_119] : memref<392x64xf32, #tpu.memory_space<vmem>>, vector<8x64xf32>
    %c24_120 = arith.constant 24 : index
    %c0_121 = arith.constant 0 : index
    %146 = vector.load %arg18[%c24_120, %c0_121] : memref<72x576xf32, #tpu.memory_space<vmem>>, vector<8x64xf32>
    tpu.vector_store %arg18[%c24_120, %c0_121], %145 {strides = array<i32>} : memref<72x576xf32, #tpu.memory_space<vmem>>, vector<8x64xf32>,
    %c120_122 = arith.constant 120 : index
    %c0_123 = arith.constant 0 : index
    %147 = vector.load %arg17[%c120_122, %c0_123] : memref<392x64xf32, #tpu.memory_space<vmem>>, vector<8x64xf32>
    %c24_124 = arith.constant 24 : index
    %c64_125 = arith.constant 64 : index
    %148 = vector.load %arg18[%c24_124, %c64_125] : memref<72x576xf32, #tpu.memory_space<vmem>>, vector<8x64xf32>
    tpu.vector_store %arg18[%c24_124, %c64_125], %147 {strides = array<i32>} : memref<72x576xf32, #tpu.memory_space<vmem>>, vector<8x64xf32>,
    %c128_126 = arith.constant 128 : index
    %c0_127 = arith.constant 0 : index
    %149 = vector.load %arg17[%c128_126, %c0_127] : memref<392x64xf32, #tpu.memory_space<vmem>>, vector<8x64xf32>
    %c24_128 = arith.constant 24 : index
    %c128_129 = arith.constant 128 : index
    %150 = vector.load %arg18[%c24_128, %c128_129] : memref<72x576xf32, #tpu.memory_space<vmem>>, vector<8x64xf32>
    tpu.vector_store %arg18[%c24_128, %c128_129], %149 {strides = array<i32>} : memref<72x576xf32, #tpu.memory_space<vmem>>, vector<8x64xf32>,
    %c168 = arith.constant 168 : index
    %c0_130 = arith.constant 0 : index
    %151 = vector.load %arg17[%c168, %c0_130] : memref<392x64xf32, #tpu.memory_space<vmem>>, vector<8x64xf32>
    %c24_131 = arith.constant 24 : index
    %c192_132 = arith.constant 192 : index
    %152 = vector.load %arg18[%c24_131, %c192_132] : memref<72x576xf32, #tpu.memory_space<vmem>>, vector<8x64xf32>
    tpu.vector_store %arg18[%c24_131, %c192_132], %151 {strides = array<i32>} : memref<72x576xf32, #tpu.memory_space<vmem>>, vector<8x64xf32>,
    %c176 = arith.constant 176 : index
    %c0_133 = arith.constant 0 : index
    %153 = vector.load %arg17[%c176, %c0_133] : memref<392x64xf32, #tpu.memory_space<vmem>>, vector<8x64xf32>
    %c24_134 = arith.constant 24 : index
    %c256_135 = arith.constant 256 : index
    %154 = vector.load %arg18[%c24_134, %c256_135] : memref<72x576xf32, #tpu.memory_space<vmem>>, vector<8x64xf32>
    tpu.vector_store %arg18[%c24_134, %c256_135], %153 {strides = array<i32>} : memref<72x576xf32, #tpu.memory_space<vmem>>, vector<8x64xf32>,
    %c184 = arith.constant 184 : index
    %c0_136 = arith.constant 0 : index
    %155 = vector.load %arg17[%c184, %c0_136] : memref<392x64xf32, #tpu.memory_space<vmem>>, vector<8x64xf32>
    %c24_137 = arith.constant 24 : index
    %c320_138 = arith.constant 320 : index
    %156 = vector.load %arg18[%c24_137, %c320_138] : memref<72x576xf32, #tpu.memory_space<vmem>>, vector<8x64xf32>
    tpu.vector_store %arg18[%c24_137, %c320_138], %155 {strides = array<i32>} : memref<72x576xf32, #tpu.memory_space<vmem>>, vector<8x64xf32>,
    %c224 = arith.constant 224 : index
    %c0_139 = arith.constant 0 : index
    %157 = vector.load %arg17[%c224, %c0_139] : memref<392x64xf32, #tpu.memory_space<vmem>>, vector<8x64xf32>
    %c24_140 = arith.constant 24 : index
    %c384_141 = arith.constant 384 : index
    %158 = vector.load %arg18[%c24_140, %c384_141] : memref<72x576xf32, #tpu.memory_space<vmem>>, vector<8x64xf32>
    tpu.vector_store %arg18[%c24_140, %c384_141], %157 {strides = array<i32>} : memref<72x576xf32, #tpu.memory_space<vmem>>, vector<8x64xf32>,
    %c232 = arith.constant 232 : index
    %c0_142 = arith.constant 0 : index
    %159 = vector.load %arg17[%c232, %c0_142] : memref<392x64xf32, #tpu.memory_space<vmem>>, vector<8x64xf32>
    %c24_143 = arith.constant 24 : index
    %c448_144 = arith.constant 448 : index
    %160 = vector.load %arg18[%c24_143, %c448_144] : memref<72x576xf32, #tpu.memory_space<vmem>>, vector<8x64xf32>
    tpu.vector_store %arg18[%c24_143, %c448_144], %159 {strides = array<i32>} : memref<72x576xf32, #tpu.memory_space<vmem>>, vector<8x64xf32>,
    %c240 = arith.constant 240 : index
    %c0_145 = arith.constant 0 : index
    %161 = vector.load %arg17[%c240, %c0_145] : memref<392x64xf32, #tpu.memory_space<vmem>>, vector<8x64xf32>
    %c24_146 = arith.constant 24 : index
    %c512_147 = arith.constant 512 : index
    %162 = vector.load %arg18[%c24_146, %c512_147] : memref<72x576xf32, #tpu.memory_space<vmem>>, vector<8x64xf32>
    tpu.vector_store %arg18[%c24_146, %c512_147], %161 {strides = array<i32>} : memref<72x576xf32, #tpu.memory_space<vmem>>, vector<8x64xf32>,
    %c128_148 = arith.constant 128 : index
    %c0_149 = arith.constant 0 : index
    %163 = vector.load %arg17[%c128_148, %c0_149] : memref<392x64xf32, #tpu.memory_space<vmem>>, vector<8x64xf32>
    %c32_150 = arith.constant 32 : index
    %c0_151 = arith.constant 0 : index
    %164 = vector.load %arg18[%c32_150, %c0_151] : memref<72x576xf32, #tpu.memory_space<vmem>>, vector<8x64xf32>
    tpu.vector_store %arg18[%c32_150, %c0_151], %163 {strides = array<i32>} : memref<72x576xf32, #tpu.memory_space<vmem>>, vector<8x64xf32>,
    %c136_152 = arith.constant 136 : index
    %c0_153 = arith.constant 0 : index
    %165 = vector.load %arg17[%c136_152, %c0_153] : memref<392x64xf32, #tpu.memory_space<vmem>>, vector<8x64xf32>
    %c32_154 = arith.constant 32 : index
    %c64_155 = arith.constant 64 : index
    %166 = vector.load %arg18[%c32_154, %c64_155] : memref<72x576xf32, #tpu.memory_space<vmem>>, vector<8x64xf32>
    tpu.vector_store %arg18[%c32_154, %c64_155], %165 {strides = array<i32>} : memref<72x576xf32, #tpu.memory_space<vmem>>, vector<8x64xf32>,
    %c144_156 = arith.constant 144 : index
    %c0_157 = arith.constant 0 : index
    %167 = vector.load %arg17[%c144_156, %c0_157] : memref<392x64xf32, #tpu.memory_space<vmem>>, vector<8x64xf32>
    %c32_158 = arith.constant 32 : index
    %c128_159 = arith.constant 128 : index
    %168 = vector.load %arg18[%c32_158, %c128_159] : memref<72x576xf32, #tpu.memory_space<vmem>>, vector<8x64xf32>
    tpu.vector_store %arg18[%c32_158, %c128_159], %167 {strides = array<i32>} : memref<72x576xf32, #tpu.memory_space<vmem>>, vector<8x64xf32>,
    %c184_160 = arith.constant 184 : index
    %c0_161 = arith.constant 0 : index
    %169 = vector.load %arg17[%c184_160, %c0_161] : memref<392x64xf32, #tpu.memory_space<vmem>>, vector<8x64xf32>
    %c32_162 = arith.constant 32 : index
    %c192_163 = arith.constant 192 : index
    %170 = vector.load %arg18[%c32_162, %c192_163] : memref<72x576xf32, #tpu.memory_space<vmem>>, vector<8x64xf32>
    tpu.vector_store %arg18[%c32_162, %c192_163], %169 {strides = array<i32>} : memref<72x576xf32, #tpu.memory_space<vmem>>, vector<8x64xf32>,
    %c192_164 = arith.constant 192 : index
    %c0_165 = arith.constant 0 : index
    %171 = vector.load %arg17[%c192_164, %c0_165] : memref<392x64xf32, #tpu.memory_space<vmem>>, vector<8x64xf32>
    %c32_166 = arith.constant 32 : index
    %c256_167 = arith.constant 256 : index
    %172 = vector.load %arg18[%c32_166, %c256_167] : memref<72x576xf32, #tpu.memory_space<vmem>>, vector<8x64xf32>
    tpu.vector_store %arg18[%c32_166, %c256_167], %171 {strides = array<i32>} : memref<72x576xf32, #tpu.memory_space<vmem>>, vector<8x64xf32>,
    %c200 = arith.constant 200 : index
    %c0_168 = arith.constant 0 : index
    %173 = vector.load %arg17[%c200, %c0_168] : memref<392x64xf32, #tpu.memory_space<vmem>>, vector<8x64xf32>
    %c32_169 = arith.constant 32 : index
    %c320_170 = arith.constant 320 : index
    %174 = vector.load %arg18[%c32_169, %c320_170] : memref<72x576xf32, #tpu.memory_space<vmem>>, vector<8x64xf32>
    tpu.vector_store %arg18[%c32_169, %c320_170], %173 {strides = array<i32>} : memref<72x576xf32, #tpu.memory_space<vmem>>, vector<8x64xf32>,
    %c240_171 = arith.constant 240 : index
    %c0_172 = arith.constant 0 : index
    %175 = vector.load %arg17[%c240_171, %c0_172] : memref<392x64xf32, #tpu.memory_space<vmem>>, vector<8x64xf32>
    %c32_173 = arith.constant 32 : index
    %c384_174 = arith.constant 384 : index
    %176 = vector.load %arg18[%c32_173, %c384_174] : memref<72x576xf32, #tpu.memory_space<vmem>>, vector<8x64xf32>
    tpu.vector_store %arg18[%c32_173, %c384_174], %175 {strides = array<i32>} : memref<72x576xf32, #tpu.memory_space<vmem>>, vector<8x64xf32>,
    %c248 = arith.constant 248 : index
    %c0_175 = arith.constant 0 : index
    %177 = vector.load %arg17[%c248, %c0_175] : memref<392x64xf32, #tpu.memory_space<vmem>>, vector<8x64xf32>
    %c32_176 = arith.constant 32 : index
    %c448_177 = arith.constant 448 : index
    %178 = vector.load %arg18[%c32_176, %c448_177] : memref<72x576xf32, #tpu.memory_space<vmem>>, vector<8x64xf32>
    tpu.vector_store %arg18[%c32_176, %c448_177], %177 {strides = array<i32>} : memref<72x576xf32, #tpu.memory_space<vmem>>, vector<8x64xf32>,
    %c256_178 = arith.constant 256 : index
    %c0_179 = arith.constant 0 : index
    %179 = vector.load %arg17[%c256_178, %c0_179] : memref<392x64xf32, #tpu.memory_space<vmem>>, vector<8x64xf32>
    %c32_180 = arith.constant 32 : index
    %c512_181 = arith.constant 512 : index
    %180 = vector.load %arg18[%c32_180, %c512_181] : memref<72x576xf32, #tpu.memory_space<vmem>>, vector<8x64xf32>
    tpu.vector_store %arg18[%c32_180, %c512_181], %179 {strides = array<i32>} : memref<72x576xf32, #tpu.memory_space<vmem>>, vector<8x64xf32>,
    %c144_182 = arith.constant 144 : index
    %c0_183 = arith.constant 0 : index
    %181 = vector.load %arg17[%c144_182, %c0_183] : memref<392x64xf32, #tpu.memory_space<vmem>>, vector<8x64xf32>
    %c40_184 = arith.constant 40 : index
    %c0_185 = arith.constant 0 : index
    %182 = vector.load %arg18[%c40_184, %c0_185] : memref<72x576xf32, #tpu.memory_space<vmem>>, vector<8x64xf32>
    tpu.vector_store %arg18[%c40_184, %c0_185], %181 {strides = array<i32>} : memref<72x576xf32, #tpu.memory_space<vmem>>, vector<8x64xf32>,
    %c152_186 = arith.constant 152 : index
    %c0_187 = arith.constant 0 : index
    %183 = vector.load %arg17[%c152_186, %c0_187] : memref<392x64xf32, #tpu.memory_space<vmem>>, vector<8x64xf32>
    %c40_188 = arith.constant 40 : index
    %c64_189 = arith.constant 64 : index
    %184 = vector.load %arg18[%c40_188, %c64_189] : memref<72x576xf32, #tpu.memory_space<vmem>>, vector<8x64xf32>
    tpu.vector_store %arg18[%c40_188, %c64_189], %183 {strides = array<i32>} : memref<72x576xf32, #tpu.memory_space<vmem>>, vector<8x64xf32>,
    %c160_190 = arith.constant 160 : index
    %c0_191 = arith.constant 0 : index
    %185 = vector.load %arg17[%c160_190, %c0_191] : memref<392x64xf32, #tpu.memory_space<vmem>>, vector<8x64xf32>
    %c40_192 = arith.constant 40 : index
    %c128_193 = arith.constant 128 : index
    %186 = vector.load %arg18[%c40_192, %c128_193] : memref<72x576xf32, #tpu.memory_space<vmem>>, vector<8x64xf32>
    tpu.vector_store %arg18[%c40_192, %c128_193], %185 {strides = array<i32>} : memref<72x576xf32, #tpu.memory_space<vmem>>, vector<8x64xf32>,
    %c200_194 = arith.constant 200 : index
    %c0_195 = arith.constant 0 : index
    %187 = vector.load %arg17[%c200_194, %c0_195] : memref<392x64xf32, #tpu.memory_space<vmem>>, vector<8x64xf32>
    %c40_196 = arith.constant 40 : index
    %c192_197 = arith.constant 192 : index
    %188 = vector.load %arg18[%c40_196, %c192_197] : memref<72x576xf32, #tpu.memory_space<vmem>>, vector<8x64xf32>
    tpu.vector_store %arg18[%c40_196, %c192_197], %187 {strides = array<i32>} : memref<72x576xf32, #tpu.memory_space<vmem>>, vector<8x64xf32>,
    %c208 = arith.constant 208 : index
    %c0_198 = arith.constant 0 : index
    %189 = vector.load %arg17[%c208, %c0_198] : memref<392x64xf32, #tpu.memory_space<vmem>>, vector<8x64xf32>
    %c40_199 = arith.constant 40 : index
    %c256_200 = arith.constant 256 : index
    %190 = vector.load %arg18[%c40_199, %c256_200] : memref<72x576xf32, #tpu.memory_space<vmem>>, vector<8x64xf32>
    tpu.vector_store %arg18[%c40_199, %c256_200], %189 {strides = array<i32>} : memref<72x576xf32, #tpu.memory_space<vmem>>, vector<8x64xf32>,
    %c216 = arith.constant 216 : index
    %c0_201 = arith.constant 0 : index
    %191 = vector.load %arg17[%c216, %c0_201] : memref<392x64xf32, #tpu.memory_space<vmem>>, vector<8x64xf32>
    %c40_202 = arith.constant 40 : index
    %c320_203 = arith.constant 320 : index
    %192 = vector.load %arg18[%c40_202, %c320_203] : memref<72x576xf32, #tpu.memory_space<vmem>>, vector<8x64xf32>
    tpu.vector_store %arg18[%c40_202, %c320_203], %191 {strides = array<i32>} : memref<72x576xf32, #tpu.memory_space<vmem>>, vector<8x64xf32>,
    %c256_204 = arith.constant 256 : index
    %c0_205 = arith.constant 0 : index
    %193 = vector.load %arg17[%c256_204, %c0_205] : memref<392x64xf32, #tpu.memory_space<vmem>>, vector<8x64xf32>
    %c40_206 = arith.constant 40 : index
    %c384_207 = arith.constant 384 : index
    %194 = vector.load %arg18[%c40_206, %c384_207] : memref<72x576xf32, #tpu.memory_space<vmem>>, vector<8x64xf32>
    tpu.vector_store %arg18[%c40_206, %c384_207], %193 {strides = array<i32>} : memref<72x576xf32, #tpu.memory_space<vmem>>, vector<8x64xf32>,
    %c264 = arith.constant 264 : index
    %c0_208 = arith.constant 0 : index
    %195 = vector.load %arg17[%c264, %c0_208] : memref<392x64xf32, #tpu.memory_space<vmem>>, vector<8x64xf32>
    %c40_209 = arith.constant 40 : index
    %c448_210 = arith.constant 448 : index
    %196 = vector.load %arg18[%c40_209, %c448_210] : memref<72x576xf32, #tpu.memory_space<vmem>>, vector<8x64xf32>
    tpu.vector_store %arg18[%c40_209, %c448_210], %195 {strides = array<i32>} : memref<72x576xf32, #tpu.memory_space<vmem>>, vector<8x64xf32>,
    %c272 = arith.constant 272 : index
    %c0_211 = arith.constant 0 : index
    %197 = vector.load %arg17[%c272, %c0_211] : memref<392x64xf32, #tpu.memory_space<vmem>>, vector<8x64xf32>
    %c40_212 = arith.constant 40 : index
    %c512_213 = arith.constant 512 : index
    %198 = vector.load %arg18[%c40_212, %c512_213] : memref<72x576xf32, #tpu.memory_space<vmem>>, vector<8x64xf32>
    tpu.vector_store %arg18[%c40_212, %c512_213], %197 {strides = array<i32>} : memref<72x576xf32, #tpu.memory_space<vmem>>, vector<8x64xf32>,
    %c224_214 = arith.constant 224 : index
    %c0_215 = arith.constant 0 : index
    %199 = vector.load %arg17[%c224_214, %c0_215] : memref<392x64xf32, #tpu.memory_space<vmem>>, vector<8x64xf32>
    %c48_216 = arith.constant 48 : index
    %c0_217 = arith.constant 0 : index
    %200 = vector.load %arg18[%c48_216, %c0_217] : memref<72x576xf32, #tpu.memory_space<vmem>>, vector<8x64xf32>
    tpu.vector_store %arg18[%c48_216, %c0_217], %199 {strides = array<i32>} : memref<72x576xf32, #tpu.memory_space<vmem>>, vector<8x64xf32>,
    %c232_218 = arith.constant 232 : index
    %c0_219 = arith.constant 0 : index
    %201 = vector.load %arg17[%c232_218, %c0_219] : memref<392x64xf32, #tpu.memory_space<vmem>>, vector<8x64xf32>
    %c48_220 = arith.constant 48 : index
    %c64_221 = arith.constant 64 : index
    %202 = vector.load %arg18[%c48_220, %c64_221] : memref<72x576xf32, #tpu.memory_space<vmem>>, vector<8x64xf32>
    tpu.vector_store %arg18[%c48_220, %c64_221], %201 {strides = array<i32>} : memref<72x576xf32, #tpu.memory_space<vmem>>, vector<8x64xf32>,
    %c240_222 = arith.constant 240 : index
    %c0_223 = arith.constant 0 : index
    %203 = vector.load %arg17[%c240_222, %c0_223] : memref<392x64xf32, #tpu.memory_space<vmem>>, vector<8x64xf32>
    %c48_224 = arith.constant 48 : index
    %c128_225 = arith.constant 128 : index
    %204 = vector.load %arg18[%c48_224, %c128_225] : memref<72x576xf32, #tpu.memory_space<vmem>>, vector<8x64xf32>
    tpu.vector_store %arg18[%c48_224, %c128_225], %203 {strides = array<i32>} : memref<72x576xf32, #tpu.memory_space<vmem>>, vector<8x64xf32>,
    %c280 = arith.constant 280 : index
    %c0_226 = arith.constant 0 : index
    %205 = vector.load %arg17[%c280, %c0_226] : memref<392x64xf32, #tpu.memory_space<vmem>>, vector<8x64xf32>
    %c48_227 = arith.constant 48 : index
    %c192_228 = arith.constant 192 : index
    %206 = vector.load %arg18[%c48_227, %c192_228] : memref<72x576xf32, #tpu.memory_space<vmem>>, vector<8x64xf32>
    tpu.vector_store %arg18[%c48_227, %c192_228], %205 {strides = array<i32>} : memref<72x576xf32, #tpu.memory_space<vmem>>, vector<8x64xf32>,
    %c288 = arith.constant 288 : index
    %c0_229 = arith.constant 0 : index
    %207 = vector.load %arg17[%c288, %c0_229] : memref<392x64xf32, #tpu.memory_space<vmem>>, vector<8x64xf32>
    %c48_230 = arith.constant 48 : index
    %c256_231 = arith.constant 256 : index
    %208 = vector.load %arg18[%c48_230, %c256_231] : memref<72x576xf32, #tpu.memory_space<vmem>>, vector<8x64xf32>
    tpu.vector_store %arg18[%c48_230, %c256_231], %207 {strides = array<i32>} : memref<72x576xf32, #tpu.memory_space<vmem>>, vector<8x64xf32>,
    %c296 = arith.constant 296 : index
    %c0_232 = arith.constant 0 : index
    %209 = vector.load %arg17[%c296, %c0_232] : memref<392x64xf32, #tpu.memory_space<vmem>>, vector<8x64xf32>
    %c48_233 = arith.constant 48 : index
    %c320_234 = arith.constant 320 : index
    %210 = vector.load %arg18[%c48_233, %c320_234] : memref<72x576xf32, #tpu.memory_space<vmem>>, vector<8x64xf32>
    tpu.vector_store %arg18[%c48_233, %c320_234], %209 {strides = array<i32>} : memref<72x576xf32, #tpu.memory_space<vmem>>, vector<8x64xf32>,
    %c336 = arith.constant 336 : index
    %c0_235 = arith.constant 0 : index
    %211 = vector.load %arg17[%c336, %c0_235] : memref<392x64xf32, #tpu.memory_space<vmem>>, vector<8x64xf32>
    %c48_236 = arith.constant 48 : index
    %c384_237 = arith.constant 384 : index
    %212 = vector.load %arg18[%c48_236, %c384_237] : memref<72x576xf32, #tpu.memory_space<vmem>>, vector<8x64xf32>
    tpu.vector_store %arg18[%c48_236, %c384_237], %211 {strides = array<i32>} : memref<72x576xf32, #tpu.memory_space<vmem>>, vector<8x64xf32>,
    %c344 = arith.constant 344 : index
    %c0_238 = arith.constant 0 : index
    %213 = vector.load %arg17[%c344, %c0_238] : memref<392x64xf32, #tpu.memory_space<vmem>>, vector<8x64xf32>
    %c48_239 = arith.constant 48 : index
    %c448_240 = arith.constant 448 : index
    %214 = vector.load %arg18[%c48_239, %c448_240] : memref<72x576xf32, #tpu.memory_space<vmem>>, vector<8x64xf32>
    tpu.vector_store %arg18[%c48_239, %c448_240], %213 {strides = array<i32>} : memref<72x576xf32, #tpu.memory_space<vmem>>, vector<8x64xf32>,
    %c352 = arith.constant 352 : index
    %c0_241 = arith.constant 0 : index
    %215 = vector.load %arg17[%c352, %c0_241] : memref<392x64xf32, #tpu.memory_space<vmem>>, vector<8x64xf32>
    %c48_242 = arith.constant 48 : index
    %c512_243 = arith.constant 512 : index
    %216 = vector.load %arg18[%c48_242, %c512_243] : memref<72x576xf32, #tpu.memory_space<vmem>>, vector<8x64xf32>
    tpu.vector_store %arg18[%c48_242, %c512_243], %215 {strides = array<i32>} : memref<72x576xf32, #tpu.memory_space<vmem>>, vector<8x64xf32>,
    %c240_244 = arith.constant 240 : index
    %c0_245 = arith.constant 0 : index
    %217 = vector.load %arg17[%c240_244, %c0_245] : memref<392x64xf32, #tpu.memory_space<vmem>>, vector<8x64xf32>
    %c56_246 = arith.constant 56 : index
    %c0_247 = arith.constant 0 : index
    %218 = vector.load %arg18[%c56_246, %c0_247] : memref<72x576xf32, #tpu.memory_space<vmem>>, vector<8x64xf32>
    tpu.vector_store %arg18[%c56_246, %c0_247], %217 {strides = array<i32>} : memref<72x576xf32, #tpu.memory_space<vmem>>, vector<8x64xf32>,
    %c248_248 = arith.constant 248 : index
    %c0_249 = arith.constant 0 : index
    %219 = vector.load %arg17[%c248_248, %c0_249] : memref<392x64xf32, #tpu.memory_space<vmem>>, vector<8x64xf32>
    %c56_250 = arith.constant 56 : index
    %c64_251 = arith.constant 64 : index
    %220 = vector.load %arg18[%c56_250, %c64_251] : memref<72x576xf32, #tpu.memory_space<vmem>>, vector<8x64xf32>
    tpu.vector_store %arg18[%c56_250, %c64_251], %219 {strides = array<i32>} : memref<72x576xf32, #tpu.memory_space<vmem>>, vector<8x64xf32>,
    %c256_252 = arith.constant 256 : index
    %c0_253 = arith.constant 0 : index
    %221 = vector.load %arg17[%c256_252, %c0_253] : memref<392x64xf32, #tpu.memory_space<vmem>>, vector<8x64xf32>
    %c56_254 = arith.constant 56 : index
    %c128_255 = arith.constant 128 : index
    %222 = vector.load %arg18[%c56_254, %c128_255] : memref<72x576xf32, #tpu.memory_space<vmem>>, vector<8x64xf32>
    tpu.vector_store %arg18[%c56_254, %c128_255], %221 {strides = array<i32>} : memref<72x576xf32, #tpu.memory_space<vmem>>, vector<8x64xf32>,
    %c296_256 = arith.constant 296 : index
    %c0_257 = arith.constant 0 : index
    %223 = vector.load %arg17[%c296_256, %c0_257] : memref<392x64xf32, #tpu.memory_space<vmem>>, vector<8x64xf32>
    %c56_258 = arith.constant 56 : index
    %c192_259 = arith.constant 192 : index
    %224 = vector.load %arg18[%c56_258, %c192_259] : memref<72x576xf32, #tpu.memory_space<vmem>>, vector<8x64xf32>
    tpu.vector_store %arg18[%c56_258, %c192_259], %223 {strides = array<i32>} : memref<72x576xf32, #tpu.memory_space<vmem>>, vector<8x64xf32>,
    %c304 = arith.constant 304 : index
    %c0_260 = arith.constant 0 : index
    %225 = vector.load %arg17[%c304, %c0_260] : memref<392x64xf32, #tpu.memory_space<vmem>>, vector<8x64xf32>
    %c56_261 = arith.constant 56 : index
    %c256_262 = arith.constant 256 : index
    %226 = vector.load %arg18[%c56_261, %c256_262] : memref<72x576xf32, #tpu.memory_space<vmem>>, vector<8x64xf32>
    tpu.vector_store %arg18[%c56_261, %c256_262], %225 {strides = array<i32>} : memref<72x576xf32, #tpu.memory_space<vmem>>, vector<8x64xf32>,
    %c312 = arith.constant 312 : index
    %c0_263 = arith.constant 0 : index
    %227 = vector.load %arg17[%c312, %c0_263] : memref<392x64xf32, #tpu.memory_space<vmem>>, vector<8x64xf32>
    %c56_264 = arith.constant 56 : index
    %c320_265 = arith.constant 320 : index
    %228 = vector.load %arg18[%c56_264, %c320_265] : memref<72x576xf32, #tpu.memory_space<vmem>>, vector<8x64xf32>
    tpu.vector_store %arg18[%c56_264, %c320_265], %227 {strides = array<i32>} : memref<72x576xf32, #tpu.memory_space<vmem>>, vector<8x64xf32>,
    %c352_266 = arith.constant 352 : index
    %c0_267 = arith.constant 0 : index
    %229 = vector.load %arg17[%c352_266, %c0_267] : memref<392x64xf32, #tpu.memory_space<vmem>>, vector<8x64xf32>
    %c56_268 = arith.constant 56 : index
    %c384_269 = arith.constant 384 : index
    %230 = vector.load %arg18[%c56_268, %c384_269] : memref<72x576xf32, #tpu.memory_space<vmem>>, vector<8x64xf32>
    tpu.vector_store %arg18[%c56_268, %c384_269], %229 {strides = array<i32>} : memref<72x576xf32, #tpu.memory_space<vmem>>, vector<8x64xf32>,
    %c360 = arith.constant 360 : index
    %c0_270 = arith.constant 0 : index
    %231 = vector.load %arg17[%c360, %c0_270] : memref<392x64xf32, #tpu.memory_space<vmem>>, vector<8x64xf32>
    %c56_271 = arith.constant 56 : index
    %c448_272 = arith.constant 448 : index
    %232 = vector.load %arg18[%c56_271, %c448_272] : memref<72x576xf32, #tpu.memory_space<vmem>>, vector<8x64xf32>
    tpu.vector_store %arg18[%c56_271, %c448_272], %231 {strides = array<i32>} : memref<72x576xf32, #tpu.memory_space<vmem>>, vector<8x64xf32>,
    %c368 = arith.constant 368 : index
    %c0_273 = arith.constant 0 : index
    %233 = vector.load %arg17[%c368, %c0_273] : memref<392x64xf32, #tpu.memory_space<vmem>>, vector<8x64xf32>
    %c56_274 = arith.constant 56 : index
    %c512_275 = arith.constant 512 : index
    %234 = vector.load %arg18[%c56_274, %c512_275] : memref<72x576xf32, #tpu.memory_space<vmem>>, vector<8x64xf32>
    tpu.vector_store %arg18[%c56_274, %c512_275], %233 {strides = array<i32>} : memref<72x576xf32, #tpu.memory_space<vmem>>, vector<8x64xf32>,
    %c256_276 = arith.constant 256 : index
    %c0_277 = arith.constant 0 : index
    %235 = vector.load %arg17[%c256_276, %c0_277] : memref<392x64xf32, #tpu.memory_space<vmem>>, vector<8x64xf32>
    %c64_278 = arith.constant 64 : index
    %c0_279 = arith.constant 0 : index
    %236 = vector.load %arg18[%c64_278, %c0_279] : memref<72x576xf32, #tpu.memory_space<vmem>>, vector<8x64xf32>
    tpu.vector_store %arg18[%c64_278, %c0_279], %235 {strides = array<i32>} : memref<72x576xf32, #tpu.memory_space<vmem>>, vector<8x64xf32>,
    %c264_280 = arith.constant 264 : index
    %c0_281 = arith.constant 0 : index
    %237 = vector.load %arg17[%c264_280, %c0_281] : memref<392x64xf32, #tpu.memory_space<vmem>>, vector<8x64xf32>
    %c64_282 = arith.constant 64 : index
    %c64_283 = arith.constant 64 : index
    %238 = vector.load %arg18[%c64_282, %c64_283] : memref<72x576xf32, #tpu.memory_space<vmem>>, vector<8x64xf32>
    tpu.vector_store %arg18[%c64_282, %c64_283], %237 {strides = array<i32>} : memref<72x576xf32, #tpu.memory_space<vmem>>, vector<8x64xf32>,
    %c272_284 = arith.constant 272 : index
    %c0_285 = arith.constant 0 : index
    %239 = vector.load %arg17[%c272_284, %c0_285] : memref<392x64xf32, #tpu.memory_space<vmem>>, vector<8x64xf32>
    %c64_286 = arith.constant 64 : index
    %c128_287 = arith.constant 128 : index
    %240 = vector.load %arg18[%c64_286, %c128_287] : memref<72x576xf32, #tpu.memory_space<vmem>>, vector<8x64xf32>
    tpu.vector_store %arg18[%c64_286, %c128_287], %239 {strides = array<i32>} : memref<72x576xf32, #tpu.memory_space<vmem>>, vector<8x64xf32>,
    %c312_288 = arith.constant 312 : index
    %c0_289 = arith.constant 0 : index
    %241 = vector.load %arg17[%c312_288, %c0_289] : memref<392x64xf32, #tpu.memory_space<vmem>>, vector<8x64xf32>
    %c64_290 = arith.constant 64 : index
    %c192_291 = arith.constant 192 : index
    %242 = vector.load %arg18[%c64_290, %c192_291] : memref<72x576xf32, #tpu.memory_space<vmem>>, vector<8x64xf32>
    tpu.vector_store %arg18[%c64_290, %c192_291], %241 {strides = array<i32>} : memref<72x576xf32, #tpu.memory_space<vmem>>, vector<8x64xf32>,
    %c320_292 = arith.constant 320 : index
    %c0_293 = arith.constant 0 : index
    %243 = vector.load %arg17[%c320_292, %c0_293] : memref<392x64xf32, #tpu.memory_space<vmem>>, vector<8x64xf32>
    %c64_294 = arith.constant 64 : index
    %c256_295 = arith.constant 256 : index
    %244 = vector.load %arg18[%c64_294, %c256_295] : memref<72x576xf32, #tpu.memory_space<vmem>>, vector<8x64xf32>
    tpu.vector_store %arg18[%c64_294, %c256_295], %243 {strides = array<i32>} : memref<72x576xf32, #tpu.memory_space<vmem>>, vector<8x64xf32>,
    %c328 = arith.constant 328 : index
    %c0_296 = arith.constant 0 : index
    %245 = vector.load %arg17[%c328, %c0_296] : memref<392x64xf32, #tpu.memory_space<vmem>>, vector<8x64xf32>
    %c64_297 = arith.constant 64 : index
    %c320_298 = arith.constant 320 : index
    %246 = vector.load %arg18[%c64_297, %c320_298] : memref<72x576xf32, #tpu.memory_space<vmem>>, vector<8x64xf32>
    tpu.vector_store %arg18[%c64_297, %c320_298], %245 {strides = array<i32>} : memref<72x576xf32, #tpu.memory_space<vmem>>, vector<8x64xf32>,
    %c368_299 = arith.constant 368 : index
    %c0_300 = arith.constant 0 : index
    %247 = vector.load %arg17[%c368_299, %c0_300] : memref<392x64xf32, #tpu.memory_space<vmem>>, vector<8x64xf32>
    %c64_301 = arith.constant 64 : index
    %c384_302 = arith.constant 384 : index
    %248 = vector.load %arg18[%c64_301, %c384_302] : memref<72x576xf32, #tpu.memory_space<vmem>>, vector<8x64xf32>
    tpu.vector_store %arg18[%c64_301, %c384_302], %247 {strides = array<i32>} : memref<72x576xf32, #tpu.memory_space<vmem>>, vector<8x64xf32>,
    %c376 = arith.constant 376 : index
    %c0_303 = arith.constant 0 : index
    %249 = vector.load %arg17[%c376, %c0_303] : memref<392x64xf32, #tpu.memory_space<vmem>>, vector<8x64xf32>
    %c64_304 = arith.constant 64 : index
    %c448_305 = arith.constant 448 : index
    %250 = vector.load %arg18[%c64_304, %c448_305] : memref<72x576xf32, #tpu.memory_space<vmem>>, vector<8x64xf32>
    tpu.vector_store %arg18[%c64_304, %c448_305], %249 {strides = array<i32>} : memref<72x576xf32, #tpu.memory_space<vmem>>, vector<8x64xf32>,
    %c384_306 = arith.constant 384 : index
    %c0_307 = arith.constant 0 : index
    %251 = vector.load %arg17[%c384_306, %c0_307] : memref<392x64xf32, #tpu.memory_space<vmem>>, vector<8x64xf32>
    %c64_308 = arith.constant 64 : index
    %c512_309 = arith.constant 512 : index
    %252 = vector.load %arg18[%c64_308, %c512_309] : memref<72x576xf32, #tpu.memory_space<vmem>>, vector<8x64xf32>
    tpu.vector_store %arg18[%c64_308, %c512_309], %251 {strides = array<i32>} : memref<72x576xf32, #tpu.memory_space<vmem>>, vector<8x64xf32>,
    %c0_310 = arith.constant 0 : index
    %c0_311 = arith.constant 0 : index
    %253 = vector.load %arg18[%c0_310, %c0_311] : memref<72x576xf32, #tpu.memory_space<vmem>>, vector<72x576xf32>
    %254 = arith.truncf %253 : vector<72x576xf32> to vector<72x576xbf16>
    %c0_312 = arith.constant 0 : index
    %c0_313 = arith.constant 0 : index
    %255 = vector.load %arg8[%c0_312, %c0_313] : memref<576x128xbf16, #tpu.memory_space<vmem>>, vector<576x128xbf16>
    %cst_314 = arith.constant dense<0.000000e+00> : vector<72x128xf32>
    %256 = tpu.matmul %254, %255, %cst_314 {dimension_numbers = #tpu.dot_dimension_numbers<[1], [0], [0], [1], [0, 0, 1, 1], [], []>} : vector<72x576xbf16>, vector<576x128xbf16>, vector<72x128xf32> -> vector<72x128xf32>
    %cst_315 = arith.constant dense<0.000000e+00> : vector<128xf32>
    %257 = vector.multi_reduction <add>, %256, %cst_315 [0] : vector<72x128xf32> to vector<128xf32>
    %258 = vector.shape_cast %257 : vector<128xf32> to vector<1x128xf32>
    %cst_316 = arith.constant 0.027777778 : f32
    %259 = vector.broadcast %cst_316 : f32 to vector<1x128xf32>
    %260 = arith.mulf %258, %259 : vector<1x128xf32>
    %261 = arith.mulf %256, %256 : vector<72x128xf32>
    %cst_317 = arith.constant dense<0.000000e+00> : vector<128xf32>
    %262 = vector.multi_reduction <add>, %261, %cst_317 [0] : vector<72x128xf32> to vector<128xf32>
    %263 = vector.shape_cast %262 : vector<128xf32> to vector<1x128xf32>
    %cst_318 = arith.constant 0.027777778 : f32
    %264 = vector.broadcast %cst_318 : f32 to vector<1x128xf32>
    %265 = arith.mulf %263, %264 : vector<1x128xf32>
    %266 = arith.mulf %260, %260 : vector<1x128xf32>
    %267 = arith.subf %265, %266 : vector<1x128xf32>
    %cst_319 = arith.constant 0.000000e+00 : f32
    %268 = vector.broadcast %cst_319 : f32 to vector<1x128xf32>
    %269 = arith.maximumf %267, %268 : vector<1x128xf32>
    %c0_320 = arith.constant 0 : index
    %c0_321 = arith.constant 0 : index
    %270 = vector.load %arg9[%c0_320, %c0_321] : memref<1x128xf32, #tpu.memory_space<vmem>>, vector<1x128xf32>
    %cst_322 = arith.constant 9.99999974E-6 : f32
    %271 = vector.broadcast %cst_322 : f32 to vector<1x128xf32>
    %272 = arith.addf %269, %271 : vector<1x128xf32>
    %273 = math.rsqrt %272 : vector<1x128xf32>
    %274 = arith.mulf %270, %273 : vector<1x128xf32>
    %c0_323 = arith.constant 0 : index
    %c0_324 = arith.constant 0 : index
    %275 = vector.load %arg10[%c0_323, %c0_324] : memref<1x128xf32, #tpu.memory_space<vmem>>, vector<1x128xf32>
    %276 = arith.mulf %260, %274 : vector<1x128xf32>
    %277 = arith.subf %275, %276 : vector<1x128xf32>
    %278 = vector.broadcast %274 : vector<1x128xf32> to vector<72x128xf32>
    %279 = arith.mulf %256, %278 : vector<72x128xf32>
    %280 = vector.broadcast %277 : vector<1x128xf32> to vector<72x128xf32>
    %281 = arith.addf %279, %280 : vector<72x128xf32>
    %cst_325 = arith.constant 0.000000e+00 : f32
    %282 = vector.broadcast %cst_325 : f32 to vector<72x128xf32>
    %283 = arith.maximumf %281, %282 : vector<72x128xf32>
    %284 = vector.extract_strided_slice %283 {offsets = [0, 0], sizes = [8, 128], strides = [1, 1]} : vector<72x128xf32> to vector<8x128xf32>
    %285 = vector.extract_strided_slice %283 {offsets = [8, 0], sizes = [8, 128], strides = [1, 1]} : vector<72x128xf32> to vector<8x128xf32>
    %286 = arith.addf %284, %285 : vector<8x128xf32>
    %287 = vector.extract_strided_slice %283 {offsets = [16, 0], sizes = [8, 128], strides = [1, 1]} : vector<72x128xf32> to vector<8x128xf32>
    %288 = arith.addf %286, %287 : vector<8x128xf32>
    %289 = vector.extract_strided_slice %283 {offsets = [24, 0], sizes = [8, 128], strides = [1, 1]} : vector<72x128xf32> to vector<8x128xf32>
    %290 = arith.addf %288, %289 : vector<8x128xf32>
    %291 = vector.extract_strided_slice %283 {offsets = [32, 0], sizes = [8, 128], strides = [1, 1]} : vector<72x128xf32> to vector<8x128xf32>
    %292 = arith.addf %290, %291 : vector<8x128xf32>
    %293 = vector.extract_strided_slice %283 {offsets = [40, 0], sizes = [8, 128], strides = [1, 1]} : vector<72x128xf32> to vector<8x128xf32>
    %294 = arith.addf %292, %293 : vector<8x128xf32>
    %295 = vector.extract_strided_slice %283 {offsets = [48, 0], sizes = [8, 128], strides = [1, 1]} : vector<72x128xf32> to vector<8x128xf32>
    %296 = arith.addf %294, %295 : vector<8x128xf32>
    %297 = vector.extract_strided_slice %283 {offsets = [56, 0], sizes = [8, 128], strides = [1, 1]} : vector<72x128xf32> to vector<8x128xf32>
    %298 = arith.addf %296, %297 : vector<8x128xf32>
    %299 = vector.extract_strided_slice %283 {offsets = [64, 0], sizes = [8, 128], strides = [1, 1]} : vector<72x128xf32> to vector<8x128xf32>
    %300 = arith.addf %298, %299 : vector<8x128xf32>
    %cst_326 = arith.constant 0.111111112 : f32
    %301 = vector.broadcast %cst_326 : f32 to vector<8x1xf32>
    %302 = arith.mulf %4, %301 : vector<8x1xf32>
    %303 = vector.broadcast %302 : vector<8x1xf32> to vector<8x128xf32>
    %304 = arith.mulf %300, %303 : vector<8x128xf32>
    %305 = tpu.concatenate %57, %304 in 1 : vector<8x128xf32>, vector<8x128xf32> -> vector<8x256xf32>
    %306 = arith.truncf %305 : vector<8x256xf32> to vector<8x256xbf16>
    %c0_327 = arith.constant 0 : index
    %c0_328 = arith.constant 0 : index
    %307 = vector.load %arg11[%c0_327, %c0_328] : memref<256x256xbf16, #tpu.memory_space<vmem>>, vector<256x256xbf16>
    %cst_329 = arith.constant dense<0.000000e+00> : vector<8x256xf32>
    %308 = tpu.matmul %306, %307, %cst_329 {dimension_numbers = #tpu.dot_dimension_numbers<[1], [0], [0], [1], [0, 0, 1, 1], [], []>} : vector<8x256xbf16>, vector<256x256xbf16>, vector<8x256xf32> -> vector<8x256xf32>
    %c0_330 = arith.constant 0 : index
    %c0_331 = arith.constant 0 : index
    %309 = vector.load %arg12[%c0_330, %c0_331] : memref<1x256xf32, #tpu.memory_space<vmem>>, vector<1x256xf32>
    %c0_332 = arith.constant 0 : index
    %c0_333 = arith.constant 0 : index
    %310 = vector.load %arg13[%c0_332, %c0_333] : memref<1x256xf32, #tpu.memory_space<vmem>>, vector<1x256xf32>
    %cst_334 = arith.constant dense<0.000000e+00> : vector<256xf32>
    %311 = vector.multi_reduction <add>, %308, %cst_334 [0] : vector<8x256xf32> to vector<256xf32>
    %312 = vector.shape_cast %311 : vector<256xf32> to vector<1x256xf32>
    %cst_335 = arith.constant 2.500000e-01 : f32
    %313 = vector.broadcast %cst_335 : f32 to vector<1x256xf32>
    %314 = arith.mulf %312, %313 : vector<1x256xf32>
    %315 = arith.mulf %308, %308 : vector<8x256xf32>
    %cst_336 = arith.constant dense<0.000000e+00> : vector<256xf32>
    %316 = vector.multi_reduction <add>, %315, %cst_336 [0] : vector<8x256xf32> to vector<256xf32>
    %317 = vector.shape_cast %316 : vector<256xf32> to vector<1x256xf32>
    %cst_337 = arith.constant 2.500000e-01 : f32
    %318 = vector.broadcast %cst_337 : f32 to vector<1x256xf32>
    %319 = arith.mulf %317, %318 : vector<1x256xf32>
    %320 = arith.mulf %314, %314 : vector<1x256xf32>
    %321 = arith.subf %319, %320 : vector<1x256xf32>
    %cst_338 = arith.constant 0.000000e+00 : f32
    %322 = vector.broadcast %cst_338 : f32 to vector<1x256xf32>
    %323 = arith.maximumf %321, %322 : vector<1x256xf32>
    %cst_339 = arith.constant 9.99999974E-6 : f32
    %324 = vector.broadcast %cst_339 : f32 to vector<1x256xf32>
    %325 = arith.addf %323, %324 : vector<1x256xf32>
    %326 = math.rsqrt %325 : vector<1x256xf32>
    %327 = arith.mulf %309, %326 : vector<1x256xf32>
    %328 = arith.mulf %314, %327 : vector<1x256xf32>
    %329 = arith.subf %310, %328 : vector<1x256xf32>
    %330 = vector.broadcast %327 : vector<1x256xf32> to vector<8x256xf32>
    %331 = arith.mulf %308, %330 : vector<8x256xf32>
    %332 = vector.broadcast %329 : vector<1x256xf32> to vector<8x256xf32>
    %333 = arith.addf %331, %332 : vector<8x256xf32>
    %cst_340 = arith.constant 0.000000e+00 : f32
    %334 = vector.broadcast %cst_340 : f32 to vector<8x256xf32>
    %335 = arith.maximumf %333, %334 : vector<8x256xf32>
    %336 = arith.truncf %335 : vector<8x256xf32> to vector<8x256xbf16>
    %c0_341 = arith.constant 0 : index
    %c0_342 = arith.constant 0 : index
    %337 = vector.load %arg14[%c0_341, %c0_342] : memref<256x32xbf16, #tpu.memory_space<vmem>>, vector<256x32xbf16>
    %cst_343 = arith.constant dense<0.000000e+00> : vector<8x32xf32>
    %338 = tpu.matmul %336, %337, %cst_343 {dimension_numbers = #tpu.dot_dimension_numbers<[1], [0], [0], [1], [0, 0, 1, 1], [], []>} : vector<8x256xbf16>, vector<256x32xbf16>, vector<8x32xf32> -> vector<8x32xf32>
    %c0_344 = arith.constant 0 : index
    %c0_345 = arith.constant 0 : index
    %339 = vector.load %arg15[%c0_344, %c0_345] : memref<1x32xf32, #tpu.memory_space<vmem>>, vector<1x32xf32>
    %340 = vector.broadcast %339 : vector<1x32xf32> to vector<8x32xf32>
    %341 = arith.addf %338, %340 : vector<8x32xf32>
    %342 = vector.extract_strided_slice %341 {offsets = [0, 0], sizes = [4, 32], strides = [1, 1]} : vector<8x32xf32> to vector<4x32xf32>
    %c0_346 = arith.constant 0 : index
    %c0_347 = arith.constant 0 : index
    %343 = vector.load %arg16[%c0_346, %c0_347] : memref<4x32xf32, #tpu.memory_space<vmem>>, vector<4x32xf32>
    tpu.vector_store %arg16[%c0_346, %c0_347], %342 {strides = array<i32>} : memref<4x32xf32, #tpu.memory_space<vmem>>, vector<4x32xf32>,
    return
  }
}

</mosaic_0001>

<bundles_post_ra>
// kernel: supervisor_forward.1
= control target key start
LH: loop header
LB: loop body
LE: loop exit
PB: predicated region body
PF: predicated region fallthrough
CT: control target
= control target key end

     0   :  { %s5921_s0 = inlined_call_operand.vmem [shape: bf16[8,10], index: 0, kind: input, shape index: {}]   ;;  %s5922_s1 = inlined_call_operand.vmem [shape: bf16[392,27], index: 1, kind: input, shape index: {}]   ;;  %s5923_s2 = inlined_call_operand.vmem [shape: bf16[10,128], index: 2, kind: input, shape index: {}]   ;;  %s5924_s3 = inlined_call_operand.vmem [shape: f32[1,128], index: 3, kind: input, shape index: {}]   ;;  %s5925_s4 = inlined_call_operand.vmem [shape: f32[1,128], index: 4, kind: input, shape index: {}]   ;;  %s5926_s5 = inlined_call_operand.vmem [shape: bf16[27,64], index: 5, kind: input, shape index: {}]   ;;  %s5927_s6 = inlined_call_operand.vmem [shape: f32[1,64], index: 6, kind: input, shape index: {}]   ;;  %s5928_s7 = inlined_call_operand.vmem [shape: f32[1,64], index: 7, kind: input, shape index: {}]   ;;  %s5929_s8 = inlined_call_operand.vmem [shape: bf16[576,128], index: 8, kind: input, shape index: {}]   ;;  %s5930_s9 = inlined_call_operand.vmem [shape: f32[1,128], index: 9, kind: input, shape index: {}]   ;;  %s5931_s10 = inlined_call_operand.vmem [shape: f32[1,128], index: 10, kind: input, shape index: {}]   ;;  %s5932_s11 = inlined_call_operand.vmem [shape: bf16[256,256], index: 11, kind: input, shape index: {}]   ;;  %s5933_s12 = inlined_call_operand.vmem [shape: f32[1,256], index: 12, kind: input, shape index: {}]   ;;  %s5934_s13 = inlined_call_operand.vmem [shape: f32[1,256], index: 13, kind: input, shape index: {}]   ;;  %s5935_s14 = inlined_call_operand.vmem [shape: bf16[256,32], index: 14, kind: input, shape index: {}]   ;;  %s5936_s15 = inlined_call_operand.vmem [shape: f32[1,32], index: 15, kind: input, shape index: {}]   ;;  %s5937_s16 = inlined_call_operand.hbm [shape: f32[4,32], index: 16, kind: output, shape index: {}]  }
   0x1   :  { %5960 = sst [smem:[#allocation48_spill]] %s5921_s0 }
   0x2   :  { %vm855_vm0 = vcmask 1044480   ;;  %v3464_v0 = vld [vmem:[%s5926_s5 + $0x8] sm:$0xf]  ;;  %v3858_v1 = vld [vmem:[%s5926_s5 + $0x8] sm:$0x30]  ;;  %vm1179_vm1 = vcmask 1045504  }
   0x3   :  { %v3465_v2 = vor.u32 %v3858_v1, %v3464_v0  ;;  %v3988_v3 = vmov 65535  }
   0x4   :  { %v1180_v4 = vsel %vm855_vm0, 4294967295, %v3988_v3 }
   0x5   :  { %21 = vsyncpa [#allocation5], 0  ;;  %v1181_v5 = vsel %vm1179_vm1, %v1180_v4, 0  ;;  %v3857_v7 = vld [vmem:[%s5926_s5] sm:$0xff]  ;;  %vm1103_vm2 = vcmask 220160   ;;  %v3834_v9 = vld [vmem:[%s5922_s1 + $0x8] sm:$0xff] }
   0x6   :  { %v1183_v6 = vand.u32 %v3465_v2, %v1181_v5  ;;  %v3833_v8 = vld [vmem:[%s5922_s1] sm:$0xff]  ;;  %v3835_v10 = vld [vmem:[%s5922_s1 + $0x10] sm:$0xff]  ;;  %v3836_v11 = vld [vmem:[%s5922_s1 + $0x18] sm:$0xff]  ;;  %vm1320_vm3 = vcmask 523264   ;;  %s6120_s22 = sld [smem:[#allocation48_spill]]  ;;  %s3991_s17 = smov [#allocation4]  }
   0x7   :  { %v3837_v12 = vld [vmem:[%s5922_s1 + $0x20] sm:$0xff]  ;;  %v3838_v13 = vld [vmem:[%s5922_s1 + $0x28] sm:$0xff]  ;;  %v3839_v14 = vld [vmem:[%s5922_s1 + $0x30] sm:$0xff]  ;;  %s3298_s20 = sshll.u32 %s5937_s16, 4  ;;  %s3299_s20 = int_to_ptr.hbm [resolvable:$true] %s3298_s20 }
   0x8   :  { %1191 = vmatpush.bf16.msra.mxu1 %v1183_v6  ;;  %3943 = vmatpush.bf16.msra.mxu2 %v1183_v6  ;;  %v3840_v15 = vld [vmem:[%s5922_s1 + $0x38] sm:$0xff]  ;;  %v3841_v16 = vld [vmem:[%s5922_s1 + $0x40] sm:$0xff]  ;;  %v3842_v19 = vld [vmem:[%s5922_s1 + $0x48] sm:$0xff] }
   0x9   :  { %3944 = vmatpush.bf16.msra.mxu3 %v1183_v6  ;;  %v3849_v21 = vld [vmem:[%s5922_s1 + $0x80] sm:$0xff]  ;;  %v3843_v23 = vld [vmem:[%s5922_s1 + $0x50] sm:$0xff]  ;;  %v3850_v25 = vld [vmem:[%s5922_s1 + $0x88] sm:$0xff] }
   0xa   :  { %v3844_v27 = vld [vmem:[%s5922_s1 + $0x58] sm:$0xff]  ;;  %v3851_v29 = vld [vmem:[%s5922_s1 + $0x90] sm:$0xff]  ;;  %v3854_v31 = vld [vmem:[%s5922_s1 + $0xa8] sm:$0xff] }
   0xb   :  { %v3845_v32 = vld [vmem:[%s5922_s1 + $0x60] sm:$0xff]  ;;  %v3852_v34 = vld [vmem:[%s5922_s1 + $0x98] sm:$0xff]  ;;  %v3855_v36 = vld [vmem:[%s5922_s1 + $0xb0] sm:$0xff] }
   0xc   :  { %1192 = vmatpush.bf16.msra.mxu1 %v3857_v7  ;;  %3945 = vmatpush.bf16.msra.mxu2 %v3857_v7  ;;  %v3846_v37 = vld [vmem:[%s5922_s1 + $0x68] sm:$0xff]  ;;  %v3853_v39 = vld [vmem:[%s5922_s1 + $0xa0] sm:$0xff]  ;;  %v3856_v41 = vld [vmem:[%s5922_s1 + $0xb8] sm:$0xff] }
   0xd   :  { %3946 = vmatpush.bf16.msra.mxu3 %v3857_v7  ;;  %v3847_v42 = vld [vmem:[%s5922_s1 + $0x70] sm:$0xff]  ;;  %v964_v45 = vld [vmem:[%s5922_s1 + $0xc0] sm:$0xf]  ;;  %v3848_v48 = vld [vmem:[%s5922_s1 + $0x78] sm:$0xff] }
   0xe   :  { %v1066_v46 = vunpack.c.l.b16 %v964_v45 }
   0xf   :  { %3466 = vmatmul.msk.bf16.vlgmr.msra.gmra.mxu1 %vm1103_vm2, %v3833_v8  ;;  %3482 = vmatmul.msk.bf16.vlgmr.msra.gmra.mxu2 %vm1103_vm2, %v3849_v21 }
  0x10   :  { %3487 = vmatmul.msk.bf16.vlgmr.msra.gmra.mxu3 %vm1103_vm2, %v3854_v31  ;;  %v1091_v47 = vpack.c.b16 %v1066_v46, %v1066_v46 }
  0x1f   :  { %3467 = vmatmul.msk.bf16.gmra.mxu1 %vm1103_vm2, %v3834_v9  ;;  %3483 = vmatmul.msk.bf16.gmra.mxu2 %vm1103_vm2, %v3850_v25 }
  0x20   :  { %3488 = vmatmul.msk.bf16.gmra.mxu3 %vm1103_vm2, %v3855_v36 }
  0x2f   :  { %3468 = vmatmul.msk.bf16.gmra.mxu1 %vm1103_vm2, %v3835_v10  ;;  %3484 = vmatmul.msk.bf16.gmra.mxu2 %vm1103_vm2, %v3851_v29 }
  0x30   :  { %3489 = vmatmul.msk.bf16.gmra.mxu3 %vm1103_vm2, %v3856_v41 }
  0x3f   :  { %3469 = vmatmul.msk.bf16.gmra.mxu1 %vm1103_vm2, %v3836_v11  ;;  %3485 = vmatmul.msk.bf16.gmra.mxu2 %vm1103_vm2, %v3852_v34 }
  0x40   :  { %3490 = vmatmul.msk.bf16.gmra.mxu3 %vm1103_vm2, %v1091_v47 }
  0x4f   :  { %3470 = vmatmul.msk.bf16.gmra.mxu1 %vm1103_vm2, %v3837_v12  ;;  %3486 = vmatmul.msk.bf16.gmra.mxu2 %vm1103_vm2, %v3853_v39 }
  0x5f   :  { %3471 = vmatmul.msk.bf16.gmra.mxu1 %vm1103_vm2, %v3838_v13 }
  0x6f   :  { %3472 = vmatmul.msk.bf16.gmra.mxu1 %vm1103_vm2, %v3839_v14 }
  0x7f   :  { %3473 = vmatmul.msk.bf16.gmra.mxu1 %vm1103_vm2, %v3840_v15 }
  0x8c   :  { %v4122_v17 = vpop.f32.mrf.mxu1 }
  0x8d   :  { %v1425_v62 = vmul.f32 %v4122_v17, %v4122_v17  ;;  %v1321_v1 = vsel %vm1320_vm3, %v4122_v17, 0.0 }
  0x8f   :  { %3474 = vmatmul.msk.bf16.gmra.mxu1 %vm1103_vm2, %v3841_v16  ;;  %v1474_v6 = vsel %vm1320_vm3, %v1425_v62, 0.0 }
  0x92   :  { %v4231_v57 = vpop.f32.mrf.mxu2 }
  0x93   :  { %5970 = vst [vmem:[#allocation16_spill] sm:$0xff] %v4231_v57 }
  0x94   :  { %v4125_v18 = vpop.f32.mrf.mxu1 }
  0x95   :  { %v1426_v61 = vmul.f32 %v4125_v18, %v4125_v18  ;;  %v1322_v63 = vsel %vm1320_vm3, %v4125_v18, 0.0 }
  0x96   :  { %v1323_v5 = vadd.f32 %v1322_v63, %v1321_v1 }
  0x97   :  { %v1475_v2 = vsel %vm1320_vm3, %v1426_v61, 0.0 }
  0x98   :  { %v1476_v11 = vadd.f32 %v1475_v2, %v1474_v6 }
  0x9a   :  { %v4237_v60 = vpop.f32.mrf.mxu2 }
  0x9c   :  { %v4130_v20 = vpop.f32.mrf.mxu1 }
  0x9d   :  { %v1427_v0 = vmul.f32 %v4130_v20, %v4130_v20  ;;  %v1324_v3 = vsel %vm1320_vm3, %v4130_v20, 0.0 }
  0x9e   :  { %v1325_v10 = vadd.f32 %v1324_v3, %v1323_v5 }
  0x9f   :  { %3475 = vmatmul.msk.bf16.gmra.mxu1 %vm1103_vm2, %v3842_v19  ;;  %v1477_v7 = vsel %vm1320_vm3, %v1427_v0, 0.0 }
  0xa0   :  { %v1478_v16 = vadd.f32 %v1477_v7, %v1476_v11 }
  0xa2   :  { %v4267_v21 = vpop.f32.mrf.mxu2 }
  0xa4   :  { %v4136_v22 = vpop.f32.mrf.mxu1 }
  0xa5   :  { %v1428_v4 = vmul.f32 %v4136_v22, %v4136_v22  ;;  %v1326_v8 = vsel %vm1320_vm3, %v4136_v22, 0.0 }
  0xa6   :  { %v1327_v19 = vadd.f32 %v1326_v8, %v1325_v10 }
  0xa7   :  { %v1479_v13 = vsel %vm1320_vm3, %v1428_v4, 0.0 }
  0xac   :  { %v4142_v24 = vpop.f32.mrf.mxu1 }
  0xad   :  { %v1429_v9 = vmul.f32 %v4142_v24, %v4142_v24  ;;  %v1328_v14 = vsel %vm1320_vm3, %v4142_v24, 0.0 }
  0xae   :  { %v1329_v31 = vadd.f32 %v1328_v14, %v1327_v19 }
  0xaf   :  { %3476 = vmatmul.msk.bf16.gmra.mxu1 %vm1103_vm2, %v3843_v23  ;;  %v4269_v23 = vpop.f32.mrf.mxu3  ;;  %v1481_v25 = vsel %vm1320_vm3, %v1429_v9, 0.0  ;;  %v4300_v9 = vpop.f32.mrf.mxu2 }
  0xb4   :  { %v4148_v26 = vpop.f32.mrf.mxu1 }
  0xb5   :  { %v1430_v15 = vmul.f32 %v4148_v26, %v4148_v26 }
  0xb7   :  { %v1483_v34 = vsel %vm1320_vm3, %v1430_v15, 0.0  ;;  %v4293_v3 = vpop.f32.mrf.mxu3 }
  0xbc   :  { %v4154_v28 = vpop.f32.mrf.mxu1 }
  0xbd   :  { %v1431_v29 = vmul.f32 %v4154_v28, %v4154_v28  ;;  %v1332_v36 = vsel %vm1320_vm3, %v4154_v28, 0.0 }
  0xbf   :  { %3477 = vmatmul.msk.bf16.gmra.mxu1 %vm1103_vm2, %v3844_v27  ;;  %v1330_v27 = vsel %vm1320_vm3, %v4148_v26, 0.0 }
  0xc0   :  { %v1331_v41 = vadd.f32 %v1330_v27, %v1329_v31 }
  0xc2   :  { %v1333_v47 = vadd.f32 %v1332_v36, %v1331_v41  ;;  %v4319_v41 = vpop.f32.mrf.mxu3 }
  0xc4   :  { %v4160_v30 = vpop.f32.mrf.mxu1 }
  0xc5   :  { %v1334_v45 = vsel %vm1320_vm3, %v4160_v30, 0.0 }
  0xc6   :  { %v1335_v2 = vadd.f32 %v1334_v45, %v1333_v47 }
  0xcc   :  { %v4170_v33 = vpop.f32.mrf.mxu1 }
  0xcd   :  { %v1433_v46 = vmul.f32 %v4170_v33, %v4170_v33  ;;  %v1336_v63 = vsel %vm1320_vm3, %v4170_v33, 0.0 }
  0xce   :  { %v1337_v7 = vadd.f32 %v1336_v63, %v1335_v2 }
  0xcf   :  { %3478 = vmatmul.msk.bf16.gmra.mxu1 %vm1103_vm2, %v3845_v32  ;;  %v1480_v32 = vadd.f32 %v1479_v13, %v1478_v16  ;;  %v1489_v4 = vsel %vm1320_vm3, %v1433_v46, 0.0 }
  0xd1   :  { %v1482_v39 = vadd.f32 %v1481_v25, %v1480_v32 }
  0xd4   :  { %v4176_v35 = vpop.f32.mrf.mxu1 }
  0xd5   :  { %v1434_v0 = vmul.f32 %v4176_v35, %v4176_v35  ;;  %v1338_v5 = vsel %vm1320_vm3, %v4176_v35, 0.0 }
  0xd6   :  { %v1339_v15 = vadd.f32 %v1338_v5, %v1337_v7 }
  0xd7   :  { %v1491_v10 = vsel %vm1320_vm3, %v1434_v0, 0.0 }
  0xdc   :  { %v4186_v38 = vpop.f32.mrf.mxu1 }
  0xdd   :  { %v1435_v6 = vmul.f32 %v4186_v38, %v4186_v38  ;;  %v1340_v11 = vsel %vm1320_vm3, %v4186_v38, 0.0 }
  0xdf   :  { %3479 = vmatmul.msk.bf16.gmra.mxu1 %vm1103_vm2, %v3846_v37  ;;  %v1432_v37 = vmul.f32 %v4160_v30, %v4160_v30  ;;  %v1493_v16 = vsel %vm1320_vm3, %v1435_v6, 0.0 }
  0xe1   :  { %v1487_v62 = vsel %vm1320_vm3, %v1432_v37, 0.0 }
  0xe4   :  { %v4192_v40 = vpop.f32.mrf.mxu1 }
  0xe5   :  { %v1436_v13 = vmul.f32 %v4192_v40, %v4192_v40  ;;  %v1342_v19 = vsel %vm1320_vm3, %v4192_v40, 0.0 }
  0xe7   :  { %v1495_v32 = vsel %vm1320_vm3, %v1436_v13, 0.0 }
  0xec   :  { %v4202_v43 = vpop.f32.mrf.mxu1 }
  0xed   :  { %v1437_v25 = vmul.f32 %v4202_v43, %v4202_v43 }
  0xef   :  { %3480 = vmatmul.msk.bf16.gmra.mxu1 %vm1103_vm2, %v3847_v42  ;;  %v1485_v42 = vsel %vm1320_vm3, %v1431_v29, 0.0  ;;  %v1341_v29 = vadd.f32 %v1340_v11, %v1339_v15 }
  0xf4   :  { %v4205_v44 = vpop.f32.mrf.mxu1 }
  0xf5   :  { %5961 = vst [vmem:[#allocation7_spill] sm:$0xff] %v4205_v44  ;;  %v1438_v36 = vmul.f32 %v4205_v44, %v4205_v44  ;;  %v1346_v45 = vsel %vm1320_vm3, %v4205_v44, 0.0 }
  0xfc   :  { %v4214_v49 = vpop.f32.mrf.mxu1 }
  0xfd   :  { %5962 = vst [vmem:[#allocation8_spill] sm:$0xff] %v4214_v49  ;;  %v1439_v46 = vmul.f32 %v4214_v49, %v4214_v49  ;;  %v1348_v63 = vsel %vm1320_vm3, %v4214_v49, 0.0 }
  0xff   :  { %3481 = vmatmul.msk.bf16.gmra.mxu1 %vm1103_vm2, %v3848_v48  ;;  %v1484_v48 = vadd.f32 %v1483_v34, %v1482_v39  ;;  %v1344_v34 = vsel %vm1320_vm3, %v4202_v43, 0.0  ;;  %v1343_v39 = vadd.f32 %v1342_v19, %v1341_v29  ;;  %v1501_v5 = vsel %vm1320_vm3, %v1439_v46, 0.0 }
 0x101   :  { %v1486_v1 = vadd.f32 %v1485_v42, %v1484_v48  ;;  %v1497_v42 = vsel %vm1320_vm3, %v1437_v25, 0.0  ;;  %v1345_v48 = vadd.f32 %v1344_v34, %v1343_v39  ;;  %v4345_v25 = vpop.f32.mrf.mxu3 }
 0x103   :  { %v1488_v8 = vadd.f32 %v1487_v62, %v1486_v1  ;;  %v1499_v62 = vsel %vm1320_vm3, %v1438_v36, 0.0  ;;  %v1347_v2 = vadd.f32 %v1346_v45, %v1345_v48 }
 0x104   :  { %v4217_v50 = vpop.f32.mrf.mxu1 }
 0x105   :  { %5963 = vst [vmem:[#allocation9_spill] sm:$0xff] %v4217_v50  ;;  %v1490_v14 = vadd.f32 %v1489_v4, %v1488_v8  ;;  %v1440_v0 = vmul.f32 %v4217_v50, %v4217_v50  ;;  %v4331_v4 = vpop.f32.mrf.mxu2  ;;  %v1350_v6 = vsel %vm1320_vm3, %v4217_v50, 0.0 }
 0x107   :  { %v1492_v27 = vadd.f32 %v1491_v10, %v1490_v14  ;;  %v1349_v10 = vadd.f32 %v1348_v63, %v1347_v2  ;;  %v1503_v13 = vsel %vm1320_vm3, %v1440_v0, 0.0 }
 0x109   :  { %v1494_v37 = vadd.f32 %v1493_v16, %v1492_v27  ;;  %v1351_v19 = vadd.f32 %v1350_v6, %v1349_v10 }
 0x10b   :  { %v1496_v47 = vadd.f32 %v1495_v32, %v1494_v37 }
 0x10c   :  { %v4219_v51 = vpop.f32.mrf.mxu1 }
 0x10d   :  { %5964 = vst [vmem:[#allocation10_spill] sm:$0xff] %v4219_v51  ;;  %v1498_v1 = vadd.f32 %v1497_v42, %v1496_v47  ;;  %v1441_v7 = vmul.f32 %v4219_v51, %v4219_v51  ;;  %v1352_v14 = vsel %vm1320_vm3, %v4219_v51, 0.0  ;;  %v4364_v2 = vpop.f32.mrf.mxu2 }
 0x10e   :  { %v1353_v36 = vadd.f32 %v1352_v14, %v1351_v19 }
 0x10f   :  { %v1500_v8 = vadd.f32 %v1499_v62, %v1498_v1  ;;  %v1505_v27 = vsel %vm1320_vm3, %v1441_v7, 0.0 }
 0x111   :  { %v1502_v16 = vadd.f32 %v1501_v5, %v1500_v8 }
 0x113   :  { %v1504_v34 = vadd.f32 %v1503_v13, %v1502_v16  ;;  %v4371_v13 = vpop.f32.mrf.mxu3 }
 0x114   :  { %v4221_v52 = vpop.f32.mrf.mxu1 }
 0x115   :  { %5965 = vst [vmem:[#allocation11_spill] sm:$0xff] %v4221_v52  ;;  %v1442_v15 = vmul.f32 %v4221_v52, %v4221_v52  ;;  %v1354_v29 = vsel %vm1320_vm3, %v4221_v52, 0.0  ;;  %v1506_v45 = vadd.f32 %v1505_v27, %v1504_v34 }
 0x116   :  { %v1355_v46 = vadd.f32 %v1354_v29, %v1353_v36 }
 0x117   :  { %v1507_v37 = vsel %vm1320_vm3, %v1442_v15, 0.0 }
 0x118   :  { %v1508_v63 = vadd.f32 %v1507_v37, %v1506_v45 }
 0x11c   :  { %v4223_v53 = vpop.f32.mrf.mxu1 }
 0x11d   :  { %5966 = vst [vmem:[#allocation12_spill] sm:$0xff] %v4223_v53  ;;  %v1443_v32 = vmul.f32 %v4223_v53, %v4223_v53  ;;  %v1356_v39 = vsel %vm1320_vm3, %v4223_v53, 0.0 }
 0x11e   :  { %v1357_v0 = vadd.f32 %v1356_v39, %v1355_v46 }
 0x11f   :  { %v1509_v47 = vsel %vm1320_vm3, %v1443_v32, 0.0 }
 0x120   :  { %v1510_v8 = vadd.f32 %v1509_v47, %v1508_v63 }
 0x124   :  { %v4225_v54 = vpop.f32.mrf.mxu1 }
 0x125   :  { %5967 = vst [vmem:[#allocation13_spill] sm:$0xff] %v4225_v54  ;;  %v1444_v42 = vmul.f32 %v4225_v54, %v4225_v54  ;;  %v1358_v48 = vsel %vm1320_vm3, %v4225_v54, 0.0 }
 0x126   :  { %v1359_v10 = vadd.f32 %v1358_v48, %v1357_v0 }
 0x127   :  { %v1511_v5 = vsel %vm1320_vm3, %v1444_v42, 0.0 }
 0x128   :  { %v1512_v19 = vadd.f32 %v1511_v5, %v1510_v8  ;;  %v4397_v8 = vpop.f32.mrf.mxu3 }
 0x12c   :  { %v4227_v55 = vpop.f32.mrf.mxu1 }
 0x12d   :  { %5968 = vst [vmem:[#allocation14_spill] sm:$0xff] %v4227_v55  ;;  %v1445_v62 = vmul.f32 %v4227_v55, %v4227_v55  ;;  %v1360_v6 = vsel %vm1320_vm3, %v4227_v55, 0.0 }
 0x12e   :  { %v1361_v27 = vadd.f32 %v1360_v6, %v1359_v10 }
 0x12f   :  { %v1513_v14 = vsel %vm1320_vm3, %v1445_v62, 0.0 }
 0x130   :  { %v1514_v36 = vadd.f32 %v1513_v14, %v1512_v19 }
 0x134   :  { %v4229_v56 = vpop.f32.mrf.mxu1 }
 0x135   :  { %5969 = vst [vmem:[#allocation15_spill] sm:$0xff] %v4229_v56  ;;  %v1446_v7 = vmul.f32 %v4229_v56, %v4229_v56  ;;  %v1362_v15 = vsel %vm1320_vm3, %v4229_v56, 0.0 }
 0x136   :  { %v1363_v37 = vadd.f32 %v1362_v15, %v1361_v27 }
 0x137   :  { %v1515_v29 = vsel %vm1320_vm3, %v1446_v7, 0.0  ;;  %v4395_v7 = vpop.f32.mrf.mxu2 }
 0x138   :  { %v1516_v46 = vadd.f32 %v1515_v29, %v1514_v36 }
 0x13c   :  { %v4233_v58 = vpop.f32.mrf.mxu1 }
 0x13d   :  { %5971 = vst [vmem:[#allocation17_spill] sm:$0xff] %v4233_v58  ;;  %v1447_v16 = vmul.f32 %v4233_v58, %v4233_v58  ;;  %v1364_v32 = vsel %vm1320_vm3, %v4233_v58, 0.0 }
 0x13e   :  { %v1365_v47 = vadd.f32 %v1364_v32, %v1363_v37 }
 0x13f   :  { %v1517_v39 = vsel %vm1320_vm3, %v1447_v16, 0.0 }
 0x140   :  { %v1518_v5 = vadd.f32 %v1517_v39, %v1516_v46 }
 0x144   :  { %v4235_v59 = vpop.f32.mrf.mxu1 }
 0x145   :  { %5972 = vst [vmem:[#allocation18_spill] sm:$0xff] %v4235_v59  ;;  %v1448_v34 = vmul.f32 %v4235_v59, %v4235_v59  ;;  %v1366_v42 = vsel %vm1320_vm3, %v4235_v59, 0.0 }
 0x146   :  { %v1367_v6 = vadd.f32 %v1366_v42, %v1365_v47 }
 0x147   :  { %v1519_v62 = vsel %vm1320_vm3, %v1448_v34, 0.0 }
 0x148   :  { %v1520_v16 = vadd.f32 %v1519_v62, %v1518_v5 }
 0x14c   :  { %v4260_v12 = vpop.f32.mrf.mxu1 }
 0x14d   :  { %5973 = vst [vmem:[#allocation19_spill] sm:$0xff] %v4260_v12  ;;  %v1449_v45 = vmul.f32 %v4260_v12, %v4260_v12  ;;  %v1368_v63 = vsel %vm1320_vm3, %v4260_v12, 0.0 }
 0x14e   :  { %v1369_v19 = vadd.f32 %v1368_v63, %v1367_v6 }
 0x14f   :  { %v1521_v10 = vsel %vm1320_vm3, %v1449_v45, 0.0 }
 0x150   :  { %v1522_v34 = vadd.f32 %v1521_v10, %v1520_v16  ;;  %v4421_v10 = vpop.f32.mrf.mxu3 }
 0x154   :  { %v4286_v61 = vpop.f32.mrf.mxu1 }
 0x155   :  { %5974 = vst [vmem:[#allocation20_spill] sm:$0xff] %v4286_v61  ;;  %v1450_v0 = vmul.f32 %v4286_v61, %v4286_v61  ;;  %v1370_v14 = vsel %vm1320_vm3, %v4286_v61, 0.0 }
 0x156   :  { %v1371_v36 = vadd.f32 %v1370_v14, %v1369_v19 }
 0x157   :  { %v1523_v27 = vsel %vm1320_vm3, %v1450_v0, 0.0 }
 0x158   :  { %v1524_v45 = vadd.f32 %v1523_v27, %v1522_v34 }
 0x15c   :  { %v4312_v31 = vpop.f32.mrf.mxu1 }
 0x15d   :  { %5975 = vst [vmem:[#allocation21_spill] sm:$0xff] %v4312_v31  ;;  %v1451_v15 = vmul.f32 %v4312_v31, %v4312_v31  ;;  %v1372_v29 = vsel %vm1320_vm3, %v4312_v31, 0.0 }
 0x15e   :  { %v1373_v46 = vadd.f32 %v1372_v29, %v1371_v36  ;;  %v4428_v29 = vpop.f32.mrf.mxu2 }
 0x15f   :  { %v1525_v37 = vsel %vm1320_vm3, %v1451_v15, 0.0 }
 0x160   :  { %v1526_v5 = vadd.f32 %v1525_v37, %v1524_v45 }
 0x164   :  { %v4338_v11 = vpop.f32.mrf.mxu1 }
 0x165   :  { %5976 = vst [vmem:[#allocation22_spill] sm:$0xff] %v4338_v11  ;;  %v1452_v32 = vmul.f32 %v4338_v11, %v4338_v11  ;;  %v1374_v39 = vsel %vm1320_vm3, %v4338_v11, 0.0 }
 0x166   :  { %v1375_v6 = vadd.f32 %v1374_v39, %v1373_v46 }
 0x167   :  { %v1527_v62 = vsel %vm1320_vm3, %v1452_v32, 0.0 }
 0x168   :  { %v1528_v19 = vadd.f32 %v1527_v62, %v1526_v5 }
 0x16c   :  { %v4362_v1 = vpop.f32.mrf.mxu1 }
 0x16d   :  { %5977 = vst [vmem:[#allocation23_spill] sm:$0xff] %v4362_v1  ;;  %v1453_v42 = vmul.f32 %v4362_v1, %v4362_v1  ;;  %v1376_v63 = vsel %vm1320_vm3, %v4362_v1, 0.0 }
 0x16e   :  { %v1377_v27 = vadd.f32 %v1376_v63, %v1375_v6  ;;  %v1316_v6 = vpop.f32.mrf.mxu3 }
 0x16f   :  { %v1529_v14 = vsel %vm1320_vm3, %v1453_v42, 0.0  ;;  %v1390_v6 = vsel %vm1320_vm3, %v4300_v9, 0.0 }
 0x170   :  { %v1530_v36 = vadd.f32 %v1529_v14, %v1528_v19  ;;  %v1384_v14 = vsel %vm1320_vm3, %v4231_v57, 0.0 }
 0x174   :  { %v4388_v48 = vpop.f32.mrf.mxu1 }
 0x175   :  { %5978 = vst [vmem:[#allocation24_spill] sm:$0xff] %v4388_v48  ;;  %v1454_v0 = vmul.f32 %v4388_v48, %v4388_v48  ;;  %v1378_v15 = vsel %vm1320_vm3, %v4388_v48, 0.0  ;;  %v1457_v48 = vmul.f32 %v4231_v57, %v4231_v57 }
 0x176   :  { %v1379_v37 = vadd.f32 %v1378_v15, %v1377_v27  ;;  %v1458_v15 = vmul.f32 %v4237_v60, %v4237_v60 }
 0x177   :  { %v1531_v32 = vsel %vm1320_vm3, %v1454_v0, 0.0 }
 0x178   :  { %v1532_v42 = vadd.f32 %v1531_v32, %v1530_v36  ;;  %v1537_v32 = vsel %vm1320_vm3, %v1457_v48, 0.0  ;;  %v1459_v36 = vmul.f32 %v4267_v21, %v4267_v21 }
 0x17c   :  { %v4414_v47 = vpop.f32.mrf.mxu1 }
 0x17d   :  { %5979 = vst [vmem:[#allocation25_spill] sm:$0xff] %v4414_v47  ;;  %v1455_v16 = vmul.f32 %v4414_v47, %v4414_v47  ;;  %v1380_v34 = vsel %vm1320_vm3, %v4414_v47, 0.0 }
 0x17e   :  { %v1381_v45 = vadd.f32 %v1380_v34, %v1379_v37  ;;  %v1386_v34 = vsel %vm1320_vm3, %v4237_v60, 0.0 }
 0x17f   :  { %v1533_v39 = vsel %vm1320_vm3, %v1455_v16, 0.0 }
 0x180   :  { %v1534_v0 = vadd.f32 %v1533_v39, %v1532_v42  ;;  %v4452_v42 = vpop.f32.mrf.mxu2 }
 0x184   :  { %v4434_v46 = vpop.f32.mrf.mxu1 }
 0x185   :  { %5980 = vst [vmem:[#allocation26_spill] sm:$0xff] %v4434_v46  ;;  %v1382_v62 = vsel %vm1320_vm3, %v4434_v46, 0.0  ;;  %v1456_v63 = vmul.f32 %v4434_v46, %v4434_v46 }
 0x186   :  { %v1383_v5 = vadd.f32 %v1382_v62, %v1381_v45  ;;  %v1539_v45 = vsel %vm1320_vm3, %v1458_v15, 0.0  ;;  %v1388_v62 = vsel %vm1320_vm3, %v4267_v21, 0.0 }
 0x187   :  { %v1535_v16 = vsel %vm1320_vm3, %v1456_v63, 0.0  ;;  %v1460_v63 = vmul.f32 %v4300_v9, %v4300_v9 }
 0x188   :  { %v1385_v19 = vadd.f32 %v1384_v14, %v1383_v5  ;;  %v1536_v27 = vadd.f32 %v1535_v16, %v1534_v0  ;;  %v1541_v5 = vsel %vm1320_vm3, %v1459_v36, 0.0  ;;  %v1461_v14 = vmul.f32 %v4331_v4, %v4331_v4 }
 0x189   :  { %v1543_v15 = vsel %vm1320_vm3, %v1460_v63, 0.0 }
 0x18a   :  { %v1387_v37 = vadd.f32 %v1386_v34, %v1385_v19  ;;  %v1538_v39 = vadd.f32 %v1537_v32, %v1536_v27  ;;  %v1392_v27 = vsel %vm1320_vm3, %v4331_v4, 0.0  ;;  %v1462_v32 = vmul.f32 %v4364_v2, %v4364_v2 }
 0x18b   :  { %v1545_v36 = vsel %vm1320_vm3, %v1461_v14, 0.0 }
 0x18c   :  { %v1389_v0 = vadd.f32 %v1388_v62, %v1387_v37  ;;  %v1540_v48 = vadd.f32 %v1539_v45, %v1538_v39  ;;  %v1394_v39 = vsel %vm1320_vm3, %v4364_v2, 0.0  ;;  %v1463_v45 = vmul.f32 %v4395_v7, %v4395_v7 }
 0x18d   :  { %v1547_v63 = vsel %vm1320_vm3, %v1462_v32, 0.0 }
 0x18e   :  { %v1391_v16 = vadd.f32 %v1390_v6, %v1389_v0  ;;  %v1542_v19 = vadd.f32 %v1541_v5, %v1540_v48  ;;  %v1396_v48 = vsel %vm1320_vm3, %v4395_v7, 0.0  ;;  %v1464_v5 = vmul.f32 %v4428_v29, %v4428_v29 }
 0x18f   :  { %v1549_v14 = vsel %vm1320_vm3, %v1463_v45, 0.0  ;;  %v1467_v45 = vmul.f32 %v4269_v23, %v4269_v23 }
 0x190   :  { %v1544_v34 = vadd.f32 %v1543_v15, %v1542_v19  ;;  %v1393_v37 = vadd.f32 %v1392_v27, %v1391_v16  ;;  %v4479_v19 = vpop.f32.mrf.mxu2  ;;  %v1398_v15 = vsel %vm1320_vm3, %v4428_v29, 0.0  ;;  %v1465_v27 = vmul.f32 %v4452_v42, %v4452_v42 }
 0x192   :  { %v1395_v62 = vadd.f32 %v1394_v39, %v1393_v37  ;;  %v1546_v0 = vadd.f32 %v1545_v36, %v1544_v34  ;;  %v1551_v37 = vsel %vm1320_vm3, %v1464_v5, 0.0  ;;  %v1400_v36 = vsel %vm1320_vm3, %v4452_v42, 0.0 }
 0x193   :  { %v1466_v39 = vmul.f32 %v4479_v19, %v4479_v19  ;;  %v1404_v5 = vsel %vm1320_vm3, %v4269_v23, 0.0 }
 0x194   :  { %v1397_v6 = vadd.f32 %v1396_v48, %v1395_v62  ;;  %v1548_v16 = vadd.f32 %v1547_v63, %v1546_v0  ;;  %v1553_v63 = vsel %vm1320_vm3, %v1465_v27, 0.0  ;;  %v1402_v48 = vsel %vm1320_vm3, %v4479_v19, 0.0 }
 0x195   :  { %v1406_v27 = vsel %vm1320_vm3, %v4293_v3, 0.0 }
 0x196   :  { %v1399_v34 = vadd.f32 %v1398_v15, %v1397_v6  ;;  %v1550_v32 = vadd.f32 %v1549_v14, %v1548_v16  ;;  %v1468_v14 = vmul.f32 %v4293_v3, %v4293_v3  ;;  %v1555_v15 = vsel %vm1320_vm3, %v1466_v39, 0.0 }
 0x197   :  { %v1470_v39 = vmul.f32 %v4345_v25, %v4345_v25 }
 0x198   :  { %v1401_v62 = vadd.f32 %v1400_v36, %v1399_v34  ;;  %v1552_v0 = vadd.f32 %v1551_v37, %v1550_v32  ;;  %v1557_v37 = vsel %vm1320_vm3, %v1467_v45, 0.0  ;;  %v1469_v36 = vmul.f32 %v4319_v41, %v4319_v41 }
 0x19a   :  { %v1554_v6 = vadd.f32 %v1553_v63, %v1552_v0  ;;  %v1403_v16 = vadd.f32 %v1402_v48, %v1401_v62  ;;  %v1559_v63 = vsel %vm1320_vm3, %v1468_v14, 0.0  ;;  %v1408_v48 = vsel %vm1320_vm3, %v4319_v41, 0.0 }
 0x19b   :  { %v1561_v45 = vsel %vm1320_vm3, %v1469_v36, 0.0  ;;  %v1563_v14 = vsel %vm1320_vm3, %v1470_v39, 0.0 }
 0x19c   :  { %v1405_v34 = vadd.f32 %v1404_v5, %v1403_v16  ;;  %v1556_v32 = vadd.f32 %v1555_v15, %v1554_v6  ;;  %v1410_v5 = vsel %vm1320_vm3, %v4345_v25, 0.0  ;;  %v1471_v15 = vmul.f32 %v4371_v13, %v4371_v13 }
 0x19e   :  { %v1407_v0 = vadd.f32 %v1406_v27, %v1405_v34  ;;  %v1558_v62 = vadd.f32 %v1557_v37, %v1556_v32  ;;  %v1412_v37 = vsel %vm1320_vm3, %v4371_v13, 0.0  ;;  %v1472_v27 = vmul.f32 %v4397_v8, %v4397_v8 }
 0x1a0   :  { %v1409_v16 = vadd.f32 %v1408_v48, %v1407_v0  ;;  %v1560_v6 = vadd.f32 %v1559_v63, %v1558_v62  ;;  %v1473_v0 = vmul.f32 %v4421_v10, %v4421_v10  ;;  %v1565_v63 = vsel %vm1320_vm3, %v1471_v15, 0.0 }
 0x1a1   :  { %v1414_v48 = vsel %vm1320_vm3, %v4397_v8, 0.0 }
 0x1a2   :  { %v1562_v34 = vadd.f32 %v1561_v45, %v1560_v6  ;;  %v1411_v32 = vadd.f32 %v1410_v5, %v1409_v16  ;;  %v1416_v16 = vsel %vm1320_vm3, %v4421_v10, 0.0  ;;  %v1567_v45 = vsel %vm1320_vm3, %v1472_v27, 0.0 }
 0x1a3   :  { %v1569_v5 = vsel %vm1320_vm3, %v1473_v0, 0.0 }
 0x1a4   :  { %v1413_v36 = vadd.f32 %v1412_v37, %v1411_v32  ;;  %v1564_v62 = vadd.f32 %v1563_v14, %v1562_v34 }
 0x1a6   :  { %v1415_v39 = vadd.f32 %v1414_v48, %v1413_v36  ;;  %v1566_v6 = vadd.f32 %v1565_v63, %v1564_v62  ;;  %v55_v36 = vlaneseq }
 0x1a8   :  { %v1417_v57 = vadd.f32 %v1416_v16, %v1415_v39  ;;  %v1568_v46 = vadd.f32 %v1567_v45, %v1566_v6  ;;  %v4534_v48 = vshrl.u32 %v55_v36, 7 }
 0x1aa   :  { %v1418_v47 = vrot.slane %v1417_v57, 4  ;;  %v1570_v1 = vadd.f32 %v1569_v5, %v1568_v46  ;;  %v60_v46 = vadd.s32 8, %v4534_v48  ;;  %v63_v39 = vadd.s32 32, %v4534_v48 }
 0x1ab   :  { %v64_v6 = vadd.s32 40, %v4534_v48  ;;  %v65_v45 = vadd.s32 48, %v4534_v48  ;;  %v5955_v5 = vmov 0.0   ;;  %v66_v36 = vadd.s32 56, %v4534_v48 }
 0x1ac   :  { %v1419_v32 = vadd.f32 %v1418_v47, %v1417_v57  ;;  %v1571_v34 = vrot.slane %v1570_v1, 4  ;;  %v74_v52 = vadd.s32 120, %v4534_v48 }
 0x1ae   :  { %v1420_v14 = vrot.slane %v1419_v32, 2  ;;  %v1572_v15 = vadd.f32 %v1571_v34, %v1570_v1  ;;  %v112_v1 = vand.u32 7, %v4534_v48 }
 0x1b0   :  { %v1421_v37 = vadd.f32 %v1420_v14, %v1419_v32  ;;  %v1573_v11 = vrot.slane %v1572_v15, 2  ;;  %vm696_vm4 = vcmp.lt.s32.totalorder %v112_v1, 4  ;;  %v140_v14 = vand.u32 7, %v63_v39 }
 0x1b1   :  { %v4544_v32 = vsel %vm696_vm4, 1.0, %v5955_v5  ;;  %v71_v1 = vadd.s32 96, %v4534_v48  ;;  %v161_v39 = vand.u32 7, %v66_v36 }
 0x1b2   :  { %v1422_v31 = vrot.slane %v1421_v37, 1  ;;  %v1574_v61 = vadd.f32 %v1573_v11, %v1572_v15  ;;  %v61_v11 = vadd.s32 16, %v4534_v48  ;;  %v147_v15 = vand.u32 7, %v64_v6 }
 0x1b3   :  { %vm700_vm8 = vcmp.lt.s32.totalorder %v140_v14, 4  ;;  %v196_v54 = vand.u32 7, %v71_v1  ;;  %vm4573_vm12 = vcmp.lt.s32.totalorder %v161_v39, 4  ;;  %v107_v1 = vadd.s32 384, %v4534_v48 }
 0x1b4   :  { %v1423_v12 = vadd.f32 %v1422_v31, %v1421_v37  ;;  %v1575_v59 = vrot.slane %v1574_v61, 1  ;;  %v62_v31 = vadd.s32 24, %v4534_v48  ;;  %v154_v37 = vand.u32 7, %v65_v45 }
 0x1b5   :  { %vm701_vm9 = vcmp.lt.s32.totalorder %v147_v15, 4 }
 0x1b6   :  { %v4530_v62 = vmul.f32 0.0051020407, %v1423_v12  ;;  %v1576_v27 = vadd.f32 %v1575_v59, %v1574_v61  ;;  %v119_v59 = vand.u32 7, %v60_v46  ;;  %v126_v12 = vand.u32 7, %v61_v11 }
 0x1b7   :  { %v133_v61 = vand.u32 7, %v62_v31  ;;  %v72_v31 = vadd.s32 104, %v4534_v48  ;;  %vm702_vm10 = vcmp.lt.s32.totalorder %v154_v37, 4  ;;  %v4568_v14 = vsel %vm701_vm9, 1.0, %v5955_v5 }
 0x1b8   :  { %v1577_v63 = vmul.f32 0.0051020407, %v1576_v27  ;;  %v1578_v0 = vmul.f32 %v4530_v62, %v4530_v62  ;;  %vm697_vm5 = vcmp.lt.s32.totalorder %v119_v59, 4  ;;  %vm698_vm6 = vcmp.lt.s32.totalorder %v126_v12, 4 }
 0x1b9   :  { %vm699_vm7 = vcmp.lt.s32.totalorder %v133_v61, 4  ;;  %v67_v27 = vadd.s32 64, %v4534_v48  ;;  %v4553_v46 = vsel %vm697_vm5, 1.0, %v5955_v5  ;;  %v4556_v11 = vsel %vm698_vm6, 1.0, %v5955_v5 }
 0x1ba   :  { %v1579_v57 = vsub.f32 %v1577_v63, %v1578_v0  ;;  %v68_v0 = vadd.s32 72, %v4534_v48  ;;  %5981 = vst [vmem:[#allocation27_spill] sm:$0xff] %v4553_v46  ;;  %v4560_v12 = vsel %vm699_vm7, 1.0, %v5955_v5  ;;  %v73_v61 = vadd.s32 112, %v4534_v48 }
 0x1bb   :  { %5982 = vst [vmem:[#allocation28_spill] sm:$0xff] %v4556_v11  ;;  %v168_v6 = vand.u32 7, %v67_v27  ;;  %v203_v53 = vand.u32 7, %v72_v31  ;;  %v4571_v15 = vsel %vm702_vm10, 1.0, %v5955_v5  ;;  %vm4589_vm5 = vcmp.lt.s32.totalorder %v196_v54, 4 }
 0x1bc   :  { %v1580_v47 = vmax.f32 %v1579_v57, 0.0  ;;  %v69_v57 = vadd.s32 80, %v4534_v48  ;;  %5983 = vst [vmem:[#allocation29_spill] sm:$0xff] %v4560_v12  ;;  %v175_v58 = vand.u32 7, %v68_v0  ;;  %v210_v37 = vand.u32 7, %v73_v61 }
 0x1bd   :  { %5985 = vst [vmem:[#allocation31_spill] sm:$0xff] %v4571_v15  ;;  %vm4577_vm13 = vcmp.lt.s32.totalorder %v168_v6, 4  ;;  %v1318_v0 = vld [vmem:[%s5927_s6] sm:$0x1]  ;;  %vm4593_vm6 = vcmp.lt.s32.totalorder %v203_v53, 4  ;;  %v217_v61 = vand.u32 7, %v74_v52 }
 0x1be   :  { %v1581_v16 = vadd.f32 1e-05, %v1580_v47  ;;  %v70_v47 = vadd.s32 88, %v4534_v48  ;;  %v182_v56 = vand.u32 7, %v69_v57  ;;  %vm705_vm15 = vcmp.lt.s32.totalorder %v175_v58, 4 }
 0x1bf   :  { %vm710_vm7 = vcmp.lt.s32.totalorder %v210_v37, 4  ;;  %v4607_v53 = vsel %vm4577_vm13, 1.0, %v5955_v5  ;;  %v4610_v54 = vsel %vm705_vm15, 1.0, %v5955_v5  ;;  %v448_v6 = vand.u32 7, %v107_v1 }
 0x1c0   :  { %3952 = vrsqrt.f32 %v1581_v16  ;;  %v189_v55 = vand.u32 7, %v70_v47  ;;  %vm1588_vm14 = vweird.f32 %v1581_v16  ;;  %vm706_vm1 = vcmp.lt.s32.totalorder %v182_v56, 4  ;;  %5996 = vst [vmem:[#allocation32_spill] sm:$0xff] %v4607_v53 }
 0x1c1   :  { %v75_v56 = vadd.s32 128, %v4534_v48  ;;  %5997 = vst [vmem:[#allocation33_spill] sm:$0xff] %v4610_v54  ;;  %v4613_v52 = vsel %vm706_vm1, 1.0, %v5955_v5  ;;  %v4629_v36 = vsel %vm4589_vm5, 1.0, %v5955_v5  ;;  %v4634_v27 = vsel %vm4593_vm6, 1.0, %v5955_v5 }
 0x1c2   :  { %vm4584_vm2 = vcmp.lt.s32.totalorder %v189_v55, 4  ;;  %v76_v55 = vadd.s32 136, %v4534_v48  ;;  %5998 = vst [vmem:[#allocation34_spill] sm:$0xff] %v4613_v52  ;;  %v77_v1 = vadd.s32 144, %v4534_v48  ;;  %v78_v31 = vadd.s32 152, %v4534_v48 }
 0x1c3   :  { %v4621_v39 = vsel %vm4584_vm2, 1.0, %v5955_v5  ;;  %6000 = vst [vmem:[#allocation36_spill] sm:$0xff] %v4629_v36  ;;  %vm744_vm9 = vcmp.lt.s32.totalorder %v448_v6, 4  ;;  %v6005_v36 = vmov 0.0   ;;  %v85_v11 = vadd.s32 208, %v4534_v48 }
 0x1c4   :  { %5999 = vst [vmem:[#allocation35_spill] sm:$0xff] %v4621_v39  ;;  %v231_v47 = vand.u32 7, %v76_v55  ;;  %v83_v55 = vadd.s32 192, %v4534_v48  ;;  %v238_v52 = vand.u32 7, %v77_v1  ;;  %v245_v54 = vand.u32 7, %v78_v31 }
 0x1c5   :  { %6001 = vst [vmem:[#allocation37_spill] sm:$0xff] %v4634_v27  ;;  %v81_v27 = vadd.s32 176, %v4534_v48  ;;  %v3356_v15 = vsel %vm744_vm9, 1.0, %v6005_v36  ;;  %v94_v46 = vadd.s32 280, %v4534_v48 }
 0x1c6   :  { %v3953_v34 = vpop.eup %3952  ;;  %vm715_vm13 = vcmp.lt.s32.totalorder %v245_v54, 4 }
 0x1c7   :  { %v1583_v63 = vmul.f32 %v3953_v34, %v1581_v16  ;;  %vm1589_vm11 = vweird.f32 %v3953_v34  ;;  %v4602_v16 = vsel %vm4573_vm12, 1.0, %v5955_v5  ;;  %vm714_vm12 = vcmp.lt.s32.totalorder %v238_v52, 4 }
 0x1c8   :  { %vm1590_vm4 = vmor %vm1588_vm14, %vm1589_vm11  ;;  %vm4666_vm11 = vcmp.lt.s32.totalorder %v231_v47, 4  ;;  %v93_v47 = vadd.s32 272, %v4534_v48 }
 0x1c9   :  { %v1584_v59 = vmul.f32 %v3953_v34, %v1583_v63  ;;  %v4565_v63 = vsel %vm700_vm8, 1.0, %v5955_v5  ;;  %vm4639_vm8 = vcmp.lt.s32.totalorder %v217_v61, 4 }
 0x1ca   :  { %5984 = vst [vmem:[#allocation30_spill] sm:$0xff] %v4565_v63  ;;  %v4660_v39 = vsel %vm4639_vm8, 1.0, %v6005_v36  ;;  %v266_v63 = vand.u32 7, %v81_v27  ;;  %v350_v52 = vand.u32 7, %v93_v47 }
 0x1cb   :  { %v1585_v45 = vmul.f32 0.5, %v1584_v59  ;;  %v80_v59 = vadd.s32 168, %v4534_v48  ;;  %6006 = vst [vmem:[#allocation39_spill] sm:$0xff] %v4660_v39 }
 0x1cc   :  { %vm4693_vm1 = vcmp.lt.s32.totalorder %v266_v63, 4  ;;  %vm4767_vm8 = vcmp.lt.s32.totalorder %v350_v52, 4 }
 0x1cd   :  { %v1586_v51 = vsub.f32 1.5, %v1585_v45  ;;  %v259_v50 = vand.u32 7, %v80_v59  ;;  %v357_v59 = vand.u32 7, %v94_v46 }
 0x1cf   :  { %v1587_v57 = vmul.f32 %v3953_v34, %v1586_v51  ;;  %vm4689_vm15 = vcmp.lt.s32.totalorder %v259_v50, 4 }
 0x1d0   :  { %v4735_v46 = vsel %vm4689_vm15, 1.0, %v6005_v36 }
 0x1d1   :  { %v1591_v51 = vsel %vm1590_vm4, %v3953_v34, %v1587_v57  ;;  %v1319_v34 = vld [vmem:[%s5928_s7] sm:$0x1]  ;;  %s3990_s7 = smov 64  }
 0x1d2   :  { %v1592_v58 = vmul.f32 %v1591_v51, %v1318_v0  ;;  %v4637_v0 = vsel %vm710_vm7, 1.0, %v5955_v5  ;;  %v82_v5 = vadd.s32 184, %v4534_v48 }
 0x1d3   :  { %6002 = vst [vmem:[#allocation38_spill] sm:$0xff] %v4637_v0 }
 0x1d4   :  { %v1593_v45 = vmul.f32 %v1592_v58, %v4530_v62  ;;  %v4624_v37 = vperm.slane %v1592_v58, 0  ;;  %v224_v62 = vand.u32 7, %v75_v56  ;;  %v79_v58 = vadd.s32 160, %v4534_v48 }
 0x1d5   :  { %v91_v56 = vadd.s32 256, %v4534_v48  ;;  %v273_v57 = vand.u32 7, %v82_v5  ;;  %v4683_v5 = vsel %vm4666_vm11, 1.0, %v6005_v36 }
 0x1d6   :  { %v1594_v51 = vsub.f32 %v1319_v34, %v1593_v45  ;;  %v1646_v61 = vmul.f32 %v4624_v37, %v4421_v10  ;;  %v92_v34 = vadd.s32 264, %v4534_v48  ;;  %v84_v45 = vadd.s32 200, %v4534_v48 }
 0x1d7   :  { %vm4662_vm10 = vcmp.lt.s32.totalorder %v224_v62, 4  ;;  %v252_v53 = vand.u32 7, %v79_v58  ;;  %v336_v39 = vand.u32 7, %v91_v56  ;;  %v280_v62 = vand.u32 7, %v83_v55 }
 0x1d8   :  { %v4651_v0 = vperm.slane %v1594_v51, 0  ;;  %v343_v12 = vand.u32 7, %v92_v34  ;;  %v287_v44 = vand.u32 7, %v84_v45  ;;  %v4678_v1 = vsel %vm4662_vm10, 1.0, %v6005_v36 }
 0x1d9   :  { %vm4685_vm14 = vcmp.lt.s32.totalorder %v252_v53, 4  ;;  %vm4697_vm2 = vcmp.lt.s32.totalorder %v273_v57, 4  ;;  %vm4702_vm4 = vcmp.lt.s32.totalorder %v336_v39, 4  ;;  %vm4706_vm5 = vcmp.lt.s32.totalorder %v280_v62, 4 }
 0x1da   :  { %v1698_v51 = vadd.f32 %v4651_v0, %v1646_v61  ;;  %vm4710_vm6 = vcmp.lt.s32.totalorder %v343_v12, 4  ;;  %vm4714_vm7 = vcmp.lt.s32.totalorder %v287_v44, 4  ;;  %v294_v58 = vand.u32 7, %v85_v11 }
 0x1db   :  { %v86_v39 = vadd.s32 216, %v4534_v48  ;;  %v4720_v56 = vsel %vm714_vm12, 1.0, %v6005_v36  ;;  %v4723_v55 = vsel %vm715_vm13, 1.0, %v6005_v36  ;;  %v95_v12 = vadd.s32 288, %v4534_v48 }
 0x1dc   :  { %v1747_v49 = vmax.f32 %v1698_v51, 0.0  ;;  %v87_v34 = vadd.s32 224, %v4534_v48  ;;  %v4730_v44 = vsel %vm4685_vm14, 1.0, %v6005_v36  ;;  %v4740_v11 = vsel %vm4693_vm1, 1.0, %v6005_v36 }
 0x1dd   :  { %v4745_v45 = vsel %vm4697_vm2, 1.0, %v6005_v36  ;;  %v4750_v6 = vsel %vm4702_vm4, 1.0, %v6005_v36  ;;  %v4755_v10 = vsel %vm4706_vm5, 1.0, %v6005_v36  ;;  %v4760_v51 = vsel %vm4710_vm6, 1.0, %v6005_v36 }
 0x1de   :  { %v1796_v61 = vmul.f32 %v3356_v15, %v1747_v49  ;;  %v4765_v57 = vsel %vm4714_vm7, 1.0, %v6005_v36  ;;  %vm4771_vm9 = vcmp.lt.s32.totalorder %v294_v58, 4  ;;  %vm4775_vm10 = vcmp.lt.s32.totalorder %v357_v59, 4 }
 0x1df   :  { %v301_v27 = vand.u32 7, %v86_v39  ;;  %v364_v31 = vand.u32 7, %v95_v12  ;;  %v308_v49 = vand.u32 7, %v87_v34  ;;  %v1605_v15 = vmul.f32 %v4624_v37, %v4160_v30 }
 0x1e0   :  { %1845 = vst.msk [vmem:[#allocation2 + $0x180] sm:$0xff] %vm1320_vm3, %v1796_v61  ;;  %v1631_v54 = vmul.f32 %v4624_v37, %v4237_v60  ;;  %v1632_v53 = vmul.f32 %v4624_v37, %v4267_v21  ;;  %v1633_v50 = vmul.f32 %v4624_v37, %v4300_v9  ;;  %v1634_v63 = vmul.f32 %v4624_v37, %v4331_v4 }
 0x1e1   :  { %v1635_v52 = vmul.f32 %v4624_v37, %v4364_v2  ;;  %v1636_v58 = vmul.f32 %v4624_v37, %v4395_v7  ;;  %v1637_v30 = vmul.f32 %v4624_v37, %v4428_v29  ;;  %v1638_v60 = vmul.f32 %v4624_v37, %v4452_v42 }
 0x1e2   :  { %v1639_v21 = vmul.f32 %v4624_v37, %v4479_v19  ;;  %v1640_v9 = vmul.f32 %v4624_v37, %v4269_v23  ;;  %v1641_v4 = vmul.f32 %v4624_v37, %v4293_v3  ;;  %v1642_v2 = vmul.f32 %v4624_v37, %v4319_v41 }
 0x1e3   :  { %v1643_v7 = vmul.f32 %v4624_v37, %v4345_v25  ;;  %v1644_v29 = vmul.f32 %v4624_v37, %v4371_v13  ;;  %v1645_v42 = vmul.f32 %v4624_v37, %v4397_v8  ;;  %v1657_v19 = vadd.f32 %v4651_v0, %v1605_v15 }
 0x1e4   :  { %v4813_v59 = vadd.f32 %v4651_v0, %v1631_v54  ;;  %v4816_v23 = vadd.f32 %v4651_v0, %v1632_v53  ;;  %v4819_v3 = vadd.f32 %v4651_v0, %v1633_v50  ;;  %v4822_v41 = vadd.f32 %v4651_v0, %v1634_v63 }
 0x1e5   :  { %v4825_v25 = vadd.f32 %v4651_v0, %v1635_v52  ;;  %v4828_v13 = vadd.f32 %v4651_v0, %v1636_v58  ;;  %v4831_v8 = vadd.f32 %v4651_v0, %v1637_v30  ;;  %v4834_v39 = vadd.f32 %v4651_v0, %v1638_v60 }
 0x1e6   :  { %v4837_v12 = vadd.f32 %v4651_v0, %v1639_v21  ;;  %v4840_v34 = vadd.f32 %v4651_v0, %v1640_v9  ;;  %v4843_v15 = vadd.f32 %v4651_v0, %v1641_v4  ;;  %v4846_v54 = vadd.f32 %v4651_v0, %v1642_v2 }
 0x1e7   :  { %v4849_v53 = vadd.f32 %v4651_v0, %v1643_v7  ;;  %v4854_v50 = vsel %vm4767_vm8, 1.0, %v6005_v36  ;;  %v4857_v63 = vadd.f32 %v4651_v0, %v1644_v29  ;;  %v4860_v52 = vadd.f32 %v4651_v0, %v1645_v42 }
 0x1e8   :  { %6033 = vst [vmem:[#allocation40_spill] sm:$0xff] %v4837_v12  ;;  %v1706_v58 = vmax.f32 %v1657_v19, 0.0  ;;  %v4865_v30 = vsel %vm4771_vm9, 1.0, %v6005_v36  ;;  %v4870_v60 = vsel %vm4775_vm10, 1.0, %v6005_v36  ;;  %vm723_vm11 = vcmp.lt.s32.totalorder %v301_v27, 4 }
 0x1e9   :  { %6034 = vst [vmem:[#allocation41_spill] sm:$0xff] %v4840_v34  ;;  %vm4872_vm12 = vcmp.lt.s32.totalorder %v364_v31, 4  ;;  %vm4876_vm13 = vcmp.lt.s32.totalorder %v308_v49, 4  ;;  %v4881_v9 = vadd.s32 336, %v4534_v48  ;;  %v1603_v47 = vmul.f32 %v4624_v37, %v4148_v26 }
 0x1ea   :  { %6035 = vst [vmem:[#allocation42_spill] sm:$0xff] %v4843_v15  ;;  %v1755_v4 = vmul.f32 %v4602_v16, %v1706_v58  ;;  %v4887_v61 = vadd.s32 296, %v4534_v48  ;;  %v1598_v27 = vmul.f32 %v4624_v37, %v4122_v17  ;;  %v1599_v31 = vmul.f32 %v4624_v37, %v4125_v18  ;;  %v6046_v15 = vld [vmem:[#allocation28_spill] sm:$0xff] }
 0x1eb   :  { %6036 = vst [vmem:[#allocation43_spill] sm:$0xff] %v4846_v54  ;;  %v1600_v49 = vmul.f32 %v4624_v37, %v4130_v20  ;;  %v4896_v2 = vsel %vm723_vm11, 1.0, %v6005_v36  ;;  %v4899_v7 = vadd.s32 232, %v4534_v48  ;;  %v1601_v26 = vmul.f32 %v4624_v37, %v4136_v22  ;;  %v6045_v54 = vld [vmem:[#allocation27_spill] sm:$0xff] }
 0x1ec   :  { %6037 = vst [vmem:[#allocation44_spill] sm:$0xff] %v4849_v53  ;;  %v1655_v16 = vadd.f32 %v4651_v0, %v1603_v47  ;;  %v1602_v17 = vmul.f32 %v4624_v37, %v4142_v24  ;;  %v1650_v18 = vadd.f32 %v4651_v0, %v1598_v27  ;;  %v1651_v20 = vadd.f32 %v4651_v0, %v1599_v31 }
 0x1ed   :  { %6038 = vst [vmem:[#allocation45_spill] sm:$0xff] %v4857_v63  ;;  %v1652_v29 = vadd.f32 %v4651_v0, %v1600_v49  ;;  %v4913_v42 = vsel %vm4872_vm12, 1.0, %v6005_v36  ;;  %v4918_v22 = vsel %vm4876_vm13, 1.0, %v6005_v36  ;;  %v1604_v19 = vmul.f32 %v4624_v37, %v4154_v28 }
 0x1ee   :  { %6039 = vst [vmem:[#allocation46_spill] sm:$0xff] %v4860_v52  ;;  %v1653_v24 = vadd.f32 %v4651_v0, %v1601_v26  ;;  %v1654_v62 = vadd.f32 %v4651_v0, %v1602_v17  ;;  %v4930_v21 = vadd.s32 344, %v4534_v48  ;;  %v1704_v49 = vmax.f32 %v1655_v16, 0.0 }
 0x1ef   :  { %1804 = vst.msk [vmem:[#allocation2 + $0x38] sm:$0xff] %vm1320_vm3, %v1755_v4  ;;  %v1606_v4 = vmul.f32 %v4624_v37, %v4170_v33  ;;  %v1656_v31 = vadd.f32 %v4651_v0, %v1604_v19  ;;  %v1699_v26 = vmax.f32 %v1650_v18, 0.0  ;;  %v1700_v52 = vmax.f32 %v1651_v20, 0.0 }
 0x1f0   :  { %6044 = vst [vmem:[#allocation47_spill] sm:$0xff] %v4913_v42  ;;  %v1701_v58 = vmax.f32 %v1652_v29, 0.0  ;;  %v4935_v47 = vadd.s32 304, %v4534_v48  ;;  %v1607_v33 = vmul.f32 %v4624_v37, %v4176_v35  ;;  %v1608_v17 = vmul.f32 %v4624_v37, %v4186_v38 }
 0x1f1   :  { %v1658_v28 = vadd.f32 %v4651_v0, %v1606_v4  ;;  %v1702_v27 = vmax.f32 %v1653_v24, 0.0  ;;  %v4942_v63 = vadd.s32 240, %v4534_v48  ;;  %v1609_v16 = vmul.f32 %v4624_v37, %v4192_v40 }
 0x1f2   :  { %v1610_v18 = vmul.f32 %v4624_v37, %v4202_v43  ;;  %v1703_v29 = vmax.f32 %v1654_v62, 0.0  ;;  %v1659_v19 = vadd.f32 %v4651_v0, %v1607_v33  ;;  %v1660_v4 = vadd.f32 %v4651_v0, %v1608_v17  ;;  %v6047_v62 = vld [vmem:[#allocation7_spill] sm:$0xff]  ;;  %v6054_v43 = vld [vmem:[#allocation32_spill] sm:$0xff] }
 0x1f3   :  { %v1705_v35 = vmax.f32 %v1656_v31, 0.0  ;;  %v1753_v38 = vmul.f32 %v4568_v14, %v1704_v49  ;;  %v1707_v24 = vmax.f32 %v1658_v28, 0.0  ;;  %v1748_v53 = vmul.f32 %v4544_v32, %v1699_v26  ;;  %v6049_v49 = vld [vmem:[#allocation8_spill] sm:$0xff] }
 0x1f4   :  { %v1749_v40 = vmul.f32 %v6045_v54, %v1700_v52  ;;  %v1750_v34 = vmul.f32 %v6046_v15, %v1701_v58  ;;  %v1611_v33 = vmul.f32 %v4624_v37, %v6047_v62  ;;  %v1661_v17 = vadd.f32 %v4651_v0, %v1609_v16  ;;  %v6050_v15 = vld [vmem:[#allocation30_spill] sm:$0xff]  ;;  %v6051_v58 = vld [vmem:[#allocation9_spill] sm:$0xff] }
 0x1f5   :  { %1802 = vst.msk [vmem:[#allocation2 + $0x28] sm:$0xff] %vm1320_vm3, %v1753_v38  ;;  %v4962_v14 = vadd.s32 248, %v4534_v48  ;;  %v1612_v32 = vmul.f32 %v4624_v37, %v6049_v49  ;;  %v1662_v54 = vadd.f32 %v4651_v0, %v1610_v18  ;;  %v1752_v52 = vmul.f32 %v6050_v15, %v1703_v29  ;;  %v6052_v38 = vld [vmem:[#allocation31_spill] sm:$0xff]  ;;  %v6053_v62 = vld [vmem:[#allocation10_spill] sm:$0xff] }
 0x1f6   :  { %v1857_v20 = vld [vmem:[#allocation2 + $0x38] sm:$0xff]  ;;  %1798 = vst.msk [vmem:[#allocation2 + $0x8] sm:$0xff] %vm1320_vm3, %v1749_v40  ;;  %v1613_v28 = vmul.f32 %v4624_v37, %v6051_v58  ;;  %v1663_v26 = vadd.f32 %v4651_v0, %v1611_v33  ;;  %v1708_v16 = vmax.f32 %v1659_v19, 0.0  ;;  %v1709_v18 = vmax.f32 %v1660_v4, 0.0 }
 0x1f7   :  { %1859 = vrot.lane.b32.xlu1 %v1857_v20, %s3990_s7  ;;  %v6048_v20 = vld [vmem:[#allocation29_spill] sm:$0xff]  ;;  %1797 = vst.msk [vmem:[#allocation2] sm:$0xff] %vm1320_vm3, %v1748_v53  ;;  %v1664_v49 = vadd.f32 %v4651_v0, %v1612_v32  ;;  %v1756_v29 = vmul.f32 %v6054_v43, %v1707_v24  ;;  %v6055_v15 = vld [vmem:[#allocation11_spill] sm:$0xff]  ;;  %v6056_v58 = vld [vmem:[#allocation12_spill] sm:$0xff]  ;;  %v1711_v24 = vmax.f32 %v1662_v54, 0.0 }
 0x1f8   :  { %v1751_v31 = vmul.f32 %v6048_v20, %v1702_v27  ;;  %v1754_v27 = vmul.f32 %v6052_v38, %v1705_v35  ;;  %v1614_v20 = vmul.f32 %v4624_v37, %v6053_v62  ;;  %1799 = vst.msk [vmem:[#allocation2 + $0x10] sm:$0xff] %vm1320_vm3, %v1750_v34  ;;  %v1615_v33 = vmul.f32 %v4624_v37, %v6055_v15  ;;  %v6057_v34 = vld [vmem:[#allocation13_spill] sm:$0xff]  ;;  %v6060_v54 = vld [vmem:[#allocation34_spill] sm:$0xff] }
 0x1f9   :  { %v1665_v19 = vadd.f32 %v4651_v0, %v1613_v28  ;;  %v1710_v35 = vmax.f32 %v1661_v17, 0.0  ;;  %v1616_v32 = vmul.f32 %v4624_v37, %v6056_v58  ;;  %1801 = vst.msk [vmem:[#allocation2 + $0x20] sm:$0xff] %vm1320_vm3, %v1752_v52  ;;  %v1617_v43 = vmul.f32 %v4624_v37, %v6057_v34  ;;  %v6058_v28 = vld [vmem:[#allocation33_spill] sm:$0xff]  ;;  %v6061_v52 = vld [vmem:[#allocation15_spill] sm:$0xff] }
 0x1fa   :  { %1800 = vst.msk [vmem:[#allocation2 + $0x18] sm:$0xff] %vm1320_vm3, %v1751_v31  ;;  %v1666_v4 = vadd.f32 %v4651_v0, %v1614_v20  ;;  %v1667_v38 = vadd.f32 %v4651_v0, %v1615_v33  ;;  %v1712_v62 = vmax.f32 %v1663_v26, 0.0  ;;  %v1757_v17 = vmul.f32 %v6058_v28, %v1708_v16  ;;  %v6059_v31 = vld [vmem:[#allocation14_spill] sm:$0xff]  ;;  %v6062_v16 = vld [vmem:[#allocation35_spill] sm:$0xff] }
 0x1fb   :  { %1803 = vst.msk [vmem:[#allocation2 + $0x30] sm:$0xff] %vm1320_vm3, %v1754_v27  ;;  %v1618_v15 = vmul.f32 %v4624_v37, %v6059_v31  ;;  %v1668_v58 = vadd.f32 %v4651_v0, %v1616_v32  ;;  %v1713_v53 = vmax.f32 %v1664_v49, 0.0  ;;  %v1758_v40 = vmul.f32 %v6060_v54, %v1709_v18  ;;  %v6063_v31 = vld [vmem:[#allocation17_spill] sm:$0xff]  ;;  %v6064_v18 = vld [vmem:[#allocation36_spill] sm:$0xff] }
 0x1fc   :  { %v1917_v20 = vld [vmem:[#allocation2 + $0x28] sm:$0xff]  ;;  %1805 = vst.msk [vmem:[#allocation2 + $0x40] sm:$0xff] %vm1320_vm3, %v1756_v29  ;;  %v1619_v34 = vmul.f32 %v4624_v37, %v6061_v52  ;;  %v1669_v26 = vadd.f32 %v4651_v0, %v1617_v43  ;;  %v1714_v33 = vmax.f32 %v1665_v19, 0.0  ;;  %v1759_v27 = vmul.f32 %v6062_v16, %v1710_v35  ;;  %v6067_v35 = vld [vmem:[#allocation19_spill] sm:$0xff] }
 0x1fd   :  { %1919 = vrot.lane.b32.xlu2 %v1917_v20, %s3990_s7  ;;  %v1848_v28 = vld [vmem:[#allocation2 + $0x8] sm:$0xff]  ;;  %v1620_v32 = vmul.f32 %v4624_v37, %v6063_v31  ;;  %v1670_v49 = vadd.f32 %v4651_v0, %v1618_v15  ;;  %v1715_v12 = vmax.f32 %v1666_v4, 0.0  ;;  %v1760_v54 = vmul.f32 %v6064_v18, %v1711_v24  ;;  %1806 = vst.msk [vmem:[#allocation2 + $0x48] sm:$0xff] %vm1320_vm3, %v1757_v17 }
 0x1fe   :  { %1850 = vrot.lane.b32.xlu0 %v1848_v28, %s3990_s7  ;;  %v6065_v29 = vld [vmem:[#allocation18_spill] sm:$0xff]  ;;  %v1671_v19 = vadd.f32 %v4651_v0, %v1619_v34  ;;  %v1716_v43 = vmax.f32 %v1667_v38, 0.0  ;;  %v6066_v20 = vld [vmem:[#allocation37_spill] sm:$0xff]  ;;  %v1622_v16 = vmul.f32 %v4624_v37, %v6067_v35  ;;  %v1717_v4 = vmax.f32 %v1668_v58, 0.0  ;;  %1807 = vst.msk [vmem:[#allocation2 + $0x50] sm:$0xff] %vm1320_vm3, %v1758_v40  ;;  %v6072_v38 = vld [vmem:[#allocation20_spill] sm:$0xff] }
 0x1ff   :  { %v1621_v52 = vmul.f32 %v4624_v37, %v6065_v29  ;;  %v1761_v42 = vmul.f32 %v6066_v20, %v1712_v62  ;;  %v1672_v15 = vadd.f32 %v4651_v0, %v1620_v32  ;;  %v6068_v31 = vld [vmem:[#allocation38_spill] sm:$0xff]  ;;  %v6069_v28 = vand.u32 7, %v4899_v7  ;;  %v6073_v29 = vld [vmem:[#allocation39_spill] sm:$0xff]  ;;  %1808 = vst.msk [vmem:[#allocation2 + $0x58] sm:$0xff] %vm1320_vm3, %v1759_v27  ;;  %v6074_v58 = vld [vmem:[#allocation21_spill] sm:$0xff] }
 0x200   :  { %v1762_v24 = vmul.f32 %v6068_v31, %v1713_v53  ;;  %v1623_v62 = vmul.f32 %v4624_v37, %v6072_v38  ;;  %v1718_v34 = vmax.f32 %v1669_v26, 0.0  ;;  %v1763_v20 = vmul.f32 %v6073_v29, %v1714_v33  ;;  %1809 = vst.msk [vmem:[#allocation2 + $0x60] sm:$0xff] %vm1320_vm3, %v1760_v54  ;;  %v6078_v26 = vld [vmem:[#allocation22_spill] sm:$0xff] }
 0x201   :  { %vm5021_vm14 = vcmp.lt.s32.totalorder %v6069_v28, 4  ;;  %v1673_v17 = vadd.f32 %v4651_v0, %v1621_v52  ;;  %v1624_v53 = vmul.f32 %v4624_v37, %v6074_v58  ;;  %v1674_v40 = vadd.f32 %v4651_v0, %v1622_v16  ;;  %1810 = vst.msk [vmem:[#allocation2 + $0x68] sm:$0xff] %vm1320_vm3, %v1761_v42  ;;  %v6080_v16 = vld [vmem:[#allocation24_spill] sm:$0xff]  ;;  %v6081_v42 = vld [vmem:[#allocation25_spill] sm:$0xff] }
 0x202   :  { %v1719_v7 = vmax.f32 %v1670_v49, 0.0  ;;  %v1764_v32 = vmul.f32 %v4678_v1, %v1715_v12  ;;  %v6075_v35 = vand.u32 7, %v4887_v61  ;;  %v1625_v33 = vmul.f32 %v4624_v37, %v6078_v26  ;;  %v6079_v49 = vld [vmem:[#allocation23_spill] sm:$0xff]  ;;  %1811 = vst.msk [vmem:[#allocation2 + $0x70] sm:$0xff] %vm1320_vm3, %v1762_v24  ;;  %v6082_v24 = vld [vmem:[#allocation26_spill] sm:$0xff] }
 0x203   :  { %v1675_v27 = vadd.f32 %v4651_v0, %v1623_v62  ;;  %v1720_v52 = vmax.f32 %v1671_v19, 0.0  ;;  %v1765_v28 = vmul.f32 %v4683_v5, %v1716_v43  ;;  %v1626_v1 = vmul.f32 %v4624_v37, %v6079_v49  ;;  %1812 = vst.msk [vmem:[#allocation2 + $0x78] sm:$0xff] %vm1320_vm3, %v1763_v20  ;;  %v1883_v20 = vld [vmem:[#allocation2 + $0x18] sm:$0xff] }
 0x204   :  { %vm5037_vm15 = vcmp.lt.s32.totalorder %v6075_v35, 4  ;;  %v1676_v12 = vadd.f32 %v4651_v0, %v1624_v53  ;;  %v1721_v61 = vmax.f32 %v1672_v15, 0.0  ;;  %v1766_v54 = vmul.f32 %v4720_v56, %v1717_v4  ;;  %1813 = vst.msk [vmem:[#allocation2 + $0x80] sm:$0xff] %vm1320_vm3, %v1764_v32  ;;  %v5061_v4 = vld [vmem:[#allocation2 + $0x48] sm:$0xff]  ;;  %v6083_v53 = vld [vmem:[#allocation16_spill] sm:$0xff] }
 0x205   :  { %v1627_v38 = vmul.f32 %v4624_v37, %v6080_v16  ;;  %v1677_v62 = vadd.f32 %v4651_v0, %v1625_v33  ;;  %v1722_v19 = vmax.f32 %v1673_v17, 0.0  ;;  %v1767_v5 = vmul.f32 %v4723_v55, %v1718_v34  ;;  %1814 = vst.msk [vmem:[#allocation2 + $0x88] sm:$0xff] %vm1320_vm3, %v1765_v28  ;;  %1893 = vrot.lane.b32.xlu1 %v5061_v4, %s3990_s7 }
 0x206   :  { %v1628_v43 = vmul.f32 %v4624_v37, %v6081_v42  ;;  %v1678_v29 = vadd.f32 %v4651_v0, %v1626_v1  ;;  %v1723_v15 = vmax.f32 %v1674_v40, 0.0  ;;  %v1768_v56 = vmul.f32 %v4730_v44, %v1719_v7  ;;  %1815 = vst.msk [vmem:[#allocation2 + $0x90] sm:$0xff] %vm1320_vm3, %v1766_v54  ;;  %1885 = vrot.lane.b32.xlu0 %v1883_v20, %s3990_s7 }
 0x207   :  { %v1629_v58 = vmul.f32 %v4624_v37, %v6082_v24  ;;  %v1679_v17 = vadd.f32 %v4651_v0, %v1627_v38  ;;  %v1724_v55 = vmax.f32 %v1675_v27, 0.0  ;;  %v1769_v34 = vmul.f32 %v4735_v46, %v1720_v52  ;;  %1816 = vst.msk [vmem:[#allocation2 + $0x98] sm:$0xff] %vm1320_vm3, %v1767_v5 }
 0x208   :  { %v1630_v44 = vmul.f32 %v4624_v37, %v6083_v53  ;;  %v1680_v40 = vadd.f32 %v4651_v0, %v1628_v43  ;;  %v1725_v7 = vmax.f32 %v1676_v12, 0.0  ;;  %v1770_v32 = vmul.f32 %v4740_v11, %v1721_v61  ;;  %1817 = vst.msk [vmem:[#allocation2 + $0xa0] sm:$0xff] %vm1320_vm3, %v1768_v56  ;;  %v5140_v56 = vld [vmem:[#allocation2 + $0x58] sm:$0xff] }
 0x209   :  { %v378_v46 = vand.u32 7, %v4935_v47  ;;  %v1681_v35 = vadd.f32 %v4651_v0, %v1629_v58  ;;  %v1726_v26 = vmax.f32 %v1677_v62, 0.0  ;;  %v1771_v33 = vmul.f32 %v4745_v45, %v1722_v19  ;;  %1818 = vst.msk [vmem:[#allocation2 + $0xa8] sm:$0xff] %vm1320_vm3, %v1769_v34 }
 0x20a   :  { %v6084_v37 = vand.u32 7, %v4942_v63  ;;  %v1682_v11 = vadd.f32 %v4651_v0, %v1630_v44  ;;  %v1727_v52 = vmax.f32 %v1678_v29, 0.0  ;;  %v1772_v28 = vmul.f32 %v4755_v10, %v1723_v15  ;;  %1819 = vst.msk [vmem:[#allocation2 + $0xb0] sm:$0xff] %vm1320_vm3, %v1770_v32 }
 0x20b   :  { %v98_v47 = vadd.s32 312, %v4534_v48  ;;  %v6087_v49 = vand.u32 7, %v4962_v14  ;;  %v1728_v63 = vmax.f32 %v1679_v17, 0.0  ;;  %v1773_v1 = vmul.f32 %v4765_v57, %v1724_v55  ;;  %v5104_v14 = vld [vmem:[#allocation2 + $0x78] sm:$0xff]  ;;  %1820 = vst.msk [vmem:[#allocation2 + $0xb8] sm:$0xff] %vm1320_vm3, %v1771_v33 }
 0x20c   :  { %vm5082_vm1 = vcmp.lt.s32.totalorder %v6084_v37, 4  ;;  %v3337_v0 = vsel %vm5021_vm14, 1.0, %v6005_v36  ;;  %v99_v10 = vadd.s32 320, %v4534_v48  ;;  %v1729_v12 = vmax.f32 %v1680_v40, 0.0  ;;  %1953 = vrot.lane.b32.xlu2 %v5104_v14, %s3990_s7  ;;  %1821 = vst.msk [vmem:[#allocation2 + $0xc0] sm:$0xff] %vm1320_vm3, %v1772_v28  ;;  %v5173_v33 = vld [vmem:[#allocation2 + $0x88] sm:$0xff] }
 0x20d   :  { %vm5092_vm2 = vcmp.lt.s32.totalorder %v6087_v49, 4  ;;  %v1774_v61 = vmul.f32 %v4865_v30, %v1725_v7  ;;  %v3338_v54 = vsel %vm5082_vm1, 1.0, %v6005_v36  ;;  %v100_v57 = vadd.s32 328, %v4534_v48  ;;  %1822 = vst.msk [vmem:[#allocation2 + $0xc8] sm:$0xff] %vm1320_vm3, %v1773_v1  ;;  %v6104_v28 = vld [vmem:[#allocation47_spill] sm:$0xff]  ;;  %v6105_v49 = vld [vmem:[#allocation40_spill] sm:$0xff] }
 0x20e   :  { %v1730_v16 = vmax.f32 %v1681_v35, 0.0  ;;  %v1775_v38 = vmul.f32 %v4896_v2, %v1726_v26  ;;  %v6090_v30 = vand.u32 7, %v4881_v9  ;;  %v3345_v62 = vsel %vm5037_vm15, 1.0, %v6005_v36  ;;  %1927 = vrot.lane.b32.xlu0 %v5140_v56, %s3990_s7  ;;  %v5198_v1 = vld [vmem:[#allocation2 + $0x98] sm:$0xff] }
 0x20f   :  { %v3339_v19 = vsel %vm5092_vm2, 1.0, %v6005_v36  ;;  %v1731_v2 = vmax.f32 %v1682_v11, 0.0  ;;  %v1776_v5 = vmul.f32 %v4918_v22, %v1727_v52  ;;  %v6093_v42 = vand.u32 7, %v4930_v21  ;;  %1823 = vst.msk [vmem:[#allocation2 + $0xd0] sm:$0xff] %vm1320_vm3, %v1774_v61  ;;  %v6117_v9 = vld [vmem:[#allocation44_spill] sm:$0xff] }
 0x210   :  { %vm5116_vm4 = vcmp.lt.s32.totalorder %v6090_v30, 4  ;;  %vm5134_vm6 = vcmp.lt.s32.totalorder %v378_v46, 4  ;;  %v385_v31 = vand.u32 7, %v98_v47  ;;  %v1732_v29 = vmax.f32 %v4813_v59, 0.0  ;;  %1824 = vst.msk [vmem:[#allocation2 + $0xd8] sm:$0xff] %vm1320_vm3, %v1775_v38  ;;  %v1959_v40 = vld [vmem:[#allocation2 + $0xa8] sm:$0xff] }
 0x211   :  { %vm5130_vm5 = vcmp.lt.s32.totalorder %v6093_v42, 4  ;;  %v1777_v15 = vmul.f32 %v3337_v0, %v1728_v63  ;;  %v103_v22 = vadd.s32 352, %v4534_v48  ;;  %v392_v24 = vand.u32 7, %v99_v10  ;;  %1825 = vst.msk [vmem:[#allocation2 + $0xe0] sm:$0xff] %vm1320_vm3, %v1776_v5  ;;  %1961 = vrot.lane.b32.xlu1 %v1959_v40, %s3990_s7  ;;  %v6108_v10 = vld [vmem:[#allocation41_spill] sm:$0xff] }
 0x212   :  { %v1733_v21 = vmax.f32 %v4816_v23, 0.0  ;;  %v1778_v58 = vmul.f32 %v3338_v54, %v1729_v12  ;;  %v104_v17 = vadd.s32 360, %v4534_v48  ;;  %v399_v55 = vand.u32 7, %v100_v57  ;;  %v5229_v42 = vld [vmem:[#allocation2 + $0xb8] sm:$0xff]  ;;  %v1931_v57 = vld [vmem:[#allocation2 + $0x60] sm:$0xff] }
 0x213   :  { %v1734_v59 = vmax.f32 %v4819_v3, 0.0  ;;  %v1779_v34 = vmul.f32 %v3339_v19, %v1730_v16  ;;  %v3346_v20 = vsel %vm5134_vm6, 1.0, %v6005_v36  ;;  %v105_v23 = vadd.s32 368, %v4534_v48  ;;  %1826 = vst.msk [vmem:[#allocation2 + $0xe8] sm:$0xff] %vm1320_vm3, %v1777_v15  ;;  %v6111_v16 = vld [vmem:[#allocation42_spill] sm:$0xff] }
 0x214   :  { %v1735_v53 = vmax.f32 %v4822_v41, 0.0  ;;  %v1780_v44 = vmul.f32 %v4750_v6, %v1731_v2  ;;  %vm5157_vm7 = vcmp.lt.s32.totalorder %v385_v31, 4  ;;  %v106_v3 = vadd.s32 376, %v4534_v48  ;;  %1827 = vst.msk [vmem:[#allocation2 + $0xf0] sm:$0xff] %vm1320_vm3, %v1778_v58  ;;  %1987 = vrot.lane.b32.xlu2 %v5173_v33, %s3990_s7  ;;  %v6114_v2 = vld [vmem:[#allocation43_spill] sm:$0xff] }
 0x215   :  { %v1736_v32 = vmax.f32 %v4825_v25, 0.0  ;;  %v1781_v46 = vmul.f32 %v4760_v51, %v1732_v29  ;;  %v420_v41 = vand.u32 7, %v103_v22  ;;  %vm5166_vm8 = vcmp.lt.s32.totalorder %v392_v24, 4  ;;  %1828 = vst.msk [vmem:[#allocation2 + $0xf8] sm:$0xff] %vm1320_vm3, %v1779_v34  ;;  %v6118_v24 = vld [vmem:[#allocation45_spill] sm:$0xff]  ;;  %v5279_v6 = vld [vmem:[#allocation2 + $0x90] sm:$0xff] }
 0x216   :  { %v1737_v35 = vmax.f32 %v4828_v13, 0.0  ;;  %v1782_v26 = vmul.f32 %v4854_v50, %v1733_v21  ;;  %v427_v25 = vand.u32 7, %v104_v17  ;;  %vm5175_vm9 = vcmp.lt.s32.totalorder %v399_v55, 4  ;;  %v3866_v13 = vld [vmem:[%s5929_s8 + $0x38] sm:$0xff]  ;;  %1829 = vst.msk [vmem:[#allocation2 + $0x100] sm:$0xff] %vm1320_vm3, %v1780_v44  ;;  %2021 = vrot.lane.b32.xlu0 %v5198_v1, %s3990_s7  ;;  %v5247_v17 = vld [vmem:[#allocation2 + $0xc8] sm:$0xff] }
 0x217   :  { %v1738_v37 = vmax.f32 %v4831_v8, 0.0  ;;  %v1783_v27 = vmul.f32 %v4870_v60, %v1734_v59  ;;  %v3347_v50 = vsel %vm5157_vm7, 1.0, %v6005_v36  ;;  %v434_v11 = vand.u32 7, %v105_v23  ;;  %1830 = vst.msk [vmem:[#allocation2 + $0x108] sm:$0xff] %vm1320_vm3, %v1781_v46  ;;  %2526 = vmatpush.bf16.msrb.mxu2 %v3866_v13  ;;  %v6119_v59 = vld [vmem:[#allocation46_spill] sm:$0xff]  ;;  %v5296_v13 = vld [vmem:[#allocation2 + $0xa0] sm:$0xff] }
 0x218   :  { %v1739_v52 = vmax.f32 %v4834_v39, 0.0  ;;  %v1784_v8 = vmul.f32 %v6104_v28, %v1735_v53  ;;  %v3348_v60 = vsel %vm5166_vm8, 1.0, %v6005_v36  ;;  %v441_v47 = vand.u32 7, %v106_v3  ;;  %1831 = vst.msk [vmem:[#allocation2 + $0x110] sm:$0xff] %vm1320_vm3, %v1782_v26  ;;  %v3865_v23 = vld [vmem:[%s5929_s8 + $0x30] sm:$0xff]  ;;  %v3874_v26 = vld [vmem:[%s5929_s8 + $0x78] sm:$0xff] }
 0x219   :  { %v1740_v45 = vmax.f32 %v6105_v49, 0.0  ;;  %v1785_v63 = vmul.f32 %v3345_v62, %v1736_v32  ;;  %vm5200_vm10 = vcmp.lt.s32.totalorder %v420_v41, 4  ;;  %v3349_v39 = vsel %vm5175_vm9, 1.0, %v6005_v36  ;;  %1832 = vst.msk [vmem:[#allocation2 + $0x118] sm:$0xff] %vm1320_vm3, %v1783_v27  ;;  %1995 = vrot.lane.b32.xlu1 %v5229_v42, %s3990_s7  ;;  %v5274_v41 = vld [vmem:[#allocation2 + $0x80] sm:$0xff]  ;;  %v1949_v51 = vld [vmem:[#allocation2 + $0x70] sm:$0xff]  ;;  %2559 = vmatpush.bf16.msrb.mxu3 %v3874_v26 }
 0x21a   :  { %v1741_v12 = vmax.f32 %v6108_v10, 0.0  ;;  %v1786_v61 = vmul.f32 %v3346_v20, %v1737_v35  ;;  %v3350_v54 = vsel %vm5116_vm4, 1.0, %v6005_v36  ;;  %vm5214_vm11 = vcmp.lt.s32.totalorder %v427_v25, 4  ;;  %1833 = vst.msk [vmem:[#allocation2 + $0x120] sm:$0xff] %vm1320_vm3, %v1784_v8  ;;  %v5264_v7 = vld [vmem:[#allocation2 + $0xe8] sm:$0xff]  ;;  %v1915_v25 = vld [vmem:[#allocation2 + $0x20] sm:$0xff] }
 0x21b   :  { %v1742_v38 = vmax.f32 %v6111_v16, 0.0  ;;  %v1787_v30 = vmul.f32 %v3347_v50, %v1738_v37  ;;  %v3351_v62 = vsel %vm5130_vm5, 1.0, %v6005_v36  ;;  %vm5223_vm12 = vcmp.lt.s32.totalorder %v434_v11, 4  ;;  %1834 = vst.msk [vmem:[#allocation2 + $0x128] sm:$0xff] %vm1320_vm3, %v1785_v63  ;;  %2527 = vmatpush.bf16.msrb.mxu2 %v3865_v23  ;;  %v1855_v27 = vld [vmem:[#allocation2 + $0x10] sm:$0xff]  ;;  %v1846_v11 = vld [vmem:[#allocation2] sm:$0xff] }
 0x21c   :  { %v1743_v18 = vmax.f32 %v6114_v2, 0.0  ;;  %v1788_v5 = vmul.f32 %v3348_v60, %v1739_v52  ;;  %v3352_v43 = vsel %vm5200_vm10, 1.0, %v6005_v36  ;;  %vm5234_vm13 = vcmp.lt.s32.totalorder %v441_v47, 4  ;;  %1835 = vst.msk [vmem:[#allocation2 + $0x130] sm:$0xff] %vm1320_vm3, %v1786_v61  ;;  %2029 = vrot.lane.b32.xlu2 %v5247_v17, %s3990_s7  ;;  %v5271_v46 = vld [vmem:[#allocation2 + $0xf8] sm:$0xff]  ;;  %v5309_v28 = vld [vmem:[#allocation2 + $0xf0] sm:$0xff] }
 0x21d   :  { %v1744_v29 = vmax.f32 %v6117_v9, 0.0  ;;  %v1789_v15 = vmul.f32 %v3349_v39, %v1740_v45  ;;  %v3353_v22 = vsel %vm5214_vm11, 1.0, %v6005_v36  ;;  %v1745_v21 = vmax.f32 %v6118_v24, 0.0  ;;  %1836 = vst.msk [vmem:[#allocation2 + $0x138] sm:$0xff] %vm1320_vm3, %v1787_v30  ;;  %v3864_v8 = vld [vmem:[%s5929_s8 + $0x28] sm:$0xff]  ;;  %v3873_v60 = vld [vmem:[%s5929_s8 + $0x70] sm:$0xff] }
 0x21e   :  { %v1790_v58 = vmul.f32 %v3350_v54, %v1741_v12  ;;  %v3354_v55 = vsel %vm5223_vm12, 1.0, %v6005_v36  ;;  %v1746_v34 = vmax.f32 %v6119_v59, 0.0  ;;  %v1791_v20 = vmul.f32 %v3351_v62, %v1742_v38  ;;  %1837 = vst.msk [vmem:[#allocation2 + $0x140] sm:$0xff] %vm1320_vm3, %v1788_v5  ;;  %2055 = vrot.lane.b32.xlu0 %v5264_v7, %s3990_s7  ;;  %v5298_v50 = vld [vmem:[#allocation2 + $0x108] sm:$0xff]  ;;  %2560 = vmatpush.bf16.msrb.mxu3 %v3873_v60  ;;  %v1923_v49 = vld [vmem:[#allocation2 + $0x30] sm:$0xff]  ;;  %v1863_v45 = vld [vmem:[#allocation2 + $0x40] sm:$0xff] }
 0x21f   :  { %v3355_v53 = vsel %vm5234_vm13, 1.0, %v6005_v36  ;;  %v1792_v44 = vmul.f32 %v3352_v43, %v1743_v18  ;;  %v1793_v40 = vmul.f32 %v3353_v22, %v1744_v29  ;;  %1838 = vst.msk [vmem:[#allocation2 + $0x148] sm:$0xff] %vm1320_vm3, %v1789_v15  ;;  %v1794_v3 = vmul.f32 %v3354_v55, %v1745_v21  ;;  %2528 = vmatpush.bf16.msrb.mxu2 %v3864_v8  ;;  %v5323_v47 = vld [vmem:[#allocation2 + $0x110] sm:$0xff]  ;;  %v3872_v63 = vld [vmem:[%s5929_s8 + $0x68] sm:$0xff]  ;;  %v1973_v0 = vld [vmem:[#allocation2 + $0xe0] sm:$0xff] }
 0x220   :  { %1839 = vst.msk [vmem:[#allocation2 + $0x150] sm:$0xff] %vm1320_vm3, %v1790_v58  ;;  %v1795_v32 = vmul.f32 %v3355_v53, %v1746_v34  ;;  %v2061_v35 = vld [vmem:[#allocation2 + $0x118] sm:$0xff]  ;;  %v3871_v39 = vld [vmem:[%s5929_s8 + $0x60] sm:$0xff]  ;;  %v1933_v10 = vld [vmem:[#allocation2 + $0x68] sm:$0xff]  ;;  %vm1853_vm14 = vcmask 1048064   ;;  %vm851_vm15 = vcmask 80896  }
 0x221   :  { %1840 = vst.msk [vmem:[#allocation2 + $0x158] sm:$0xff] %vm1320_vm3, %v1791_v20  ;;  %2089 = vrot.lane.b32.xlu1 %v5271_v46, %s3990_s7  ;;  %v1897_v12 = vld [vmem:[#allocation2 + $0x50] sm:$0xff]  ;;  %v1999_v16 = vld [vmem:[#allocation2 + $0xc0] sm:$0xff]  ;;  %v3870_v2 = vld [vmem:[%s5929_s8 + $0x58] sm:$0xff]  ;;  %vm3101_vm12 = vcmask 1040384  }
 0x222   :  { %1841 = vst.msk [vmem:[#allocation2 + $0x160] sm:$0xff] %vm1320_vm3, %v1792_v44  ;;  %v5290_v37 = vld [vmem:[#allocation2 + $0x128] sm:$0xff]  ;;  %2561 = vmatpush.bf16.msrb.mxu3 %v3872_v63  ;;  %v1965_v61 = vld [vmem:[#allocation2 + $0xb0] sm:$0xff]  ;;  %v2035_v5 = vld [vmem:[#allocation2 + $0xd8] sm:$0xff] }
 0x223   :  { %1842 = vst.msk [vmem:[#allocation2 + $0x168] sm:$0xff] %vm1320_vm3, %v1793_v40  ;;  %v3861_v19 = vld [vmem:[%s5929_s8 + $0x10] sm:$0xff]  ;;  %v2151_v43 = vld [vmem:[#allocation2 + $0x180] sm:$0xff]  ;;  %v3860_v9 = vld [vmem:[%s5929_s8 + $0x8] sm:$0xff] }
 0x224   :  { %1843 = vst.msk [vmem:[#allocation2 + $0x170] sm:$0xff] %vm1320_vm3, %v1794_v3  ;;  %2063 = vrot.lane.b32.xlu2 %v2061_v35, %s3990_s7  ;;  %v5305_v52 = vld [vmem:[#allocation2 + $0x138] sm:$0xff]  ;;  %v2101_v18 = vld [vmem:[#allocation2 + $0x130] sm:$0xff]  ;;  %v3868_v22 = vld [vmem:[%s5929_s8 + $0x48] sm:$0xff] }
 0x225   :  { %1844 = vst.msk [vmem:[#allocation2 + $0x178] sm:$0xff] %vm1320_vm3, %v1795_v32  ;;  %v2135_v54 = vld [vmem:[#allocation2 + $0x140] sm:$0xff]  ;;  %v3869_v31 = vld [vmem:[%s5929_s8 + $0x50] sm:$0xff]  ;;  %v3890_v34 = vld [vmem:[%s5929_s8 + $0xf8] sm:$0xff] }
 0x226   :  { %1880 = vst.msk [vmem:[#allocation3 + $0x20] sm:$0xff] %vm1320_vm3, %v5274_v41  ;;  %2097 = vrot.lane.b32.xlu0 %v5290_v37, %s3990_s7  ;;  %2562 = vmatpush.bf16.msrb.mxu3 %v3871_v39  ;;  %v2137_v21 = vld [vmem:[#allocation2 + $0x148] sm:$0xff]  ;;  %v3859_v58 = vld [vmem:[%s5929_s8] sm:$0xff]  ;;  %v3894_v20 = vld [vmem:[%s5929_s8 + $0x118] sm:$0xff] }
 0x227   :  { %1914 = vst.msk [vmem:[#allocation3 + $0x48] sm:$0xff] %vm1320_vm3, %v5279_v6  ;;  %v2075_v30 = vld [vmem:[#allocation2 + $0x150] sm:$0xff]  ;;  %v3359_v40 = vld [vmem:[%s5923_s2] sm:$0xf]  ;;  %v3882_v35 = vld [vmem:[%s5929_s8 + $0xb8] sm:$0xff] }
 0x228   :  { %1916 = vst.msk [vmem:[#allocation3 + $0x50] sm:$0xff] %vm1320_vm3, %v1915_v25  ;;  %v3889_v44 = vld [vmem:[%s5929_s8 + $0xf0] sm:$0xff]  ;;  %v3888_v26 = vld [vmem:[%s5929_s8 + $0xe8] sm:$0xff]  ;;  %v3887_v63 = vld [vmem:[%s5929_s8 + $0xe0] sm:$0xff] }
 0x229   :  { %1950 = vst.msk [vmem:[#allocation3 + $0x78] sm:$0xff] %vm1320_vm3, %v1949_v51  ;;  %2123 = vrot.lane.b32.xlu1 %v5298_v50, %s3990_s7  ;;  %v2109_v38 = vld [vmem:[#allocation2 + $0x160] sm:$0xff] }
 0x22a   :  { %1984 = vst.msk [vmem:[#allocation3 + $0xa0] sm:$0xff] %vm1320_vm3, %v5274_v41  ;;  %2563 = vmatpush.bf16.msrb.mxu3 %v3870_v2  ;;  %v2111_v29 = vld [vmem:[#allocation2 + $0x168] sm:$0xff] }
 0x22b   :  { %1856 = vst.msk [vmem:[#allocation3 + $0x8] sm:$0xff] %vm1320_vm3, %v1855_v27  ;;  %v2143_v62 = vld [vmem:[#allocation2 + $0x170] sm:$0xff] }
 0x22c   :  { %2026 = vst.msk [vmem:[#allocation3 + $0xd0] sm:$0xff] %vm1320_vm3, %v5296_v13  ;;  %2131 = vrot.lane.b32.xlu2 %v5305_v52, %s3990_s7  ;;  %v2145_v24 = vld [vmem:[#allocation2 + $0x178] sm:$0xff] }
 0x22d   :  { %1847 = vst.msk [vmem:[#allocation3] sm:$0xff] %vm1320_vm3, %v1846_v11 }
 0x22e   :  { %1890 = vst.msk [vmem:[#allocation3 + $0x30] sm:$0xff] %vm1320_vm3, %v1915_v25  ;;  %1875 = vrot.lane.b32.xlu0 %v5104_v14, %s3990_s7  ;;  %v3863_v14 = vld [vmem:[%s5929_s8 + $0x20] sm:$0xff]  ;;  %2564 = vmatpush.bf16.msrb.mxu3 %v3869_v31  ;;  %v3884_v31 = vld [vmem:[%s5929_s8 + $0xc8] sm:$0xff] }
 0x22f   :  { %2060 = vst.msk [vmem:[#allocation3 + $0xf8] sm:$0xff] %vm1320_vm3, %v5309_v28  ;;  %2529 = vmatpush.bf16.msrb.mxu2 %v3863_v14 }
 0x230   :  { %1882 = vst.msk [vmem:[#allocation3 + $0x28] sm:$0xff] %vm1320_vm3, %v1855_v27  ;;  %v3893_v27 = vld [vmem:[%s5929_s8 + $0x110] sm:$0xff] }
 0x231   :  { %1958 = vst.msk [vmem:[#allocation3 + $0x80] sm:$0xff] %vm1320_vm3, %v5274_v41  ;;  %1909 = vrot.lane.b32.xlu1 %v5173_v33, %s3990_s7  ;;  %v2033_v33 = vld [vmem:[#allocation2 + $0xd0] sm:$0xff] }
 0x232   :  { %2128 = vst.msk [vmem:[#allocation3 + $0x148] sm:$0xff] %vm1320_vm3, %v5323_v47  ;;  %2565 = vmatpush.bf16.msrb.mxu3 %v3868_v22 }
 0x233   :  { %1924 = vst.msk [vmem:[#allocation3 + $0x58] sm:$0xff] %vm1320_vm3, %v1923_v49  ;;  %v3879_v49 = vld [vmem:[%s5929_s8 + $0xa0] sm:$0xff] }
 0x234   :  { %1992 = vst.msk [vmem:[#allocation3 + $0xa8] sm:$0xff] %vm1320_vm3, %v5279_v6  ;;  %1867 = vrot.lane.b32.xlu2 %v5061_v4, %s3990_s7  ;;  %v2119_v4 = vld [vmem:[#allocation2 + $0x100] sm:$0xff] }
 0x235   :  { %1864 = vst.msk [vmem:[#allocation3 + $0x10] sm:$0xff] %vm1320_vm3, %v1863_v45 }
 0x236   :  { %2018 = vst.msk [vmem:[#allocation3 + $0xc8] sm:$0xff] %vm1320_vm3, %v5279_v6  ;;  %1901 = vrot.lane.b32.xlu0 %v5140_v56, %s3990_s7  ;;  %v3862_v56 = vld [vmem:[%s5929_s8 + $0x18] sm:$0xff] }
 0x237   :  { %2086 = vst.msk [vmem:[#allocation3 + $0x118] sm:$0xff] %vm1320_vm3, %v5309_v28  ;;  %2530 = vmatpush.bf16.msrb.mxu2 %v3862_v56 }
 0x238   :  { %1974 = vst.msk [vmem:[#allocation3 + $0x90] sm:$0xff] %vm1320_vm3, %v1973_v0 }
 0x239   :  { %2052 = vst.msk [vmem:[#allocation3 + $0xf0] sm:$0xff] %vm1320_vm3, %v1973_v0  ;;  %1943 = vrot.lane.b32.xlu1 %v5198_v1, %s3990_s7  ;;  %v2067_v1 = vld [vmem:[#allocation2 + $0x120] sm:$0xff]  ;;  %v3878_v0 = vld [vmem:[%s5929_s8 + $0x98] sm:$0xff] }
 0x23a   :  { %2120 = vst.msk [vmem:[#allocation3 + $0x140] sm:$0xff] %vm1320_vm3, %v2119_v4 }
 0x23b   :  { %2008 = vst.msk [vmem:[#allocation3 + $0xb8] sm:$0xff] %vm1320_vm3, %v5309_v28  ;;  %2531 = vmatpush.bf16.msrb.mxu2 %v3861_v19  ;;  %v3875_v19 = vld [vmem:[%s5929_s8 + $0x80] sm:$0xff] }
 0x23c   :  { %2094 = vst.msk [vmem:[#allocation3 + $0x120] sm:$0xff] %vm1320_vm3, %v2119_v4  ;;  %1977 = vrot.lane.b32.xlu2 %v5264_v7, %s3990_s7  ;;  %v3832_v7 = vld [vmem:[%s5923_s2] sm:$0x10] }
 0x23d   :  { %1906 = vst.msk [vmem:[#allocation3 + $0x40] sm:$0xff] %vm1320_vm3, %v5274_v41  ;;  %v3360_v3 = vor.u32 %v3832_v7, %v3359_v40  ;;  %v843_v41 = vld [vmem:[%s6120_s22] sm:$0xf] }
 0x23e   :  { %2034 = vst.msk [vmem:[#allocation3 + $0xd8] sm:$0xff] %vm1320_vm3, %v2033_v33  ;;  %1935 = vrot.lane.b32.xlu0 %v1933_v10, %s3990_s7  ;;  %v3877_v33 = vld [vmem:[%s5929_s8 + $0x90] sm:$0xff] }
 0x23f   :  { %1872 = vst.msk [vmem:[#allocation3 + $0x18] sm:$0xff] %vm1320_vm3, %v1949_v51  ;;  %2532 = vmatpush.bf16.msrb.mxu2 %v3860_v9  ;;  %v857_v32 = vsel %vm855_vm0, %v3360_v3, 0  ;;  %v3881_v51 = vld [vmem:[%s5929_s8 + $0xb0] sm:$0xff] }
 0x240   :  { %1940 = vst.msk [vmem:[#allocation3 + $0x68] sm:$0xff] %vm1320_vm3, %v5279_v6  ;;  %866 = vmatpush.bf16.msra.mxu0 %v857_v32 }
 0x241   :  { %2068 = vst.msk [vmem:[#allocation3 + $0x100] sm:$0xff] %vm1320_vm3, %v2067_v1  ;;  %1969 = vrot.lane.b32.xlu1 %v5229_v42, %s3990_s7  ;;  %v2077_v42 = vld [vmem:[#allocation2 + $0x158] sm:$0xff] }
 0x242   :  { %1898 = vst.msk [vmem:[#allocation3 + $0x38] sm:$0xff] %vm1320_vm3, %v1897_v12 }
 0x243   :  { %1966 = vst.msk [vmem:[#allocation3 + $0x88] sm:$0xff] %vm1320_vm3, %v1965_v61  ;;  %2533 = vmatpush.bf16.msrb.mxu2 %v3859_v58  ;;  %3361 = vmatmul.msk.bf16.vlgmr.msra.gmra.mxu0 %vm851_vm15, %v843_v41  ;;  %v3886_v61 = vld [vmem:[%s5929_s8 + $0xd8] sm:$0xff] }
 0x244   :  { %2136 = vst.msk [vmem:[#allocation3 + $0x150] sm:$0xff] %vm1320_vm3, %v2135_v54  ;;  %2011 = vrot.lane.b32.xlu2 %v5271_v46, %s3990_s7  ;;  %2592 = vmatpush.bf16.msrb.mxu0 %v3882_v35  ;;  %v3876_v54 = vld [vmem:[%s5929_s8 + $0x88] sm:$0xff] }
 0x245   :  { %1932 = vst.msk [vmem:[#allocation3 + $0x60] sm:$0xff] %vm1320_vm3, %v1931_v57  ;;  %v3892_v57 = vld [vmem:[%s5929_s8 + $0x108] sm:$0xff] }
 0x246   :  { %2000 = vst.msk [vmem:[#allocation3 + $0xb0] sm:$0xff] %vm1320_vm3, %v1999_v16  ;;  %2045 = vrot.lane.b32.xlu0 %v5298_v50, %s3990_s7 }
 0x247   :  { %2042 = vst.msk [vmem:[#allocation3 + $0xe0] sm:$0xff] %vm1320_vm3, %v2119_v4  ;;  %2625 = vmatpush.bf16.msra.mxu2 %v3890_v34 }
 0x248   :  { %2110 = vst.msk [vmem:[#allocation3 + $0x130] sm:$0xff] %vm1320_vm3, %v2109_v38  ;;  %2593 = vmatpush.bf16.msrb.mxu0 %v3881_v51 }
 0x249   :  { %2076 = vst.msk [vmem:[#allocation3 + $0x108] sm:$0xff] %vm1320_vm3, %v2075_v30  ;;  %2003 = vrot.lane.b32.xlu1 %v5247_v17, %s3990_s7  ;;  %v3867_v17 = vld [vmem:[%s5929_s8 + $0x40] sm:$0xff] }
 0x24a   :  { %2144 = vst.msk [vmem:[#allocation3 + $0x158] sm:$0xff] %vm1320_vm3, %v2143_v62  ;;  %2566 = vmatpush.bf16.msrb.mxu3 %v3867_v17 }
 0x24b   :  { %2102 = vst.msk [vmem:[#allocation3 + $0x128] sm:$0xff] %vm1320_vm3, %v2101_v18  ;;  %2626 = vmatpush.bf16.msra.mxu2 %v3889_v44 }
 0x24c   :  { %1948 = vst.msk [vmem:[#allocation3 + $0x70] sm:$0xff] %vm1320_vm3, %v5296_v13  ;;  %2037 = vrot.lane.b32.xlu2 %v2035_v5, %s3990_s7  ;;  %v3880_v13 = vld [vmem:[%s5929_s8 + $0xa8] sm:$0xff]  ;;  %v3885_v5 = vld [vmem:[%s5929_s8 + $0xd0] sm:$0xff] }
 0x24d   :  { %1982 = vst.msk [vmem:[#allocation3 + $0x98] sm:$0xff] %vm1320_vm3, %v5309_v28  ;;  %2594 = vmatpush.bf16.msrb.mxu0 %v3880_v13 }
 0x24e   :  { %2016 = vst.msk [vmem:[#allocation3 + $0xc0] sm:$0xff] %vm1320_vm3, %v2119_v4  ;;  %2079 = vrot.lane.b32.xlu0 %v2077_v42, %s3990_s7  ;;  %2662 = vmatpush.bf16.msra.mxu3 %v3894_v20 }
 0x24f   :  { %2050 = vst.msk [vmem:[#allocation3 + $0xe8] sm:$0xff] %vm1320_vm3, %v5323_v47  ;;  %2627 = vmatpush.bf16.msra.mxu2 %v3888_v26 }
 0x250   :  { %2084 = vst.msk [vmem:[#allocation3 + $0x110] sm:$0xff] %vm1320_vm3, %v2109_v38 }
 0x251   :  { %2118 = vst.msk [vmem:[#allocation3 + $0x138] sm:$0xff] %vm1320_vm3, %v2143_v62  ;;  %2113 = vrot.lane.b32.xlu1 %v2111_v29, %s3990_s7  ;;  %2595 = vmatpush.bf16.msrb.mxu0 %v3879_v49 }
 0x252   :  { %2152 = vst.msk [vmem:[#allocation3 + $0x160] sm:$0xff] %vm1320_vm3, %v2151_v43  ;;  %2663 = vmatpush.bf16.msra.mxu3 %v3893_v27 }
 0x253   :  { %2628 = vmatpush.bf16.msra.mxu2 %v3887_v63 }
 0x254   :  { %2071 = vrot.lane.b32.xlu2 %v5290_v37, %s3990_s7 }
 0x255   :  { %2596 = vmatpush.bf16.msrb.mxu0 %v3878_v0  ;;  %v2157_v0 = vld [vmem:[#allocation3 + $0x20] sm:$0xff] }
 0x256   :  { %2105 = vrot.lane.b32.xlu0 %v5305_v52, %s3990_s7  ;;  %2664 = vmatpush.bf16.msra.mxu3 %v3892_v57  ;;  %v2172_v57 = vld [vmem:[#allocation3 + $0x98] sm:$0xff] }
 0x257   :  { %v1920_v15 = vpop.permute.xlu2 %1919  ;;  %2629 = vmatpush.bf16.msra.mxu2 %v3886_v61 }
 0x258   :  { %1922 = vst.msk [vmem:[#allocation3 + $0x50] sm:$0xff] %vm1853_vm14, %v1920_v15 }
 0x259   :  { %2147 = vrot.lane.b32.xlu1 %v2145_v24, %s3990_s7  ;;  %2597 = vmatpush.bf16.msrb.mxu0 %v3877_v33 }
 0x25b   :  { %2630 = vmatpush.bf16.msra.mxu2 %v3885_v5  ;;  %v2177_v5 = vld [vmem:[#allocation3 + $0xc0] sm:$0xff] }
 0x25c   :  { %2139 = vrot.lane.b32.xlu2 %v2137_v21, %s3990_s7 }
 0x25d   :  { %2598 = vmatpush.bf16.msrb.mxu0 %v3876_v54  ;;  %v2167_v54 = vld [vmem:[#allocation3 + $0x70] sm:$0xff] }
 0x25f   :  { %v2163_v38 = vld [vmem:[#allocation3 + $0x50] sm:$0xff]  ;;  %2631 = vmatpush.bf16.msra.mxu2 %v3884_v31 }
 0x261   :  { %2599 = vmatpush.bf16.msrb.mxu0 %v3875_v19  ;;  %v2207_v19 = vpack.c.bf16 %v2172_v57, %v2167_v54  ;;  %v3906_v54 = vld [vmem:[%s5932_s11 + $0x54] sm:$0xf0]  ;;  %v3674_v57 = vld [vmem:[%s5932_s11 + $0x40] sm:$0xf] }
 0x266   :  { %v1954_v59 = vpop.permute.xlu2 %1953 }
 0x267   :  { %1956 = vst.msk [vmem:[#allocation3 + $0x78] sm:$0xff] %vm1853_vm14, %v1954_v59  ;;  %v3891_v59 = vld [vmem:[%s5929_s8 + $0x100] sm:$0xff] }
 0x268   :  { %2665 = vmatpush.bf16.msra.mxu3 %v3891_v59 }
 0x269   :  { %v1860_v55 = vpop.permute.xlu1 %1859 }
 0x26a   :  { %1862 = vst.msk [vmem:[#allocation3 + $0x8] sm:$0xff] %vm1853_vm14, %v1860_v55 }
 0x26e   :  { %v1988_v23 = vpop.permute.xlu2 %1987  ;;  %v2168_v1 = vld [vmem:[#allocation3 + $0x78] sm:$0xff] }
 0x26f   :  { %1990 = vst.msk [vmem:[#allocation3 + $0xa0] sm:$0xff] %vm1853_vm14, %v1988_v23  ;;  %v2203_v62 = vpack.c.bf16 %v2168_v1, %v2163_v38 }
 0x270   :  { %v1851_v53 = vpop.permute.xlu0 %1850 }
 0x271   :  { %1854 = vst.msk [vmem:[#allocation3] sm:$0xff] %vm1853_vm14, %v1851_v53  ;;  %v2154_v50 = vld [vmem:[#allocation3 + $0x8] sm:$0xff]  ;;  %v3883_v53 = vld [vmem:[%s5929_s8 + $0xc0] sm:$0xff] }
 0x272   :  { %2632 = vmatpush.bf16.msra.mxu2 %v3883_v53 }
 0x276   :  { %v2030_v46 = vpop.permute.xlu2 %2029  ;;  %v2173_v21 = vld [vmem:[#allocation3 + $0xa0] sm:$0xff] }
 0x277   :  { %2032 = vst.msk [vmem:[#allocation3 + $0xd0] sm:$0xff] %vm1853_vm14, %v2030_v46  ;;  %v1894_v6 = vpop.permute.xlu1 %1893 }
 0x278   :  { %1896 = vst.msk [vmem:[#allocation3 + $0x30] sm:$0xff] %vm1853_vm14, %v1894_v6  ;;  %v1886_v25 = vpop.permute.xlu0 %1885  ;;  %v2153_v28 = vld [vmem:[#allocation3] sm:$0xff] }
 0x279   :  { %1888 = vst.msk [vmem:[#allocation3 + $0x28] sm:$0xff] %vm1853_vm14, %v1886_v25 }
 0x27e   :  { %v2064_v37 = vpop.permute.xlu2 %2063  ;;  %v2179_v22 = vld [vmem:[#allocation3 + $0xd0] sm:$0xff] }
 0x27f   :  { %2066 = vst.msk [vmem:[#allocation3 + $0xf8] sm:$0xff] %vm1853_vm14, %v2064_v37  ;;  %v2159_v11 = vld [vmem:[#allocation3 + $0x30] sm:$0xff] }
 0x280   :  { %v1928_v52 = vpop.permute.xlu0 %1927  ;;  %v2158_v8 = vld [vmem:[#allocation3 + $0x28] sm:$0xff]  ;;  %v2199_v60 = vpack.c.bf16 %v2159_v11, %v2154_v50 }
 0x281   :  { %1930 = vst.msk [vmem:[#allocation3 + $0x58] sm:$0xff] %vm1853_vm14, %v1928_v52  ;;  %v2198_v47 = vpack.c.bf16 %v2158_v8, %v2153_v28 }
 0x282   :  { %2567 = vmatmul.bf16.vlgmr.msrb.gmra.mxu3 %v2199_v60 }
 0x283   :  { %v1962_v45 = vpop.permute.xlu1 %1961  ;;  %2534 = vmatmul.bf16.vlgmr.msrb.gmra.mxu2 %v2198_v47 }
 0x284   :  { %1964 = vst.msk [vmem:[#allocation3 + $0x80] sm:$0xff] %vm1853_vm14, %v1962_v45 }
 0x286   :  { %v2132_v14 = vpop.permute.xlu2 %2131  ;;  %v2184_v32 = vld [vmem:[#allocation3 + $0xf8] sm:$0xff] }
 0x287   :  { %2134 = vst.msk [vmem:[#allocation3 + $0x148] sm:$0xff] %vm1853_vm14, %v2132_v14 }
 0x288   :  { %v2022_v4 = vpop.permute.xlu0 %2021  ;;  %v2164_v10 = vld [vmem:[#allocation3 + $0x58] sm:$0xff] }
 0x289   :  { %2024 = vst.msk [vmem:[#allocation3 + $0xc8] sm:$0xff] %vm1853_vm14, %v2022_v4  ;;  %v2162_v4 = vld [vmem:[#allocation3 + $0x48] sm:$0xff] }
 0x28b   :  { %v1996_v56 = vpop.permute.xlu1 %1995  ;;  %v2169_v12 = vld [vmem:[#allocation3 + $0x80] sm:$0xff] }
 0x28c   :  { %1998 = vst.msk [vmem:[#allocation3 + $0xa8] sm:$0xff] %vm1853_vm14, %v1996_v56  ;;  %v2204_v30 = vpack.c.bf16 %v2169_v12, %v2164_v10  ;;  %v2202_v10 = vpack.c.bf16 %v2162_v4, %v2157_v0  ;;  %v2197_v4 = vld [vmem:[#allocation3 + $0x160] sm:$0xff] }
 0x28e   :  { %v1868_v39 = vpop.permute.xlu2 %1867  ;;  %v2194_v50 = vld [vmem:[#allocation3 + $0x148] sm:$0xff] }
 0x28f   :  { %1870 = vst.msk [vmem:[#allocation3 + $0x10] sm:$0xff] %vm1853_vm14, %v1868_v39  ;;  %v2219_v60 = vpack.c.bf16 %v2194_v50, %v2194_v50 }
 0x290   :  { %v2056_v16 = vpop.permute.xlu0 %2055  ;;  %v2178_v15 = vld [vmem:[#allocation3 + $0xc8] sm:$0xff] }
 0x291   :  { %2058 = vst.msk [vmem:[#allocation3 + $0xf0] sm:$0xff] %vm1853_vm14, %v2056_v16  ;;  %v2208_v17 = vpack.c.bf16 %v2178_v15, %v2173_v21 }
 0x292   :  { %2572 = vmatmul.bf16.gmra.mxu3 %v2204_v30 }
 0x293   :  { %v2090_v2 = vpop.permute.xlu1 %2089  ;;  %2539 = vmatmul.bf16.gmra.mxu2 %v2203_v62  ;;  %v2174_v29 = vld [vmem:[#allocation3 + $0xa8] sm:$0xff] }
 0x294   :  { %2092 = vst.msk [vmem:[#allocation3 + $0x118] sm:$0xff] %vm1853_vm14, %v2090_v2  ;;  %v2209_v58 = vpack.c.bf16 %v2179_v22, %v2174_v29 }
 0x296   :  { %v1978_v18 = vpop.permute.xlu2 %1977  ;;  %v2155_v6 = vld [vmem:[#allocation3 + $0x10] sm:$0xff] }
 0x297   :  { %1980 = vst.msk [vmem:[#allocation3 + $0x90] sm:$0xff] %vm1853_vm14, %v1978_v18 }
 0x298   :  { %v2098_v42 = vpop.permute.xlu0 %2097  ;;  %v2183_v7 = vld [vmem:[#allocation3 + $0xf0] sm:$0xff] }
 0x299   :  { %2100 = vst.msk [vmem:[#allocation3 + $0x120] sm:$0xff] %vm1853_vm14, %v2098_v42  ;;  %v2182_v42 = vld [vmem:[#allocation3 + $0xe8] sm:$0xff] }
 0x29a   :  { %v2212_v29 = vpack.c.bf16 %v2182_v42, %v2177_v5 }
 0x29b   :  { %v2124_v43 = vpop.permute.xlu1 %2123  ;;  %v2188_v3 = vld [vmem:[#allocation3 + $0x118] sm:$0xff] }
 0x29c   :  { %2126 = vst.msk [vmem:[#allocation3 + $0x140] sm:$0xff] %vm1853_vm14, %v2124_v43  ;;  %v2213_v26 = vpack.c.bf16 %v2188_v3, %v2183_v7 }
 0x29e   :  { %v2012_v9 = vpop.permute.xlu2 %2011  ;;  %v2171_v62 = vld [vmem:[#allocation3 + $0x90] sm:$0xff] }
 0x29f   :  { %2014 = vst.msk [vmem:[#allocation3 + $0xb8] sm:$0xff] %vm1853_vm14, %v2012_v9 }
 0x2a0   :  { %v1876_v24 = vpop.permute.xlu0 %1875  ;;  %v2189_v40 = vld [vmem:[#allocation3 + $0x120] sm:$0xff] }
 0x2a1   :  { %1878 = vst.msk [vmem:[#allocation3 + $0x18] sm:$0xff] %vm1853_vm14, %v1876_v24  ;;  %v2214_v41 = vpack.c.bf16 %v2189_v40, %v2184_v32  ;;  %v2192_v40 = vld [vmem:[#allocation3 + $0x138] sm:$0xff] }
 0x2a2   :  { %2577 = vmatmul.bf16.gmra.mxu3 %v2209_v58 }
 0x2a3   :  { %v1910_v55 = vpop.permute.xlu1 %1909  ;;  %2544 = vmatmul.bf16.gmra.mxu2 %v2208_v17  ;;  %v2193_v11 = vld [vmem:[#allocation3 + $0x140] sm:$0xff] }
 0x2a4   :  { %1912 = vst.msk [vmem:[#allocation3 + $0x40] sm:$0xff] %vm1853_vm14, %v1910_v55  ;;  %v2218_v47 = vpack.c.bf16 %v2193_v11, %v2193_v11 }
 0x2a6   :  { %v2038_v34 = vpop.permute.xlu2 %2037  ;;  %v2176_v9 = vld [vmem:[#allocation3 + $0xb8] sm:$0xff] }
 0x2a7   :  { %2040 = vst.msk [vmem:[#allocation3 + $0xd8] sm:$0xff] %vm1853_vm14, %v2038_v34 }
 0x2a8   :  { %v1902_v20 = vpop.permute.xlu0 %1901  ;;  %v2156_v56 = vld [vmem:[#allocation3 + $0x18] sm:$0xff] }
 0x2a9   :  { %1904 = vst.msk [vmem:[#allocation3 + $0x38] sm:$0xff] %vm1853_vm14, %v1902_v20 }
 0x2ab   :  { %v1944_v23 = vpop.permute.xlu1 %1943  ;;  %v2161_v39 = vld [vmem:[#allocation3 + $0x40] sm:$0xff] }
 0x2ac   :  { %1946 = vst.msk [vmem:[#allocation3 + $0x68] sm:$0xff] %vm1853_vm14, %v1944_v23  ;;  %v2201_v61 = vpack.c.bf16 %v2161_v39, %v2156_v56 }
 0x2ae   :  { %v2072_v44 = vpop.permute.xlu2 %2071  ;;  %v2180_v1 = vld [vmem:[#allocation3 + $0xd8] sm:$0xff] }
 0x2af   :  { %2074 = vst.msk [vmem:[#allocation3 + $0x100] sm:$0xff] %vm1853_vm14, %v2072_v44  ;;  %v2187_v44 = vld [vmem:[#allocation3 + $0x110] sm:$0xff] }
 0x2b0   :  { %v1936_v46 = vpop.permute.xlu0 %1935  ;;  %v2160_v35 = vld [vmem:[#allocation3 + $0x38] sm:$0xff] }
 0x2b1   :  { %1938 = vst.msk [vmem:[#allocation3 + $0x60] sm:$0xff] %vm1853_vm14, %v1936_v46  ;;  %v2200_v25 = vpack.c.bf16 %v2160_v35, %v2155_v6  ;;  %v2217_v35 = vpack.c.bf16 %v2192_v40, %v2187_v44 }
 0x2b2   :  { %2582 = vmatmul.bf16.gmra.mxu3 %v2214_v41 }
 0x2b3   :  { %v1970_v51 = vpop.permute.xlu1 %1969  ;;  %2549 = vmatmul.bf16.gmra.mxu2 %v2213_v26  ;;  %2600 = vmatmul.bf16.vlgmr.msrb.gmra.mxu0 %v2200_v25  ;;  %v2166_v38 = vld [vmem:[#allocation3 + $0x68] sm:$0xff] }
 0x2b4   :  { %1972 = vst.msk [vmem:[#allocation3 + $0x88] sm:$0xff] %vm1853_vm14, %v1970_v51  ;;  %v2206_v18 = vpack.c.bf16 %v2171_v62, %v2166_v38 }
 0x2b6   :  { %v2140_v37 = vpop.permute.xlu2 %2139  ;;  %v2185_v30 = vld [vmem:[#allocation3 + $0x100] sm:$0xff] }
 0x2b7   :  { %2142 = vst.msk [vmem:[#allocation3 + $0x150] sm:$0xff] %vm1853_vm14, %v2140_v37 }
 0x2b8   :  { %v2046_v27 = vpop.permute.xlu0 %2045  ;;  %v2165_v52 = vld [vmem:[#allocation3 + $0x60] sm:$0xff] }
 0x2b9   :  { %2048 = vst.msk [vmem:[#allocation3 + $0xe0] sm:$0xff] %vm1853_vm14, %v2046_v27 }
 0x2bb   :  { %v2004_v13 = vpop.permute.xlu1 %2003  ;;  %v2170_v28 = vld [vmem:[#allocation3 + $0x88] sm:$0xff] }
 0x2bc   :  { %2006 = vst.msk [vmem:[#allocation3 + $0xb0] sm:$0xff] %vm1853_vm14, %v2004_v13  ;;  %v2205_v49 = vpack.c.bf16 %v2170_v28, %v2165_v52 }
 0x2be   :  { %v2195_v43 = vld [vmem:[#allocation3 + $0x150] sm:$0xff] }
 0x2bf   :  { %v2220_v15 = vpack.c.bf16 %v2195_v43, %v2195_v43 }
 0x2c0   :  { %v2080_v8 = vpop.permute.xlu0 %2079  ;;  %v2181_v31 = vld [vmem:[#allocation3 + $0xe0] sm:$0xff]  ;;  %v5543_v24 = vpop.f32.mrf.mxu0 }
 0x2c1   :  { %2082 = vst.msk [vmem:[#allocation3 + $0x108] sm:$0xff] %vm1853_vm14, %v2080_v8  ;;  %v2211_v22 = vpack.c.bf16 %v2181_v31, %v2176_v9  ;;  %v874_v21 = vrot.slane %v5543_v24, 4  ;;  %v881_v58 = vmul.f32 %v5543_v24, %v5543_v24  ;;  %v3698_v8 = vld [vmem:[%s5932_s11 + $0x70] sm:$0xf]  ;;  %v3902_v9 = vld [vmem:[%s5932_s11 + $0x34] sm:$0xf0] }
 0x2c2   :  { %2587 = vmatmul.bf16.gmra.mxu3 %v2219_v60  ;;  %v3910_v60 = vld [vmem:[%s5932_s11 + $0x74] sm:$0xf0]  ;;  %v3666_v31 = vld [vmem:[%s5932_s11 + $0x30] sm:$0xf] }
 0x2c3   :  { %v2114_v45 = vpop.permute.xlu1 %2113  ;;  %2554 = vmatmul.bf16.gmra.mxu2 %v2218_v47  ;;  %2605 = vmatmul.bf16.gmra.mxu0 %v2205_v49  ;;  %v2175_v33 = vld [vmem:[#allocation3 + $0xb0] sm:$0xff]  ;;  %v875_v17 = vadd.f32 %v874_v21, %v5543_v24  ;;  %v882_v55 = vrot.slane %v881_v58, 4  ;;  %v3699_v47 = vor.u32 %v3910_v60, %v3698_v8  ;;  %v3690_v49 = vld [vmem:[%s5932_s11 + $0x60] sm:$0xf]  ;;  %v3667_v21 = vor.u32 %v3902_v9, %v3666_v31 }
 0x2c4   :  { %2116 = vst.msk [vmem:[#allocation3 + $0x130] sm:$0xff] %vm1853_vm14, %v2114_v45  ;;  %v2210_v12 = vpack.c.bf16 %v2180_v1, %v2175_v33  ;;  %v3908_v45 = vld [vmem:[%s5932_s11 + $0x64] sm:$0xf0]  ;;  %v2222_v1 = vpack.c.bf16 %v2197_v4, %v2197_v4 }
 0x2c5   :  { %v876_v59 = vrot.slane %v875_v17, 2  ;;  %v883_v34 = vadd.f32 %v882_v55, %v881_v58  ;;  %2986 = vmatpush.bf16.msra.mxu0 %v3699_v47  ;;  %v3900_v58 = vld [vmem:[%s5932_s11 + $0x24] sm:$0xf0] }
 0x2c7   :  { %v877_v20 = vadd.f32 %v876_v59, %v875_v17  ;;  %v884_v23 = vrot.slane %v883_v34, 2 }
 0x2c8   :  { %v2106_v14 = vpop.permute.xlu0 %2105  ;;  %v870_v53 = vpop.f32.mrf.mxu0  ;;  %v2186_v32 = vld [vmem:[#allocation3 + $0x108] sm:$0xff] }
 0x2c9   :  { %2108 = vst.msk [vmem:[#allocation3 + $0x128] sm:$0xff] %vm1853_vm14, %v2106_v14  ;;  %v878_v7 = vrot.slane %v877_v20, 1  ;;  %v885_v3 = vadd.f32 %v884_v23, %v883_v34 }
 0x2cb   :  { %v2148_v63 = vpop.permute.xlu1 %2147  ;;  %v2191_v46 = vld [vmem:[#allocation3 + $0x130] sm:$0xff]  ;;  %v879_v41 = vadd.f32 %v878_v7, %v877_v20  ;;  %v886_v6 = vrot.slane %v885_v3, 1  ;;  %v873_v20 = vld [vmem:[%s5925_s4] sm:$0x1] }
 0x2cc   :  { %2150 = vst.msk [vmem:[#allocation3 + $0x158] sm:$0xff] %vm1853_vm14, %v2148_v63  ;;  %v2216_v26 = vpack.c.bf16 %v2191_v46, %v2186_v32  ;;  %v3691_v63 = vor.u32 %v3908_v45, %v3690_v49  ;;  %v3650_v32 = vld [vmem:[%s5932_s11 + $0x10] sm:$0xf]  ;;  %v3898_v46 = vld [vmem:[%s5932_s11 + $0x14] sm:$0xf0]  ;;  %vm3289_vm14 = vcmask 257024  }
 0x2cd   :  { %v5549_v25 = vmul.f32 0.25, %v879_v41  ;;  %v887_v51 = vadd.f32 %v886_v6, %v885_v3  ;;  %v3642_v41 = vld [vmem:[%s5932_s11] sm:$0xf]  ;;  %v3651_v6 = vor.u32 %v3898_v46, %v3650_v32 }
 0x2ce   :  { %2987 = vmatpush.bf16.msra.mxu0 %v3691_v63 }
 0x2cf   :  { %v888_v37 = vmul.f32 0.25, %v887_v51  ;;  %v889_v27 = vmul.f32 %v5549_v25, %v5549_v25 }
 0x2d0   :  { %v2190_v16 = vld [vmem:[#allocation3 + $0x128] sm:$0xff] }
 0x2d1   :  { %v2215_v2 = vpack.c.bf16 %v2190_v16, %v2185_v30  ;;  %v890_v50 = vsub.f32 %v888_v37, %v889_v27  ;;  %v3904_v30 = vld [vmem:[%s5932_s11 + $0x44] sm:$0xf0] }
 0x2d2   :  { %3635 = vmatmul.msk.bf16.vlgmr.msra.gmra.mxu3 %vm1320_vm3, %v2202_v10 }
 0x2d3   :  { %2610 = vmatmul.bf16.gmra.mxu0 %v2210_v12  ;;  %2633 = vmatmul.bf16.vlgmr.msra.gmra.mxu2 %v2201_v61  ;;  %v891_v28 = vmax.f32 %v890_v50, 0.0  ;;  %v2196_v56 = vld [vmem:[#allocation3 + $0x158] sm:$0xff]  ;;  %v3682_v61 = vld [vmem:[%s5932_s11 + $0x50] sm:$0xf] }
 0x2d4   :  { %v2221_v12 = vpack.c.bf16 %v2196_v56, %v2196_v56  ;;  %v3683_v38 = vor.u32 %v3906_v54, %v3682_v61 }
 0x2d5   :  { %v892_v14 = vadd.f32 1e-05, %v891_v28 }
 0x2d6   :  { %2988 = vmatpush.bf16.msra.mxu0 %v3683_v38 }
 0x2d7   :  { %3954 = vrsqrt.f32 %v892_v14  ;;  %vm899_vm0 = vweird.f32 %v892_v14 }
 0x2dd   :  { %v3955_v10 = vpop.eup %3954 }
 0x2de   :  { %v894_v16 = vmul.f32 %v3955_v10, %v892_v14  ;;  %vm900_vm1 = vweird.f32 %v3955_v10 }
 0x2df   :  { %vm901_vm2 = vmor %vm899_vm0, %vm900_vm1 }
 0x2e0   :  { %v895_v62 = vmul.f32 %v3955_v10, %v894_v16 }
 0x2e2   :  { %3636 = vmatmul.msk.bf16.gmra.mxu3 %vm1320_vm3, %v2207_v19  ;;  %v3675_v19 = vor.u32 %v3904_v30, %v3674_v57 }
 0x2e3   :  { %2615 = vmatmul.bf16.gmra.mxu0 %v2215_v2  ;;  %2638 = vmatmul.bf16.gmra.mxu2 %v2206_v18  ;;  %v896_v18 = vmul.f32 0.5, %v895_v62 }
 0x2e4   :  { %2989 = vmatpush.bf16.msra.mxu0 %v3675_v19 }
 0x2e5   :  { %v897_v43 = vsub.f32 1.5, %v896_v18 }
 0x2e8   :  { %2990 = vmatpush.bf16.msra.mxu0 %v3667_v21 }
 0x2f2   :  { %3637 = vmatmul.msk.bf16.gmra.mxu3 %vm1320_vm3, %v2212_v29  ;;  %v3658_v29 = vld [vmem:[%s5932_s11 + $0x20] sm:$0xf] }
 0x2f3   :  { %2620 = vmatmul.bf16.gmra.mxu0 %v2220_v15  ;;  %2643 = vmatmul.bf16.gmra.mxu2 %v2211_v22  ;;  %v872_v15 = vld [vmem:[%s5924_s3] sm:$0x1]  ;;  %v898_v22 = vmul.f32 %v3955_v10, %v897_v43  ;;  %v3659_v55 = vor.u32 %v3900_v58, %v3658_v29 }
 0x2f5   :  { %v902_v17 = vsel %vm901_vm2, %v3955_v10, %v898_v22  ;;  %2991 = vmatpush.bf16.msra.mxu0 %v3659_v55 }
 0x2f6   :  { %v903_v59 = vmul.f32 %v902_v17, %v872_v15 }
 0x2f8   :  { %v904_v53 = vmul.f32 %v903_v59, %v5549_v25  ;;  %v907_v44 = vperm.slane %v903_v59, 0 }
 0x2f9   :  { %2992 = vmatpush.bf16.msra.mxu0 %v3651_v6 }
 0x2fa   :  { %v905_v7 = vsub.f32 %v873_v20, %v904_v53  ;;  %v909_v3 = vmul.f32 %v907_v44, %v5543_v24 }
 0x302   :  { %3638 = vmatmul.msk.bf16.gmra.mxu3 %vm1320_vm3, %v2217_v35  ;;  %v3896_v35 = vld [vmem:[%s5932_s11 + $0x4] sm:$0xf0] }
 0x303   :  { %2648 = vmatmul.bf16.gmra.mxu2 %v2216_v26  ;;  %v911_v26 = vperm.slane %v905_v7, 0  ;;  %v3643_v24 = vor.u32 %v3896_v35, %v3642_v41 }
 0x305   :  { %v2568_v13 = vpop.f32.mrf.mxu3  ;;  %v913_v25 = vadd.f32 %v911_v26, %v909_v3  ;;  %2993 = vmatpush.bf16.msra.mxu0 %v3643_v24 }
 0x306   :  { %v2535_v11 = vpop.f32.mrf.mxu2 }
 0x307   :  { %v5554_v52 = vadd.f32 %v2568_v13, %v2535_v11  ;;  %v914_v27 = vmax.f32 %v913_v25, 0.0 }
 0x30d   :  { %v2570_v0 = vpop.f32.mrf.mxu3 }
 0x30e   :  { %v2537_v33 = vpop.f32.mrf.mxu2 }
 0x30f   :  { %v5568_v39 = vadd.f32 %v2570_v0, %v2537_v33 }
 0x312   :  { %3639 = vmatmul.msk.bf16.gmra.mxu3 %vm1320_vm3, %v2222_v1  ;;  %vm57_vm3 = vcmp.lt.s32.totalorder %v4534_v48, 4 }
 0x313   :  { %2653 = vmatmul.bf16.gmra.mxu2 %v2221_v12  ;;  %v5617_v50 = vsel %vm57_vm3, 1.0, %v6005_v36 }
 0x314   :  { %v915_v11 = vmul.f32 %v5617_v50, %v914_v27 }
 0x315   :  { %v2573_v2 = vpop.f32.mrf.mxu3 }
 0x316   :  { %v2540_v5 = vpop.f32.mrf.mxu2  ;;  %v5620_v28 = vpack.c.bf16 %v915_v11, %v915_v11 }
 0x317   :  { %v2574_v42 = vadd.f32 %v2573_v2, %v2540_v5 }
 0x318   :  { %2994 = vmatmul.bf16.vlgmr.msra.gmra.mxu0 %v5620_v28 }
 0x31d   :  { %v2575_v34 = vpop.f32.mrf.mxu3 }
 0x31e   :  { %v2542_v23 = vpop.f32.mrf.mxu2 }
 0x31f   :  { %v2576_v40 = vadd.f32 %v2575_v34, %v2542_v23 }
 0x325   :  { %v2578_v51 = vpop.f32.mrf.mxu3 }
 0x326   :  { %v2545_v37 = vpop.f32.mrf.mxu2 }
 0x327   :  { %v2579_v13 = vadd.f32 %v2578_v51, %v2545_v37 }
 0x32d   :  { %v2580_v8 = vpop.f32.mrf.mxu3 }
 0x32e   :  { %v2547_v60 = vpop.f32.mrf.mxu2 }
 0x32f   :  { %v2581_v47 = vadd.f32 %v2580_v8, %v2547_v60 }
 0x330   :  { %v2601_v49 = vpop.f32.mrf.mxu0 }
 0x331   :  { %v2602_v45 = vadd.f32 %v2601_v49, %v5554_v52 }
 0x335   :  { %v2583_v14 = vpop.f32.mrf.mxu3 }
 0x336   :  { %v2550_v63 = vpop.f32.mrf.mxu2 }
 0x337   :  { %v2584_v0 = vadd.f32 %v2583_v14, %v2550_v63 }
 0x338   :  { %v2603_v48 = vpop.f32.mrf.mxu0 }
 0x339   :  { %v2604_v4 = vadd.f32 %v2603_v48, %v5568_v39 }
 0x33d   :  { %v2585_v36 = vpop.f32.mrf.mxu3 }
 0x33e   :  { %v2552_v33 = vpop.f32.mrf.mxu2 }
 0x33f   :  { %v5625_v56 = vadd.f32 %v2585_v36, %v2552_v33 }
 0x340   :  { %v2606_v1 = vpop.f32.mrf.mxu0 }
 0x341   :  { %v2607_v10 = vadd.f32 %v2606_v1, %v2574_v42 }
 0x345   :  { %v2588_v12 = vpop.f32.mrf.mxu3 }
 0x346   :  { %v2555_v61 = vpop.f32.mrf.mxu2 }
 0x347   :  { %v5627_v54 = vadd.f32 %v2588_v12, %v2555_v61 }
 0x348   :  { %v2608_v57 = vpop.f32.mrf.mxu0 }
 0x349   :  { %v2609_v16 = vadd.f32 %v2608_v57, %v2576_v40 }
 0x34d   :  { %v2590_v38 = vpop.f32.mrf.mxu3 }
 0x34e   :  { %v2557_v52 = vpop.f32.mrf.mxu2 }
 0x350   :  { %v2611_v30 = vpop.f32.mrf.mxu0 }
 0x351   :  { %v2612_v6 = vadd.f32 %v2611_v30, %v2579_v13 }
 0x355   :  { %v2667_v62 = vpop.f32.mrf.mxu3 }
 0x356   :  { %v2634_v19 = vpop.f32.mrf.mxu2 }
 0x357   :  { %v2635_v18 = vadd.f32 %v2634_v19, %v2602_v45 }
 0x358   :  { %v2613_v2 = vpop.f32.mrf.mxu0 }
 0x359   :  { %v5629_v43 = vadd.f32 %v2667_v62, %v2635_v18  ;;  %v2614_v8 = vadd.f32 %v2613_v2, %v2581_v47 }
 0x35b   :  { %v2706_v29 = vmul.f32 %v5629_v43, %v5629_v43 }
 0x35d   :  { %v2669_v39 = vpop.f32.mrf.mxu3 }
 0x35e   :  { %v2636_v5 = vpop.f32.mrf.mxu2 }
 0x35f   :  { %v2637_v31 = vadd.f32 %v2636_v5, %v2604_v4 }
 0x360   :  { %v2616_v9 = vpop.f32.mrf.mxu0 }
 0x361   :  { %v5631_v42 = vadd.f32 %v2669_v39, %v2637_v31  ;;  %v2617_v4 = vadd.f32 %v2616_v9, %v2584_v0 }
 0x363   :  { %v2691_v15 = vadd.f32 %v5631_v42, %v5629_v43  ;;  %v2707_v22 = vmul.f32 %v5631_v42, %v5631_v42 }
 0x365   :  { %v2715_v21 = vadd.f32 %v2707_v22, %v2706_v29  ;;  %v2672_v58 = vpop.f32.mrf.mxu3 }
 0x366   :  { %v2639_v17 = vpop.f32.mrf.mxu2 }
 0x367   :  { %v2640_v55 = vadd.f32 %v2639_v17, %v2607_v10 }
 0x368   :  { %v2618_v59 = vpop.f32.mrf.mxu0 }
 0x369   :  { %v5639_v34 = vadd.f32 %v2672_v58, %v2640_v55  ;;  %v2619_v57 = vadd.f32 %v2618_v59, %v5625_v56 }
 0x36b   :  { %v2692_v20 = vadd.f32 %v2691_v15, %v5639_v34  ;;  %v2708_v23 = vmul.f32 %v5639_v34, %v5639_v34 }
 0x36d   :  { %v2716_v53 = vadd.f32 %v2715_v21, %v2708_v23  ;;  %v2674_v44 = vpop.f32.mrf.mxu3 }
 0x36e   :  { %v2641_v40 = vpop.f32.mrf.mxu2 }
 0x36f   :  { %v2642_v7 = vadd.f32 %v2641_v40, %v2609_v16 }
 0x370   :  { %v2621_v3 = vpop.f32.mrf.mxu0 }
 0x371   :  { %v5644_v32 = vadd.f32 %v2674_v44, %v2642_v7  ;;  %v2622_v2 = vadd.f32 %v2621_v3, %v5627_v54 }
 0x373   :  { %v2693_v46 = vadd.f32 %v2692_v20, %v5644_v32  ;;  %v2709_v41 = vmul.f32 %v5644_v32, %v5644_v32 }
 0x375   :  { %v2717_v35 = vadd.f32 %v2716_v53, %v2709_v41  ;;  %v2677_v26 = vpop.f32.mrf.mxu3 }
 0x376   :  { %v2644_v24 = vpop.f32.mrf.mxu2 }
 0x377   :  { %v2645_v25 = vadd.f32 %v2644_v24, %v2612_v6 }
 0x378   :  { %v2623_v51 = vpop.f32.mrf.mxu0 }
 0x379   :  { %v5649_v37 = vadd.f32 %v2677_v26, %v2645_v25 }
 0x37b   :  { %v2694_v27 = vadd.f32 %v2693_v46, %v5649_v37  ;;  %v2710_v11 = vmul.f32 %v5649_v37, %v5649_v37 }
 0x37d   :  { %v2718_v60 = vadd.f32 %v2717_v35, %v2710_v11  ;;  %v2679_v49 = vpop.f32.mrf.mxu3 }
 0x37e   :  { %v2646_v45 = vpop.f32.mrf.mxu2 }
 0x37f   :  { %v2647_v14 = vadd.f32 %v2646_v45, %v2614_v8  ;;  %v3925_v8 = vld [vmem:[%s5932_s11 + $0xf4] sm:$0xf] }
 0x381   :  { %v5654_v63 = vadd.f32 %v2679_v49, %v2647_v14  ;;  %v3923_v49 = vld [vmem:[%s5932_s11 + $0xe4] sm:$0xf] }
 0x383   :  { %v2695_v13 = vadd.f32 %v2694_v27, %v5654_v63  ;;  %v2711_v48 = vmul.f32 %v5654_v63, %v5654_v63 }
 0x385   :  { %v2719_v36 = vadd.f32 %v2718_v60, %v2711_v48  ;;  %v2682_v33 = vpop.f32.mrf.mxu3  ;;  %v3764_v60 = vld [vmem:[%s5932_s11 + $0xf8] sm:$0xf0]  ;;  %v3756_v48 = vld [vmem:[%s5932_s11 + $0xe8] sm:$0xf0] }
 0x386   :  { %v2649_v1 = vpop.f32.mrf.mxu2 }
 0x387   :  { %v2650_v10 = vadd.f32 %v2649_v1, %v2617_v4  ;;  %v3762_v4 = vld [vmem:[%s5932_s11 + $0xf0] sm:$0xf] }
 0x389   :  { %v5659_v12 = vadd.f32 %v2682_v33, %v2650_v10  ;;  %v2733_v33 = vld [vmem:[%s5930_s9] sm:$0x1]  ;;  %v3759_v10 = vor.u32 %v3923_v49, %v3756_v48  ;;  %v3916_v48 = vld [vmem:[%s5932_s11 + $0xa4] sm:$0xf0] }
 0x38b   :  { %v2696_v47 = vadd.f32 %v2695_v13, %v5659_v12  ;;  %v2712_v61 = vmul.f32 %v5659_v12, %v5659_v12  ;;  %v3767_v13 = vor.u32 %v3925_v8, %v3764_v60  ;;  %v3724_v8 = vld [vmem:[%s5932_s11 + $0xa8] sm:$0xf0] }
 0x38d   :  { %v2720_v16 = vadd.f32 %v2719_v36, %v2712_v61  ;;  %v2684_v38 = vpop.f32.mrf.mxu3  ;;  %v3926_v36 = vld [vmem:[%s5932_s11 + $0xf4] sm:$0xf0]  ;;  %3025 = vmatpush.bf16.msrb.mxu2 %v3767_v13  ;;  %v3754_v61 = vld [vmem:[%s5932_s11 + $0xe0] sm:$0xf] }
 0x38e   :  { %v2651_v52 = vpop.f32.mrf.mxu2  ;;  %v3722_v13 = vld [vmem:[%s5932_s11 + $0xa0] sm:$0xf] }
 0x38f   :  { %v2652_v30 = vadd.f32 %v2651_v52, %v2619_v57  ;;  %v3924_v57 = vld [vmem:[%s5932_s11 + $0xe4] sm:$0xf0] }
 0x391   :  { %v5665_v62 = vadd.f32 %v2684_v38, %v2652_v30  ;;  %v3748_v38 = vld [vmem:[%s5932_s11 + $0xd8] sm:$0xf0]  ;;  %v3755_v30 = vor.u32 %v3924_v57, %v3754_v61  ;;  %3026 = vmatpush.bf16.msrb.mxu2 %v3759_v10 }
 0x392   :  { %v3716_v10 = vld [vmem:[%s5932_s11 + $0x98] sm:$0xf0] }
 0x393   :  { %v2697_v0 = vadd.f32 %v2696_v47, %v5665_v62  ;;  %v2713_v19 = vmul.f32 %v5665_v62, %v5665_v62  ;;  %v3763_v47 = vor.u32 %v3926_v36, %v3762_v4 }
 0x395   :  { %v2721_v18 = vadd.f32 %v2720_v16, %v2713_v19  ;;  %v2687_v39 = vpop.f32.mrf.mxu3  ;;  %v5685_v45 = vpop.f32.mrf.mxu0  ;;  %v3921_v16 = vld [vmem:[%s5932_s11 + $0xd4] sm:$0xf]  ;;  %2999 = vmatpush.bf16.msrb.mxu0 %v3763_v47  ;;  %v3723_v47 = vor.u32 %v3916_v48, %v3722_v13 }
 0x396   :  { %v2654_v5 = vpop.f32.mrf.mxu2 }
 0x397   :  { %v2655_v31 = vadd.f32 %v2654_v5, %v2622_v2  ;;  %v3740_v2 = vld [vmem:[%s5932_s11 + $0xc8] sm:$0xf0]  ;;  %v2746_v5 = vld [vmem:[%s5931_s10] sm:$0x1]  ;;  %s3296_s10 = sshll.u32 %s3991_s17, 4  ;;  %s3297_s10 = int_to_ptr.vmem [resolvable:$true] %s3296_s10 }
 0x399   :  { %v5671_v9 = vadd.f32 %v2687_v39, %v2655_v31  ;;  %v3922_v39 = vld [vmem:[%s5932_s11 + $0xd4] sm:$0xf0]  ;;  %v3751_v31 = vor.u32 %v3921_v16, %v3748_v38  ;;  %3000 = vmatpush.bf16.msrb.mxu0 %v3755_v30  ;;  %v3714_v16 = vld [vmem:[%s5932_s11 + $0x90] sm:$0xf] }
 0x39a   :  { %v3914_v38 = vld [vmem:[%s5932_s11 + $0x94] sm:$0xf0] }
 0x39b   :  { %v2698_v56 = vadd.f32 %v2697_v0, %v5671_v9  ;;  %v2714_v29 = vmul.f32 %v5671_v9, %v5671_v9  ;;  %v3919_v0 = vld [vmem:[%s5932_s11 + $0xc4] sm:$0xf]  ;;  %3027 = vmatpush.bf16.msrb.mxu2 %v3751_v31  ;;  %v3706_v31 = vld [vmem:[%s5932_s11 + $0x80] sm:$0xf] }
 0x39d   :  { %v2699_v15 = vrot.slane %v2698_v56, 4  ;;  %v2722_v22 = vadd.f32 %v2721_v18, %v2714_v29  ;;  %v2689_v21 = vpop.f32.mrf.mxu3  ;;  %v3746_v18 = vld [vmem:[%s5932_s11 + $0xd0] sm:$0xf] }
 0x39e   :  { %v2656_v58 = vpop.f32.mrf.mxu2  ;;  %v3747_v21 = vor.u32 %v3922_v39, %v3746_v18  ;;  %v3715_v18 = vor.u32 %v3914_v38, %v3714_v16 }
 0x39f   :  { %v2700_v17 = vadd.f32 %v2699_v15, %v2698_v56  ;;  %v2723_v55 = vrot.slane %v2722_v22, 4  ;;  %v2997_v15 = vpop.f32.mrf.mxu0  ;;  %v3738_v58 = vld [vmem:[%s5932_s11 + $0xc0] sm:$0xf] }
 0x3a0   :  { %3001 = vmatpush.bf16.msrb.mxu0 %v3747_v21  ;;  %v3700_v15 = vld [vmem:[%s5932_s11 + $0x78] sm:$0xf0] }
 0x3a1   :  { %v2701_v59 = vrot.slane %v2700_v17, 2  ;;  %v2724_v20 = vadd.f32 %v2723_v55, %v2722_v22  ;;  %v3743_v22 = vor.u32 %v3919_v0, %v3740_v2  ;;  %v3708_v2 = vld [vmem:[%s5932_s11 + $0x88] sm:$0xf0] }
 0x3a3   :  { %v2702_v54 = vadd.f32 %v2701_v59, %v2700_v17  ;;  %v2725_v23 = vrot.slane %v2724_v20, 2  ;;  %3028 = vmatpush.bf16.msrb.mxu2 %v3743_v22 }
 0x3a5   :  { %v2703_v53 = vrot.slane %v2702_v54, 1  ;;  %v2726_v44 = vadd.f32 %v2725_v23, %v2724_v20  ;;  %v3917_v23 = vld [vmem:[%s5932_s11 + $0xb4] sm:$0xf] }
 0x3a7   :  { %v2704_v40 = vadd.f32 %v2703_v53, %v2702_v54  ;;  %v2727_v7 = vrot.slane %v2726_v44, 1  ;;  %v3920_v54 = vld [vmem:[%s5932_s11 + $0xc4] sm:$0xf0]  ;;  %v3732_v53 = vld [vmem:[%s5932_s11 + $0xb8] sm:$0xf0] }
 0x3a9   :  { %v2705_v3 = vmul.f32 0.027777778, %v2704_v40  ;;  %v2728_v46 = vadd.f32 %v2727_v7, %v2726_v44 }
 0x3ab   :  { %v2729_v41 = vmul.f32 0.027777778, %v2728_v46  ;;  %v2730_v6 = vmul.f32 %v2705_v3, %v2705_v3  ;;  %v3739_v46 = vor.u32 %v3920_v54, %v3738_v58  ;;  %v2790_v54 = vmul.f32 0.11111111, %v5617_v50  ;;  %v3684_v50 = vld [vmem:[%s5932_s11 + $0x58] sm:$0xf0] }
 0x3ad   :  { %v2731_v35 = vsub.f32 %v2729_v41, %v2730_v6  ;;  %v3735_v41 = vor.u32 %v3917_v23, %v3732_v53  ;;  %3002 = vmatpush.bf16.msrb.mxu0 %v3739_v46  ;;  %v3907_v23 = vld [vmem:[%s5932_s11 + $0x64] sm:$0xf]  ;;  %v3692_v53 = vld [vmem:[%s5932_s11 + $0x68] sm:$0xf0] }
 0x3ae   :  { %v3676_v46 = vld [vmem:[%s5932_s11 + $0x48] sm:$0xf0] }
 0x3af   :  { %v2732_v26 = vmax.f32 %v2731_v35, 0.0  ;;  %3029 = vmatpush.bf16.msrb.mxu2 %v3735_v41 }
 0x3b1   :  { %v2734_v24 = vadd.f32 1e-05, %v2732_v26 }
 0x3b3   :  { %3956 = vrsqrt.f32 %v2734_v24  ;;  %vm2741_vm5 = vweird.f32 %v2734_v24 }
 0x3b9   :  { %v3957_v25 = vpop.eup %3956 }
 0x3ba   :  { %v2736_v51 = vmul.f32 %v3957_v25, %v2734_v24  ;;  %vm2742_vm4 = vweird.f32 %v3957_v25 }
 0x3bb   :  { %vm2743_vm6 = vmor %vm2741_vm5, %vm2742_vm4 }
 0x3bc   :  { %v2737_v27 = vmul.f32 %v3957_v25, %v2736_v51 }
 0x3be   :  { %v2738_v11 = vmul.f32 0.5, %v2737_v27 }
 0x3c0   :  { %v2739_v14 = vsub.f32 1.5, %v2738_v11  ;;  %v3915_v11 = vld [vmem:[%s5932_s11 + $0xa4] sm:$0xf] }
 0x3c1   :  { %v3727_v4 = vor.u32 %v3915_v11, %v3724_v8  ;;  %v3934_v11 = vld [vmem:[%s5935_s14 + $0x38] sm:$0xff] }
 0x3c2   :  { %v2740_v1 = vmul.f32 %v3957_v25, %v2739_v14  ;;  %3263 = vmatpush.bf16.msrb.mxu3 %v3934_v11  ;;  %v3928_v11 = vld [vmem:[%s5935_s14 + $0x8] sm:$0xff] }
 0x3c3   :  { %3030 = vmatpush.bf16.msrb.mxu2 %v3727_v4 }
 0x3c4   :  { %v2744_v52 = vsel %vm2743_vm6, %v3957_v25, %v2740_v1  ;;  %v3913_v1 = vld [vmem:[%s5932_s11 + $0x94] sm:$0xf] }
 0x3c5   :  { %v2745_v19 = vmul.f32 %v2744_v52, %v2733_v33  ;;  %v3719_v52 = vor.u32 %v3913_v1, %v3716_v10 }
 0x3c7   :  { %v2747_v56 = vmul.f32 %v2745_v19, %v2705_v3  ;;  %v2750_v29 = vperm.slane %v2745_v19, 0  ;;  %v3911_v19 = vld [vmem:[%s5932_s11 + $0x84] sm:$0xf]  ;;  %3031 = vmatpush.bf16.msrb.mxu2 %v3719_v52 }
 0x3c8   :  { %v3711_v22 = vor.u32 %v3911_v19, %v3708_v2 }
 0x3c9   :  { %v2748_v17 = vsub.f32 %v2746_v5, %v2747_v56  ;;  %v2752_v55 = vmul.f32 %v2750_v29, %v5629_v43  ;;  %v2753_v59 = vmul.f32 %v2750_v29, %v5631_v42  ;;  %v2754_v20 = vmul.f32 %v2750_v29, %v5639_v34  ;;  %v3912_v56 = vld [vmem:[%s5932_s11 + $0x84] sm:$0xf0] }
 0x3ca   :  { %v2755_v44 = vmul.f32 %v2750_v29, %v5644_v32  ;;  %v2756_v43 = vmul.f32 %v2750_v29, %v5649_v37  ;;  %v2757_v42 = vmul.f32 %v2750_v29, %v5654_v63  ;;  %v2758_v34 = vmul.f32 %v2750_v29, %v5659_v12  ;;  %v3730_v32 = vld [vmem:[%s5932_s11 + $0xb0] sm:$0xf]  ;;  %v3918_v37 = vld [vmem:[%s5932_s11 + $0xb4] sm:$0xf0] }
 0x3cb   :  { %v2759_v40 = vmul.f32 %v2750_v29, %v5665_v62  ;;  %v2760_v7 = vmul.f32 %v2750_v29, %v5671_v9  ;;  %v2762_v3 = vperm.slane %v2748_v17, 0  ;;  %v3731_v60 = vor.u32 %v3918_v37, %v3730_v32  ;;  %v3909_v29 = vld [vmem:[%s5932_s11 + $0x74] sm:$0xf]  ;;  %3032 = vmatpush.bf16.msrb.mxu2 %v3711_v22  ;;  %v3660_v32 = vld [vmem:[%s5932_s11 + $0x28] sm:$0xf0] }
 0x3cc   :  { %v3707_v17 = vor.u32 %v3912_v56, %v3706_v31 }
 0x3cd   :  { %v2764_v6 = vadd.f32 %v2762_v3, %v2752_v55  ;;  %v2765_v35 = vadd.f32 %v2762_v3, %v2753_v59  ;;  %v2766_v26 = vadd.f32 %v2762_v3, %v2754_v20  ;;  %v2767_v24 = vadd.f32 %v2762_v3, %v2755_v44  ;;  %3003 = vmatpush.bf16.msrb.mxu0 %v3731_v60  ;;  %v3933_v60 = vld [vmem:[%s5935_s14 + $0x30] sm:$0xff] }
 0x3ce   :  { %v2768_v63 = vadd.f32 %v2762_v3, %v2756_v43  ;;  %v2769_v12 = vadd.f32 %v2762_v3, %v2757_v42  ;;  %v2770_v62 = vadd.f32 %v2762_v3, %v2758_v34  ;;  %v2771_v9 = vadd.f32 %v2762_v3, %v2759_v40  ;;  %v3905_v34 = vld [vmem:[%s5932_s11 + $0x54] sm:$0xf]  ;;  %3264 = vmatpush.bf16.msrb.mxu3 %v3933_v60  ;;  %v3938_v60 = vld [vmem:[%s5935_s14 + $0x58] sm:$0xff] }
 0x3cf   :  { %v2772_v25 = vadd.f32 %v2762_v3, %v2760_v7  ;;  %v2773_v51 = vmax.f32 %v2764_v6, 0.0  ;;  %v2774_v27 = vmax.f32 %v2765_v35, 0.0  ;;  %v2775_v49 = vmax.f32 %v2766_v26, 0.0  ;;  %v3903_v3 = vld [vmem:[%s5932_s11 + $0x44] sm:$0xf] }
 0x3d0   :  { %v2776_v36 = vmax.f32 %v2767_v24, 0.0  ;;  %v2777_v61 = vmax.f32 %v2768_v63, 0.0  ;;  %v2778_v30 = vmax.f32 %v2769_v12, 0.0  ;;  %v2779_v39 = vmax.f32 %v2770_v62, 0.0  ;;  %v3901_v6 = vld [vmem:[%s5932_s11 + $0x34] sm:$0xf] }
 0x3d1   :  { %v2782_v14 = vadd.f32 %v2774_v27, %v2773_v51  ;;  %3004 = vmatpush.bf16.msrb.mxu0 %v3723_v47  ;;  %v2780_v21 = vmax.f32 %v2771_v9, 0.0  ;;  %v2781_v55 = vmax.f32 %v2772_v25, 0.0  ;;  %v3703_v20 = vor.u32 %v3909_v29, %v3700_v15  ;;  %v3668_v35 = vld [vmem:[%s5932_s11 + $0x38] sm:$0xf0]  ;;  %v3899_v24 = vld [vmem:[%s5932_s11 + $0x24] sm:$0xf] }
 0x3d2   :  { %v3695_v43 = vor.u32 %v3907_v23, %v3692_v53  ;;  %v3687_v7 = vor.u32 %v3905_v34, %v3684_v50  ;;  %v3679_v41 = vor.u32 %v3903_v3, %v3676_v46  ;;  %v3671_v26 = vor.u32 %v3901_v6, %v3668_v35  ;;  %v3897_v63 = vld [vmem:[%s5932_s11 + $0x14] sm:$0xf]  ;;  %v3652_v12 = vld [vmem:[%s5932_s11 + $0x18] sm:$0xf0]  ;;  %v3895_v9 = vld [vmem:[%s5932_s11 + $0x4] sm:$0xf] }
 0x3d3   :  { %v2783_v33 = vadd.f32 %v2782_v14, %v2775_v49  ;;  %v3663_v37 = vor.u32 %v3899_v24, %v3660_v32  ;;  %v3655_v62 = vor.u32 %v3897_v63, %v3652_v12  ;;  %v3644_v25 = vld [vmem:[%s5932_s11 + $0x8] sm:$0xf0]  ;;  %v3942_v46 = vld [vmem:[%s5935_s14 + $0x78] sm:$0xff]  ;;  %v3931_v6 = vld [vmem:[%s5935_s14 + $0x20] sm:$0xff] }
 0x3d4   :  { %v3647_v51 = vor.u32 %v3895_v9, %v3644_v25  ;;  %v3941_v35 = vld [vmem:[%s5935_s14 + $0x70] sm:$0xff]  ;;  %v3930_v24 = vld [vmem:[%s5935_s14 + $0x18] sm:$0xff]  ;;  %v3940_v32 = vld [vmem:[%s5935_s14 + $0x68] sm:$0xff] }
 0x3d5   :  { %v2784_v57 = vadd.f32 %v2783_v33, %v2776_v36  ;;  %3005 = vmatpush.bf16.msrb.mxu0 %v3715_v18  ;;  %v3939_v9 = vld [vmem:[%s5935_s14 + $0x60] sm:$0xff] }
 0x3d7   :  { %v2785_v0 = vadd.f32 %v2784_v57, %v2777_v61 }
 0x3d9   :  { %v2786_v5 = vadd.f32 %v2785_v0, %v2778_v30  ;;  %3006 = vmatpush.bf16.msrb.mxu0 %v3707_v17 }
 0x3db   :  { %v2787_v58 = vadd.f32 %v2786_v5, %v2779_v39 }
 0x3dd   :  { %v2788_v59 = vadd.f32 %v2787_v58, %v2780_v21  ;;  %3012 = vmatpush.bf16.msra.mxu0 %v3703_v20 }
 0x3df   :  { %v2789_v44 = vadd.f32 %v2788_v59, %v2781_v55 }
 0x3e1   :  { %v2791_v42 = vmul.f32 %v2790_v54, %v2789_v44  ;;  %3013 = vmatpush.bf16.msra.mxu0 %v3695_v43 }
 0x3e3   :  { %v2793_v40 = vpack.c.bf16 %v2791_v42, %v2791_v42 }
 0x3e5   :  { %3033 = vmatmul.bf16.vlgmr.msrb.gmra.mxu2 %v2793_v40  ;;  %3007 = vmatmul.bf16.vlgmr.msrb.gmra.mxu0 %v2793_v40 }
 0x3e6   :  { %3014 = vmatpush.bf16.msra.mxu0 %v3687_v7  ;;  %v3932_v7 = vld [vmem:[%s5935_s14 + $0x28] sm:$0xff] }
 0x3e7   :  { %3265 = vmatpush.bf16.msrb.mxu3 %v3932_v7 }
 0x3ea   :  { %3015 = vmatpush.bf16.msra.mxu0 %v3679_v41 }
 0x3eb   :  { %3266 = vmatpush.bf16.msrb.mxu3 %v3931_v6 }
 0x3ee   :  { %3016 = vmatpush.bf16.msra.mxu0 %v3671_v26 }
 0x3ef   :  { %3267 = vmatpush.bf16.msrb.mxu3 %v3930_v24 }
 0x3f2   :  { %3017 = vmatpush.bf16.msra.mxu0 %v3663_v37 }
 0x3f6   :  { %3018 = vmatpush.bf16.msra.mxu0 %v3655_v62  ;;  %v3929_v62 = vld [vmem:[%s5935_s14 + $0x10] sm:$0xff] }
 0x3f7   :  { %3268 = vmatpush.bf16.msrb.mxu3 %v3929_v62 }
 0x3fa   :  { %3019 = vmatpush.bf16.msra.mxu0 %v3647_v51 }
 0x3fb   :  { %3269 = vmatpush.bf16.msrb.mxu3 %v3928_v11 }
 0x3fd   :  { %3020 = vmatmul.bf16.vlgmr.msra.gmra.mxu0 %v5620_v28 }
 0x3fe   :  { %3276 = vmatpush.bf16.msrb.mxu0 %v3942_v46 }
 0x402   :  { %3277 = vmatpush.bf16.msrb.mxu0 %v3941_v35 }
 0x406   :  { %3278 = vmatpush.bf16.msrb.mxu0 %v3940_v32 }
 0x40a   :  { %3279 = vmatpush.bf16.msrb.mxu0 %v3939_v9 }
 0x40e   :  { %3280 = vmatpush.bf16.msrb.mxu0 %v3938_v60 }
 0x462   :  { %v3008_v27 = vpop.f32.mrf.mxu0 }
 0x463   :  { %v5843_v8 = vadd.f32 %v3008_v27, %v5685_v45 }
 0x465   :  { %v3040_v49 = vrot.slane %v5843_v8, 4  ;;  %v3054_v14 = vmul.f32 %v5843_v8, %v5843_v8 }
 0x467   :  { %v3041_v28 = vadd.f32 %v3040_v49, %v5843_v8  ;;  %v3056_v13 = vrot.slane %v3054_v14, 4 }
 0x468   :  { %v3034_v48 = vpop.f32.mrf.mxu2 }
 0x469   :  { %v3042_v4 = vrot.slane %v3041_v28, 2  ;;  %v3057_v36 = vadd.f32 %v3056_v13, %v3054_v14  ;;  %v3927_v13 = vld [vmem:[%s5935_s14] sm:$0xff] }
 0x46a   :  { %v3010_v33 = vpop.f32.mrf.mxu0  ;;  %3270 = vmatpush.bf16.msrb.mxu3 %v3927_v13 }
 0x46b   :  { %v3043_v45 = vadd.f32 %v3042_v4, %v3041_v28  ;;  %v3058_v1 = vrot.slane %v3057_v36, 2 }
 0x46d   :  { %v3044_v10 = vrot.slane %v3043_v45, 1  ;;  %v3059_v47 = vadd.f32 %v3058_v1, %v3057_v36  ;;  %v3038_v36 = vld [vmem:[%s5933_s12] sm:$0x3] }
 0x46f   :  { %v3045_v57 = vadd.f32 %v3044_v10, %v3043_v45  ;;  %v3060_v16 = vrot.slane %v3059_v47, 1  ;;  %v3936_v10 = vld [vmem:[%s5935_s14 + $0x48] sm:$0xff] }
 0x470   :  { %v3036_v61 = vpop.f32.mrf.mxu2 }
 0x471   :  { %v5852_v38 = vmul.f32 0.25, %v3045_v57  ;;  %v3061_v52 = vadd.f32 %v3060_v16, %v3059_v47  ;;  %v3935_v16 = vld [vmem:[%s5935_s14 + $0x40] sm:$0xff] }
 0x473   :  { %v3068_v30 = vmul.f32 0.25, %v3061_v52  ;;  %v3070_v0 = vmul.f32 %v5852_v38, %v5852_v38 }
 0x475   :  { %v3072_v18 = vsub.f32 %v3068_v30, %v3070_v0 }
 0x477   :  { %v3074_v29 = vmax.f32 %v3072_v18, 0.0 }
 0x479   :  { %v3076_v55 = vadd.f32 1e-05, %v3074_v29 }
 0x47a   :  { %v3021_v19 = vpop.f32.mrf.mxu0 }
 0x47b   :  { %v5856_v2 = vadd.f32 %v3034_v48, %v3021_v19  ;;  %3958 = vrsqrt.f32 %v3076_v55  ;;  %v3937_v48 = vld [vmem:[%s5935_s14 + $0x50] sm:$0xff]  ;;  %vm3084_vm11 = vweird.f32 %v3076_v55  ;;  %v3039_v19 = vld [vmem:[%s5934_s13] sm:$0x3] }
 0x47c   :  { %3281 = vmatpush.bf16.msrb.mxu0 %v3937_v48 }
 0x47d   :  { %v3046_v39 = vrot.slane %v5856_v2, 4  ;;  %v3055_v5 = vmul.f32 %v5856_v2, %v5856_v2 }
 0x47f   :  { %v3047_v31 = vadd.f32 %v3046_v39, %v5856_v2  ;;  %v3062_v56 = vrot.slane %v3055_v5, 4 }
 0x480   :  { %3282 = vmatpush.bf16.msrb.mxu0 %v3936_v10 }
 0x481   :  { %v3048_v15 = vrot.slane %v3047_v31, 2  ;;  %v3063_v22 = vadd.f32 %v3062_v56, %v3055_v5  ;;  %v3959_v50 = vpop.eup %3958 }
 0x482   :  { %v3023_v21 = vpop.f32.mrf.mxu0  ;;  %v3079_v41 = vmul.f32 %v3959_v50, %v3076_v55  ;;  %vm3085_vm8 = vweird.f32 %v3959_v50 }
 0x483   :  { %v3049_v58 = vadd.f32 %v3048_v15, %v3047_v31  ;;  %v3064_v17 = vrot.slane %v3063_v22, 2  ;;  %vm3086_vm13 = vmor %vm3084_vm11, %vm3085_vm8 }
 0x484   :  { %v3080_v26 = vmul.f32 %v3959_v50, %v3079_v41  ;;  %3283 = vmatpush.bf16.msrb.mxu0 %v3935_v16 }
 0x485   :  { %v3050_v59 = vrot.slane %v3049_v58, 1  ;;  %v3065_v20 = vadd.f32 %v3064_v17, %v3063_v22 }
 0x486   :  { %v3081_v63 = vmul.f32 0.5, %v3080_v26 }
 0x487   :  { %v3051_v54 = vadd.f32 %v3050_v59, %v3049_v58  ;;  %v3066_v23 = vrot.slane %v3065_v20, 1  ;;  %v3951_v59 = vld [vmem:[%s5936_s15] ss:$0 sm:$0xff] }
 0x488   :  { %v3082_v51 = vsub.f32 1.5, %v3081_v63 }
 0x489   :  { %v3053_v53 = vmul.f32 0.25, %v3051_v54  ;;  %v3067_v44 = vadd.f32 %v3066_v23, %v3065_v20 }
 0x48a   :  { %v3083_v14 = vmul.f32 %v3959_v50, %v3082_v51 }
 0x48b   :  { %v3069_v43 = vmul.f32 0.25, %v3067_v44  ;;  %v3071_v42 = vmul.f32 %v3053_v53, %v3053_v53 }
 0x48c   :  { %v3087_v45 = vsel %vm3086_vm13, %v3959_v50, %v3083_v14 }
 0x48d   :  { %v3073_v34 = vsub.f32 %v3069_v43, %v3071_v42 }
 0x48f   :  { %v3075_v40 = vmax.f32 %v3073_v34, 0.0 }
 0x491   :  { %v3077_v3 = vadd.f32 1e-05, %v3075_v40 }
 0x493   :  { %3960 = vrsqrt.f32 %v3077_v3  ;;  %vm3094_vm9 = vweird.f32 %v3077_v3 }
 0x499   :  { %v3961_v37 = vpop.eup %3960 }
 0x49a   :  { %v3089_v12 = vmul.f32 %v3961_v37, %v3077_v3  ;;  %vm3095_vm7 = vweird.f32 %v3961_v37 }
 0x49b   :  { %vm3096_vm10 = vmor %vm3094_vm9, %vm3095_vm7 }
 0x49c   :  { %v3090_v25 = vmul.f32 %v3961_v37, %v3089_v12 }
 0x49e   :  { %v3091_v27 = vmul.f32 0.5, %v3090_v25 }
 0x4a0   :  { %v3092_v49 = vsub.f32 1.5, %v3091_v27 }
 0x4a2   :  { %v3093_v28 = vmul.f32 %v3961_v37, %v3092_v49 }
 0x4a4   :  { %v3097_v4 = vsel %vm3096_vm10, %v3961_v37, %v3093_v28 }
 0x4a5   :  { %v3100_v33 = vrot.slane %v3097_v4, 7 }
 0x4a7   :  { %v3102_v1 = vsel %vm3101_vm12, %v3087_v45, %v3100_v33 }
 0x4a8   :  { %v3104_v47 = vmul.f32 %v3102_v1, %v3038_v36 }
 0x4aa   :  { %v3106_v61 = vperm.slane %v3104_v47, 0  ;;  %v3107_v57 = vperm.slane %v3104_v47, 1 }
 0x4ac   :  { %v3111_v52 = vmul.f32 %v3107_v57, %v3053_v53  ;;  %v3110_v30 = vmul.f32 %v3106_v61, %v5852_v38  ;;  %v3119_v5 = vmul.f32 %v3107_v57, %v5856_v2  ;;  %v3118_v31 = vmul.f32 %v3106_v61, %v5843_v8 }
 0x4ae   :  { %v3114_v0 = vrot.slane %v3111_v52, 7 }
 0x4b0   :  { %v3115_v18 = vsel %vm3101_vm12, %v3110_v30, %v3114_v0 }
 0x4b1   :  { %v3117_v39 = vsub.f32 %v3039_v19, %v3115_v18 }
 0x4b3   :  { %v3121_v56 = vperm.slane %v3117_v39, 0  ;;  %v3122_v29 = vperm.slane %v3117_v39, 1 }
 0x4b5   :  { %v3125_v15 = vadd.f32 %v3121_v56, %v3118_v31  ;;  %v3126_v22 = vadd.f32 %v3122_v29, %v3119_v5 }
 0x4b7   :  { %v3127_v21 = vmax.f32 %v3125_v15, 0.0  ;;  %v3128_v58 = vmax.f32 %v3126_v22, 0.0 }
 0x4b9   :  { %v3129_v38 = vpack.c.bf16 %v3127_v21, %v3127_v21  ;;  %v3130_v17 = vpack.c.bf16 %v3128_v58, %v3128_v58 }
 0x4bb   :  { %3271 = vmatmul.bf16.vlgmr.msrb.gmra.mxu3 %v3129_v38  ;;  %3284 = vmatmul.bf16.vlgmr.msrb.gmra.mxu0 %v3130_v17 }
 0x538   :  { %v3285_v55 = vpop.f32.mrf.mxu0 }
 0x53e   :  { %v3272_v20 = vpop.f32.mrf.mxu3 }
 0x53f   :  { %v3273_v8 = vadd.f32 %v3951_v59, %v3272_v20 }
 0x540   :  { %v3287_v2 = vpop.f32.mrf.mxu0 }
 0x541   :  { %v3286_v54 = vadd.f32 %v3285_v55, %v3273_v8 }
 0x543   :  { %3290 = vst.msk [vmem:[#allocation4] sm:$0xf] %vm3289_vm14, %v3286_v54 }
 0x544   :  { %3301 = dma.vmem_to_hbm [thread:$0]  %s3297_s10, 64, %s3299_s20, [#allocation5]  }
 0x546   :  { %v3274_v23 = vpop.f32.mrf.mxu3 }
 0x547   :  { %3986 = dma.done.wait [#allocation5], 64  }
 0x548   :  { %3987 = vsyncadd [#allocation5], 4294967232 }
 0x549   :  { %3306 = vsyncpa [#allocation5], 1 }

</bundles_post_ra>
